<compile_context>
chip_gen: v7x
topology: tpu7x:2x2x1
jax: 0.10.0
libtpu: 0.0.40
codegen_flags: <defaults>
</compile_context>

<pallas_src>
import functools
import math

import jax
import jax.numpy as jnp
from jax.experimental import pallas as pl
from jax.experimental.pallas import tpu as pltpu

D = 512          # feature / hidden / output dim, hardcoded to 512 in the module
EPS = 1e-5       # BatchNorm1d default eps


# --------------------------------------------------------------------------
# Fused SimSiam kernel: projection MLP (3 layers) + prediction MLP (2 layers)
# One grid step = one modality; both views are handled inside the body.
# --------------------------------------------------------------------------
def fused_simsiam_kernel(x_ref, w_ref, v_ref, z_ref, p_ref, *, b_real):
    """
    x_ref : (V, Bp, D) f32   two views, batch padded to Bp (multiple of 8)
    w_ref : (5, D, D)  bf16  proj W1, W2, W3, pred W1, pred W2
    v_ref : (9, D)     f32   proj (g1,b1,g2,b2,g3,b3), pred (g1,b1), pred bias2
    z_ref : (V, Bp, D) f32
    p_ref : (V, Bp, D) f32
    """
    V, Bp, d = x_ref.shape
    M = V * Bp
    inv_n = 1.0 / float(b_real)

    if Bp != b_real:
        row = jax.lax.broadcasted_iota(jnp.int32, (V, Bp, d), 1)
        mask = (row < b_real).astype(jnp.float32)
    else:
        mask = None

    def bn(h2d, g, b):
        # Exact per-view, real-batch training-mode BatchNorm1d (biased var),
        # one-pass variance so the two reductions are independent.
        h = h2d.reshape(V, Bp, d)
        hm = h if mask is None else h * mask
        mean = jnp.sum(hm, axis=1, keepdims=True) * inv_n
        ex2 = jnp.sum(hm * h, axis=1, keepdims=True) * inv_n
        var = ex2 - mean * mean
        out = (h - mean) * jax.lax.rsqrt(var + EPS) * g + b
        return out.reshape(M, d)

    # Flatten views into the matmul M dimension (Bp is a sublane multiple, so
    # this reshape is a pure re-view of the same layout).
    x = x_ref[...].astype(jnp.bfloat16).reshape(M, d)

    # --- projection MLP (Linear biases cancelled exactly by training-mode BN)
    h = jnp.dot(x, w_ref[0], preferred_element_type=jnp.float32)
    h = jnp.maximum(bn(h, v_ref[0:1], v_ref[1:2]), 0.0)

    h = jnp.dot(h.astype(jnp.bfloat16), w_ref[1], preferred_element_type=jnp.float32)
    h = jnp.maximum(bn(h, v_ref[2:3], v_ref[3:4]), 0.0)

    h = jnp.dot(h.astype(jnp.bfloat16), w_ref[2], preferred_element_type=jnp.float32)
    z = bn(h, v_ref[4:5], v_ref[5:6])                 # output fc has BN, no ReLU
    z_ref[...] = z.reshape(V, Bp, d).astype(z_ref.dtype)

    # --- prediction MLP (consumes z directly in VMEM, no HBM round-trip) ----
    h = jnp.dot(z.astype(jnp.bfloat16), w_ref[3], preferred_element_type=jnp.float32)
    h = jnp.maximum(bn(h, v_ref[6:7], v_ref[7:8]), 0.0)

    p = jnp.dot(h.astype(jnp.bfloat16), w_ref[4],
                preferred_element_type=jnp.float32) + v_ref[8:9]
    p_ref[...] = p.reshape(V, Bp, d).astype(p_ref.dtype)   # no BN, no ReLU


def fused_projection_prediction(x_views, w_stack, v_stack):
    """x_views: [S, 2, B, D] f32 (S modalities, 2 views).
       w_stack: [S, 5, D, D] bf16,  v_stack: [S, 9, D] f32.
       Returns (z, p), each [S, 2, B, D] f32."""
    S, V, B, _ = x_views.shape
    Bp = ((B + 7) // 8) * 8                     # sublane-friendly batch
    if Bp != B:
        x_views = jnp.pad(x_views, ((0, 0), (0, 0), (0, Bp - B), (0, 0)))

    view_block = (pl.Squeezed(), V, Bp, D)
    view_map = lambda s: (s, 0, 0, 0)

    z, p = pl.pallas_call(
        functools.partial(fused_simsiam_kernel, b_real=B),
        out_shape=(jax.ShapeDtypeStruct((S, V, Bp, D), jnp.float32),
                   jax.ShapeDtypeStruct((S, V, Bp, D), jnp.float32)),
        grid_spec=pltpu.PrefetchScalarGridSpec(
            num_scalar_prefetch=0,
            grid=(S,),
            in_specs=[
                pl.BlockSpec(view_block, view_map),
                pl.BlockSpec((pl.Squeezed(), 5, D, D), lambda s: (s, 0, 0, 0)),
                pl.BlockSpec((pl.Squeezed(), 9, D), lambda s: (s, 0, 0)),
            ],
            out_specs=[pl.BlockSpec(view_block, view_map),
                       pl.BlockSpec(view_block, view_map)],
        ),
        compiler_params=pltpu.CompilerParams(
            dimension_semantics=("parallel",),      # v7x: modalities on the 2 TCs
            vmem_limit_bytes=32 * 1024 * 1024),
    )(x_views, w_stack, v_stack)
    return z[:, :, :B], p[:, :, :B]


# --------------------------------------------------------------------------
# Parameter initialization (deterministic, synthetic), packed per modality
# --------------------------------------------------------------------------
def _init_linear_w(key, in_dim, out_dim):
    # nn.Linear default weight init: U(-1/sqrt(in_dim), 1/sqrt(in_dim)).
    bound = 1.0 / math.sqrt(in_dim)
    w = jax.random.uniform(key, (in_dim, out_dim), jnp.float32, -bound, bound)
    return w.astype(jnp.bfloat16)


def init_simsiam_stack(key):
    """Packed per-modality params: (5, D, D) bf16 weights, (9, D) f32 vectors.
    Linear biases before training-mode BN are omitted (exactly cancelled)."""
    ks = jax.random.split(key, 6)
    w = jnp.stack([_init_linear_w(ks[i], D, D) for i in range(5)])
    ones = jnp.ones((D,), jnp.float32)
    zeros = jnp.zeros((D,), jnp.float32)
    bound = 1.0 / math.sqrt(D)
    b2 = jax.random.uniform(ks[5], (D,), jnp.float32, -bound, bound)  # kept (no BN)
    v = jnp.stack([ones, zeros, ones, zeros, ones, zeros, ones, zeros, b2])
    return w, v


# --------------------------------------------------------------------------
# Stub CLIP encoders (plain-JAX glue inside the same jit region)
# --------------------------------------------------------------------------
def encode_image_stub(images, w_img):
    # TODO(synk): CLIP visual backbone (build_CLIP_from_openai_pretrained) has no
    # clean Pallas equivalent; replaced by a deterministic linear stub encoder.
    b = images.shape[0]
    x = images.reshape(b, -1).astype(jnp.float32)
    return x @ w_img


def encode_text_stub(captions, emb_table):
    # TODO(synk): CLIP text transformer replaced by a deterministic mean-pooled
    # token-embedding stub encoder.
    e = emb_table[captions]          # [B, L, D]
    return jnp.mean(e, axis=1)       # [B, D]


# --------------------------------------------------------------------------
# Full MultiViewCLIPGNN forward (jit-wrapped at the call site)
# --------------------------------------------------------------------------
def multi_view_clip_gnn_forward(params, images1, images2, captions1, captions2):
    image_feats = encode_image_stub(
        jnp.concatenate([images1, images2], axis=0), params["w_img"])
    text_feats = encode_text_stub(
        jnp.concatenate([captions1, captions2], axis=0), params["emb"])

    b_img = images1.shape[0]
    b_txt = captions1.shape[0]
    img_views = image_feats.reshape(2, b_img, D)
    txt_views = text_feats.reshape(2, b_txt, D)

    if b_img == b_txt:
        # Both modalities in ONE pallas_call: grid over modality, "parallel".
        x_all = jnp.stack([img_views, txt_views], axis=0)        # (2, 2, B, D)
        z_all, p_all = fused_projection_prediction(
            x_all, params["w_stack"], params["v_stack"])
        z_img, p_img = z_all[0], p_all[0]
        z_txt, p_txt = z_all[1], p_all[1]
    else:
        z_i, p_i = fused_projection_prediction(
            img_views[None], params["w_stack"][0:1], params["v_stack"][0:1])
        z_t, p_t = fused_projection_prediction(
            txt_views[None], params["w_stack"][1:2], params["v_stack"][1:2])
        z_img, p_img, z_txt, p_txt = z_i[0], p_i[0], z_t[0], p_t[0]

    return {
        "image_feats": [image_feats[:b_img], image_feats[b_img:]],
        "text_feats": [text_feats[:b_txt], text_feats[b_txt:]],
        "simsiam_features_images": [z_img[0], z_img[1], p_img[0], p_img[1]],
        "simsiam_features_texts": [z_txt[0], z_txt[1], p_txt[0], p_txt[1]],
        "logit_scale": params["logit_scale"],
    }


# --------------------------------------------------------------------------
# Plain-JAX reference of the kernel math (same dtypes / same BN formula)
# --------------------------------------------------------------------------
def _reference_simsiam(x, w, v):
    def bn(h, g, b):
        mean = jnp.mean(h, axis=1, keepdims=True)
        var = jnp.mean(h * h, axis=1, keepdims=True) - mean * mean
        return (h - mean) * jax.lax.rsqrt(var + EPS) * g + b

    def mm(a, wi):
        return jnp.dot(a.astype(jnp.bfloat16), wi, preferred_element_type=jnp.float32)

    h = jnp.maximum(bn(mm(x, w[0]), v[0], v[1]), 0.0)
    h = jnp.maximum(bn(mm(h, w[1]), v[2], v[3]), 0.0)
    z = bn(mm(h, w[2]), v[4], v[5])
    h = jnp.maximum(bn(mm(z, w[3]), v[6], v[7]), 0.0)
    p = mm(h, w[4]) + v[8]
    return z, p


# --------------------------------------------------------------------------
# Main
# --------------------------------------------------------------------------
if __name__ == "__main__":
    key = jax.random.PRNGKey(0)
    (k_img1, k_img2, k_cap1, k_cap2, k_wimg, k_emb,
     k_mod_i, k_mod_t) = jax.random.split(key, 8)

    B, C, H, W = 2, 4, 16, 16   # small image batch (NCHW)
    L, VOCAB = 8, 64            # small caption length / vocab

    images1 = jax.random.normal(k_img1, (B, C, H, W), jnp.float32)
    images2 = jax.random.normal(k_img2, (B, C, H, W), jnp.float32)
    captions1 = jax.random.randint(k_cap1, (B, L), 0, VOCAB, jnp.int32)
    captions2 = jax.random.randint(k_cap2, (B, L), 0, VOCAB, jnp.int32)

    w_img_stack, v_img_stack = init_simsiam_stack(k_mod_i)
    w_txt_stack, v_txt_stack = init_simsiam_stack(k_mod_t)

    params = {
        "w_img": jax.random.normal(k_wimg, (C * H * W, D), jnp.float32)
                 / math.sqrt(C * H * W),
        "emb": jax.random.normal(k_emb, (VOCAB, D), jnp.float32) * 0.02,
        "w_stack": jnp.stack([w_img_stack, w_txt_stack]),   # (2, 5, D, D) bf16
        "v_stack": jnp.stack([v_img_stack, v_txt_stack]),   # (2, 9, D) f32
        "logit_scale": jnp.asarray(math.log(1.0 / 0.07), jnp.float32),
    }

    forward = jax.jit(multi_view_clip_gnn_forward)
    out = forward(params, images1, images2, captions1, captions2)
    jax.block_until_ready(out)

    # Shape / finiteness sanity checks.
    assert out["simsiam_features_images"][0].shape == (B, D)
    assert out["simsiam_features_images"][3].shape == (B, D)
    assert out["simsiam_features_texts"][0].shape == (B, D)
    assert out["simsiam_features_texts"][3].shape == (B, D)
    assert out["image_feats"][0].shape == (B, D)
    assert bool(jnp.all(jnp.isfinite(out["simsiam_features_images"][0])))
    assert bool(jnp.all(jnp.isfinite(out["simsiam_features_texts"][3])))

    # Numerical check against a plain-JAX reference with identical math.
    image_feats = encode_image_stub(
        jnp.concatenate([images1, images2], axis=0), params["w_img"])
    text_feats = encode_text_stub(
        jnp.concatenate([captions1, captions2], axis=0), params["emb"])
    z_ref_i, p_ref_i = _reference_simsiam(
        image_feats.reshape(2, B, D), params["w_stack"][0], params["v_stack"][0])
    z_ref_t, p_ref_t = _reference_simsiam(
        text_feats.reshape(2, B, D), params["w_stack"][1], params["v_stack"][1])
    zi = jnp.stack(out["simsiam_features_images"][:2])
    pi = jnp.stack(out["simsiam_features_images"][2:])
    zt = jnp.stack(out["simsiam_features_texts"][:2])
    pt = jnp.stack(out["simsiam_features_texts"][2:])
    assert bool(jnp.allclose(zi, z_ref_i, rtol=5e-2, atol=5e-2))
    assert bool(jnp.allclose(pi, p_ref_i, rtol=5e-2, atol=5e-2))
    assert bool(jnp.allclose(zt, z_ref_t, rtol=5e-2, atol=5e-2))
    assert bool(jnp.allclose(pt, p_ref_t, rtol=5e-2, atol=5e-2))

    print("KERNEL_OK")
</pallas_src>

<mosaic_0001>
module attributes {stable_mosaic.version = 11 : i64} {
  func.func @fused_simsiam_kernel(%arg0: i32, %arg1: memref<1x2x8x512xf32, #tpu.memory_space<vmem>>, %arg2: memref<1x5x512x512xbf16, #tpu.memory_space<vmem>>, %arg3: memref<1x9x512xf32, #tpu.memory_space<vmem>>, %arg4: memref<1x2x8x512xf32, #tpu.memory_space<vmem>>, %arg5: memref<1x2x8x512xf32, #tpu.memory_space<vmem>>) attributes {dimension_semantics = [#tpu.dimension_semantics<parallel>], iteration_bounds = array<i64: 2>, scalar_prefetch = 0 : i64, scratch_operands = 0 : i64, tpu.core_type = #tpu.core_type<tc>, window_params = [{transform_indices = @transform_0, window_bounds = array<i64: 1, 2, 8, 512>}, {transform_indices = @transform_1, window_bounds = array<i64: 1, 5, 512, 512>}, {transform_indices = @transform_2, window_bounds = array<i64: 1, 9, 512>}, {transform_indices = @transform_3, window_bounds = array<i64: 1, 2, 8, 512>}, {transform_indices = @transform_4, window_bounds = array<i64: 1, 2, 8, 512>}]} {
    %0 = tpu.iota {dimensions = array<i32: 1>} : vector<2x8x512xi32>
    %c2_i32 = arith.constant 2 : i32
    %1 = vector.broadcast %c2_i32 : i32 to vector<2x8x512xi32>
    %2 = arith.cmpi slt, %0, %1 : vector<2x8x512xi32>
    %3 = arith.extui %2 : vector<2x8x512xi1> to vector<2x8x512xi32>
    %4 = arith.sitofp %3 : vector<2x8x512xi32> to vector<2x8x512xf32>
    %c0 = arith.constant 0 : index
    %c0_0 = arith.constant 0 : index
    %c0_1 = arith.constant 0 : index
    %c0_2 = arith.constant 0 : index
    %5 = vector.load %arg1[%c0, %c0_0, %c0_1, %c0_2] : memref<1x2x8x512xf32, #tpu.memory_space<vmem>>, vector<1x2x8x512xf32>
    %6 = vector.shape_cast %5 : vector<1x2x8x512xf32> to vector<2x8x512xf32>
    %7 = arith.truncf %6 : vector<2x8x512xf32> to vector<2x8x512xbf16>
    %8 = vector.shape_cast %7 : vector<2x8x512xbf16> to vector<16x512xbf16>
    %c0_3 = arith.constant 0 : index
    %c0_4 = arith.constant 0 : index
    %c0_5 = arith.constant 0 : index
    %c0_6 = arith.constant 0 : index
    %9 = vector.load %arg2[%c0_3, %c0_4, %c0_5, %c0_6] : memref<1x5x512x512xbf16, #tpu.memory_space<vmem>>, vector<1x1x512x512xbf16>
    %10 = vector.shape_cast %9 : vector<1x1x512x512xbf16> to vector<512x512xbf16>
    %cst = arith.constant dense<0.000000e+00> : vector<16x512xf32>
    %11 = tpu.matmul %8, %10, %cst {dimension_numbers = #tpu.dot_dimension_numbers<[1], [0], [0], [1], [0, 0, 1, 1], [], []>} : vector<16x512xbf16>, vector<512x512xbf16>, vector<16x512xf32> -> vector<16x512xf32>
    %c0_7 = arith.constant 0 : index
    %c0_8 = arith.constant 0 : index
    %c0_9 = arith.constant 0 : index
    %12 = vector.load %arg3[%c0_7, %c0_8, %c0_9] : memref<1x9x512xf32, #tpu.memory_space<vmem>>, vector<1x1x512xf32>
    %13 = vector.shape_cast %12 : vector<1x1x512xf32> to vector<1x512xf32>
    %c0_10 = arith.constant 0 : index
    %c1 = arith.constant 1 : index
    %c0_11 = arith.constant 0 : index
    %14 = vector.load %arg3[%c0_10, %c1, %c0_11] : memref<1x9x512xf32, #tpu.memory_space<vmem>>, vector<1x1x512xf32>
    %15 = vector.shape_cast %14 : vector<1x1x512xf32> to vector<1x512xf32>
    %16 = vector.shape_cast %11 : vector<16x512xf32> to vector<2x8x512xf32>
    %17 = arith.mulf %16, %4 : vector<2x8x512xf32>
    %cst_12 = arith.constant dense<0.000000e+00> : vector<2x512xf32>
    %18 = vector.multi_reduction <add>, %17, %cst_12 [1] : vector<2x8x512xf32> to vector<2x512xf32>
    %19 = vector.shape_cast %18 : vector<2x512xf32> to vector<2x1x512xf32>
    %cst_13 = arith.constant 5.000000e-01 : f32
    %20 = vector.broadcast %cst_13 : f32 to vector<2x1x512xf32>
    %21 = arith.mulf %19, %20 : vector<2x1x512xf32>
    %22 = arith.mulf %17, %16 : vector<2x8x512xf32>
    %cst_14 = arith.constant dense<0.000000e+00> : vector<2x512xf32>
    %23 = vector.multi_reduction <add>, %22, %cst_14 [1] : vector<2x8x512xf32> to vector<2x512xf32>
    %24 = vector.shape_cast %23 : vector<2x512xf32> to vector<2x1x512xf32>
    %cst_15 = arith.constant 5.000000e-01 : f32
    %25 = vector.broadcast %cst_15 : f32 to vector<2x1x512xf32>
    %26 = arith.mulf %24, %25 : vector<2x1x512xf32>
    %27 = arith.mulf %21, %21 : vector<2x1x512xf32>
    %28 = arith.subf %26, %27 : vector<2x1x512xf32>
    %29 = vector.broadcast %21 : vector<2x1x512xf32> to vector<2x8x512xf32>
    %30 = arith.subf %16, %29 : vector<2x8x512xf32>
    %cst_16 = arith.constant 9.99999974E-6 : f32
    %31 = vector.broadcast %cst_16 : f32 to vector<2x1x512xf32>
    %32 = arith.addf %28, %31 : vector<2x1x512xf32>
    %33 = math.rsqrt %32 : vector<2x1x512xf32>
    %34 = vector.broadcast %33 : vector<2x1x512xf32> to vector<2x8x512xf32>
    %35 = arith.mulf %30, %34 : vector<2x8x512xf32>
    %36 = vector.shape_cast %13 : vector<1x512xf32> to vector<1x1x512xf32>
    %37 = vector.broadcast %36 : vector<1x1x512xf32> to vector<2x8x512xf32>
    %38 = arith.mulf %35, %37 : vector<2x8x512xf32>
    %39 = vector.shape_cast %15 : vector<1x512xf32> to vector<1x1x512xf32>
    %40 = vector.broadcast %39 : vector<1x1x512xf32> to vector<2x8x512xf32>
    %41 = arith.addf %38, %40 : vector<2x8x512xf32>
    %42 = vector.shape_cast %41 : vector<2x8x512xf32> to vector<16x512xf32>
    %cst_17 = arith.constant 0.000000e+00 : f32
    %43 = vector.broadcast %cst_17 : f32 to vector<16x512xf32>
    %44 = arith.maximumf %42, %43 : vector<16x512xf32>
    %45 = arith.truncf %44 : vector<16x512xf32> to vector<16x512xbf16>
    %c0_18 = arith.constant 0 : index
    %c1_19 = arith.constant 1 : index
    %c0_20 = arith.constant 0 : index
    %c0_21 = arith.constant 0 : index
    %46 = vector.load %arg2[%c0_18, %c1_19, %c0_20, %c0_21] : memref<1x5x512x512xbf16, #tpu.memory_space<vmem>>, vector<1x1x512x512xbf16>
    %47 = vector.shape_cast %46 : vector<1x1x512x512xbf16> to vector<512x512xbf16>
    %cst_22 = arith.constant dense<0.000000e+00> : vector<16x512xf32>
    %48 = tpu.matmul %45, %47, %cst_22 {dimension_numbers = #tpu.dot_dimension_numbers<[1], [0], [0], [1], [0, 0, 1, 1], [], []>} : vector<16x512xbf16>, vector<512x512xbf16>, vector<16x512xf32> -> vector<16x512xf32>
    %c0_23 = arith.constant 0 : index
    %c2 = arith.constant 2 : index
    %c0_24 = arith.constant 0 : index
    %49 = vector.load %arg3[%c0_23, %c2, %c0_24] : memref<1x9x512xf32, #tpu.memory_space<vmem>>, vector<1x1x512xf32>
    %50 = vector.shape_cast %49 : vector<1x1x512xf32> to vector<1x512xf32>
    %c0_25 = arith.constant 0 : index
    %c3 = arith.constant 3 : index
    %c0_26 = arith.constant 0 : index
    %51 = vector.load %arg3[%c0_25, %c3, %c0_26] : memref<1x9x512xf32, #tpu.memory_space<vmem>>, vector<1x1x512xf32>
    %52 = vector.shape_cast %51 : vector<1x1x512xf32> to vector<1x512xf32>
    %53 = vector.shape_cast %48 : vector<16x512xf32> to vector<2x8x512xf32>
    %54 = arith.mulf %53, %4 : vector<2x8x512xf32>
    %cst_27 = arith.constant dense<0.000000e+00> : vector<2x512xf32>
    %55 = vector.multi_reduction <add>, %54, %cst_27 [1] : vector<2x8x512xf32> to vector<2x512xf32>
    %56 = vector.shape_cast %55 : vector<2x512xf32> to vector<2x1x512xf32>
    %cst_28 = arith.constant 5.000000e-01 : f32
    %57 = vector.broadcast %cst_28 : f32 to vector<2x1x512xf32>
    %58 = arith.mulf %56, %57 : vector<2x1x512xf32>
    %59 = arith.mulf %54, %53 : vector<2x8x512xf32>
    %cst_29 = arith.constant dense<0.000000e+00> : vector<2x512xf32>
    %60 = vector.multi_reduction <add>, %59, %cst_29 [1] : vector<2x8x512xf32> to vector<2x512xf32>
    %61 = vector.shape_cast %60 : vector<2x512xf32> to vector<2x1x512xf32>
    %cst_30 = arith.constant 5.000000e-01 : f32
    %62 = vector.broadcast %cst_30 : f32 to vector<2x1x512xf32>
    %63 = arith.mulf %61, %62 : vector<2x1x512xf32>
    %64 = arith.mulf %58, %58 : vector<2x1x512xf32>
    %65 = arith.subf %63, %64 : vector<2x1x512xf32>
    %66 = vector.broadcast %58 : vector<2x1x512xf32> to vector<2x8x512xf32>
    %67 = arith.subf %53, %66 : vector<2x8x512xf32>
    %cst_31 = arith.constant 9.99999974E-6 : f32
    %68 = vector.broadcast %cst_31 : f32 to vector<2x1x512xf32>
    %69 = arith.addf %65, %68 : vector<2x1x512xf32>
    %70 = math.rsqrt %69 : vector<2x1x512xf32>
    %71 = vector.broadcast %70 : vector<2x1x512xf32> to vector<2x8x512xf32>
    %72 = arith.mulf %67, %71 : vector<2x8x512xf32>
    %73 = vector.shape_cast %50 : vector<1x512xf32> to vector<1x1x512xf32>
    %74 = vector.broadcast %73 : vector<1x1x512xf32> to vector<2x8x512xf32>
    %75 = arith.mulf %72, %74 : vector<2x8x512xf32>
    %76 = vector.shape_cast %52 : vector<1x512xf32> to vector<1x1x512xf32>
    %77 = vector.broadcast %76 : vector<1x1x512xf32> to vector<2x8x512xf32>
    %78 = arith.addf %75, %77 : vector<2x8x512xf32>
    %79 = vector.shape_cast %78 : vector<2x8x512xf32> to vector<16x512xf32>
    %cst_32 = arith.constant 0.000000e+00 : f32
    %80 = vector.broadcast %cst_32 : f32 to vector<16x512xf32>
    %81 = arith.maximumf %79, %80 : vector<16x512xf32>
    %82 = arith.truncf %81 : vector<16x512xf32> to vector<16x512xbf16>
    %c0_33 = arith.constant 0 : index
    %c2_34 = arith.constant 2 : index
    %c0_35 = arith.constant 0 : index
    %c0_36 = arith.constant 0 : index
    %83 = vector.load %arg2[%c0_33, %c2_34, %c0_35, %c0_36] : memref<1x5x512x512xbf16, #tpu.memory_space<vmem>>, vector<1x1x512x512xbf16>
    %84 = vector.shape_cast %83 : vector<1x1x512x512xbf16> to vector<512x512xbf16>
    %cst_37 = arith.constant dense<0.000000e+00> : vector<16x512xf32>
    %85 = tpu.matmul %82, %84, %cst_37 {dimension_numbers = #tpu.dot_dimension_numbers<[1], [0], [0], [1], [0, 0, 1, 1], [], []>} : vector<16x512xbf16>, vector<512x512xbf16>, vector<16x512xf32> -> vector<16x512xf32>
    %c0_38 = arith.constant 0 : index
    %c4 = arith.constant 4 : index
    %c0_39 = arith.constant 0 : index
    %86 = vector.load %arg3[%c0_38, %c4, %c0_39] : memref<1x9x512xf32, #tpu.memory_space<vmem>>, vector<1x1x512xf32>
    %87 = vector.shape_cast %86 : vector<1x1x512xf32> to vector<1x512xf32>
    %c0_40 = arith.constant 0 : index
    %c5 = arith.constant 5 : index
    %c0_41 = arith.constant 0 : index
    %88 = vector.load %arg3[%c0_40, %c5, %c0_41] : memref<1x9x512xf32, #tpu.memory_space<vmem>>, vector<1x1x512xf32>
    %89 = vector.shape_cast %88 : vector<1x1x512xf32> to vector<1x512xf32>
    %90 = vector.shape_cast %85 : vector<16x512xf32> to vector<2x8x512xf32>
    %91 = arith.mulf %90, %4 : vector<2x8x512xf32>
    %cst_42 = arith.constant dense<0.000000e+00> : vector<2x512xf32>
    %92 = vector.multi_reduction <add>, %91, %cst_42 [1] : vector<2x8x512xf32> to vector<2x512xf32>
    %93 = vector.shape_cast %92 : vector<2x512xf32> to vector<2x1x512xf32>
    %cst_43 = arith.constant 5.000000e-01 : f32
    %94 = vector.broadcast %cst_43 : f32 to vector<2x1x512xf32>
    %95 = arith.mulf %93, %94 : vector<2x1x512xf32>
    %96 = arith.mulf %91, %90 : vector<2x8x512xf32>
    %cst_44 = arith.constant dense<0.000000e+00> : vector<2x512xf32>
    %97 = vector.multi_reduction <add>, %96, %cst_44 [1] : vector<2x8x512xf32> to vector<2x512xf32>
    %98 = vector.shape_cast %97 : vector<2x512xf32> to vector<2x1x512xf32>
    %cst_45 = arith.constant 5.000000e-01 : f32
    %99 = vector.broadcast %cst_45 : f32 to vector<2x1x512xf32>
    %100 = arith.mulf %98, %99 : vector<2x1x512xf32>
    %101 = arith.mulf %95, %95 : vector<2x1x512xf32>
    %102 = arith.subf %100, %101 : vector<2x1x512xf32>
    %103 = vector.broadcast %95 : vector<2x1x512xf32> to vector<2x8x512xf32>
    %104 = arith.subf %90, %103 : vector<2x8x512xf32>
    %cst_46 = arith.constant 9.99999974E-6 : f32
    %105 = vector.broadcast %cst_46 : f32 to vector<2x1x512xf32>
    %106 = arith.addf %102, %105 : vector<2x1x512xf32>
    %107 = math.rsqrt %106 : vector<2x1x512xf32>
    %108 = vector.broadcast %107 : vector<2x1x512xf32> to vector<2x8x512xf32>
    %109 = arith.mulf %104, %108 : vector<2x8x512xf32>
    %110 = vector.shape_cast %87 : vector<1x512xf32> to vector<1x1x512xf32>
    %111 = vector.broadcast %110 : vector<1x1x512xf32> to vector<2x8x512xf32>
    %112 = arith.mulf %109, %111 : vector<2x8x512xf32>
    %113 = vector.shape_cast %89 : vector<1x512xf32> to vector<1x1x512xf32>
    %114 = vector.broadcast %113 : vector<1x1x512xf32> to vector<2x8x512xf32>
    %115 = arith.addf %112, %114 : vector<2x8x512xf32>
    %116 = vector.shape_cast %115 : vector<2x8x512xf32> to vector<16x512xf32>
    %117 = vector.shape_cast %116 : vector<16x512xf32> to vector<2x8x512xf32>
    %c0_47 = arith.constant 0 : index
    %c0_48 = arith.constant 0 : index
    %c0_49 = arith.constant 0 : index
    %c0_50 = arith.constant 0 : index
    %118 = vector.load %arg4[%c0_47, %c0_48, %c0_49, %c0_50] : memref<1x2x8x512xf32, #tpu.memory_space<vmem>>, vector<1x2x8x512xf32>
    %119 = vector.shape_cast %118 : vector<1x2x8x512xf32> to vector<2x8x512xf32>
    %120 = vector.shape_cast %117 : vector<2x8x512xf32> to vector<1x2x8x512xf32>
    tpu.vector_store %arg4[%c0_47, %c0_48, %c0_49, %c0_50], %120 {strides = array<i32>} : memref<1x2x8x512xf32, #tpu.memory_space<vmem>>, vector<1x2x8x512xf32>,
    %121 = arith.truncf %116 : vector<16x512xf32> to vector<16x512xbf16>
    %c0_51 = arith.constant 0 : index
    %c3_52 = arith.constant 3 : index
    %c0_53 = arith.constant 0 : index
    %c0_54 = arith.constant 0 : index
    %122 = vector.load %arg2[%c0_51, %c3_52, %c0_53, %c0_54] : memref<1x5x512x512xbf16, #tpu.memory_space<vmem>>, vector<1x1x512x512xbf16>
    %123 = vector.shape_cast %122 : vector<1x1x512x512xbf16> to vector<512x512xbf16>
    %cst_55 = arith.constant dense<0.000000e+00> : vector<16x512xf32>
    %124 = tpu.matmul %121, %123, %cst_55 {dimension_numbers = #tpu.dot_dimension_numbers<[1], [0], [0], [1], [0, 0, 1, 1], [], []>} : vector<16x512xbf16>, vector<512x512xbf16>, vector<16x512xf32> -> vector<16x512xf32>
    %c0_56 = arith.constant 0 : index
    %c6 = arith.constant 6 : index
    %c0_57 = arith.constant 0 : index
    %125 = vector.load %arg3[%c0_56, %c6, %c0_57] : memref<1x9x512xf32, #tpu.memory_space<vmem>>, vector<1x1x512xf32>
    %126 = vector.shape_cast %125 : vector<1x1x512xf32> to vector<1x512xf32>
    %c0_58 = arith.constant 0 : index
    %c7 = arith.constant 7 : index
    %c0_59 = arith.constant 0 : index
    %127 = vector.load %arg3[%c0_58, %c7, %c0_59] : memref<1x9x512xf32, #tpu.memory_space<vmem>>, vector<1x1x512xf32>
    %128 = vector.shape_cast %127 : vector<1x1x512xf32> to vector<1x512xf32>
    %129 = vector.shape_cast %124 : vector<16x512xf32> to vector<2x8x512xf32>
    %130 = arith.mulf %129, %4 : vector<2x8x512xf32>
    %cst_60 = arith.constant dense<0.000000e+00> : vector<2x512xf32>
    %131 = vector.multi_reduction <add>, %130, %cst_60 [1] : vector<2x8x512xf32> to vector<2x512xf32>
    %132 = vector.shape_cast %131 : vector<2x512xf32> to vector<2x1x512xf32>
    %cst_61 = arith.constant 5.000000e-01 : f32
    %133 = vector.broadcast %cst_61 : f32 to vector<2x1x512xf32>
    %134 = arith.mulf %132, %133 : vector<2x1x512xf32>
    %135 = arith.mulf %130, %129 : vector<2x8x512xf32>
    %cst_62 = arith.constant dense<0.000000e+00> : vector<2x512xf32>
    %136 = vector.multi_reduction <add>, %135, %cst_62 [1] : vector<2x8x512xf32> to vector<2x512xf32>
    %137 = vector.shape_cast %136 : vector<2x512xf32> to vector<2x1x512xf32>
    %cst_63 = arith.constant 5.000000e-01 : f32
    %138 = vector.broadcast %cst_63 : f32 to vector<2x1x512xf32>
    %139 = arith.mulf %137, %138 : vector<2x1x512xf32>
    %140 = arith.mulf %134, %134 : vector<2x1x512xf32>
    %141 = arith.subf %139, %140 : vector<2x1x512xf32>
    %142 = vector.broadcast %134 : vector<2x1x512xf32> to vector<2x8x512xf32>
    %143 = arith.subf %129, %142 : vector<2x8x512xf32>
    %cst_64 = arith.constant 9.99999974E-6 : f32
    %144 = vector.broadcast %cst_64 : f32 to vector<2x1x512xf32>
    %145 = arith.addf %141, %144 : vector<2x1x512xf32>
    %146 = math.rsqrt %145 : vector<2x1x512xf32>
    %147 = vector.broadcast %146 : vector<2x1x512xf32> to vector<2x8x512xf32>
    %148 = arith.mulf %143, %147 : vector<2x8x512xf32>
    %149 = vector.shape_cast %126 : vector<1x512xf32> to vector<1x1x512xf32>
    %150 = vector.broadcast %149 : vector<1x1x512xf32> to vector<2x8x512xf32>
    %151 = arith.mulf %148, %150 : vector<2x8x512xf32>
    %152 = vector.shape_cast %128 : vector<1x512xf32> to vector<1x1x512xf32>
    %153 = vector.broadcast %152 : vector<1x1x512xf32> to vector<2x8x512xf32>
    %154 = arith.addf %151, %153 : vector<2x8x512xf32>
    %155 = vector.shape_cast %154 : vector<2x8x512xf32> to vector<16x512xf32>
    %cst_65 = arith.constant 0.000000e+00 : f32
    %156 = vector.broadcast %cst_65 : f32 to vector<16x512xf32>
    %157 = arith.maximumf %155, %156 : vector<16x512xf32>
    %158 = arith.truncf %157 : vector<16x512xf32> to vector<16x512xbf16>
    %c0_66 = arith.constant 0 : index
    %c4_67 = arith.constant 4 : index
    %c0_68 = arith.constant 0 : index
    %c0_69 = arith.constant 0 : index
    %159 = vector.load %arg2[%c0_66, %c4_67, %c0_68, %c0_69] : memref<1x5x512x512xbf16, #tpu.memory_space<vmem>>, vector<1x1x512x512xbf16>
    %160 = vector.shape_cast %159 : vector<1x1x512x512xbf16> to vector<512x512xbf16>
    %cst_70 = arith.constant dense<0.000000e+00> : vector<16x512xf32>
    %161 = tpu.matmul %158, %160, %cst_70 {dimension_numbers = #tpu.dot_dimension_numbers<[1], [0], [0], [1], [0, 0, 1, 1], [], []>} : vector<16x512xbf16>, vector<512x512xbf16>, vector<16x512xf32> -> vector<16x512xf32>
    %c0_71 = arith.constant 0 : index
    %c8 = arith.constant 8 : index
    %c0_72 = arith.constant 0 : index
    %162 = vector.load %arg3[%c0_71, %c8, %c0_72] : memref<1x9x512xf32, #tpu.memory_space<vmem>>, vector<1x1x512xf32>
    %163 = vector.shape_cast %162 : vector<1x1x512xf32> to vector<1x512xf32>
    %164 = vector.broadcast %163 : vector<1x512xf32> to vector<16x512xf32>
    %165 = arith.addf %161, %164 : vector<16x512xf32>
    %166 = vector.shape_cast %165 : vector<16x512xf32> to vector<2x8x512xf32>
    %c0_73 = arith.constant 0 : index
    %c0_74 = arith.constant 0 : index
    %c0_75 = arith.constant 0 : index
    %c0_76 = arith.constant 0 : index
    %167 = vector.load %arg5[%c0_73, %c0_74, %c0_75, %c0_76] : memref<1x2x8x512xf32, #tpu.memory_space<vmem>>, vector<1x2x8x512xf32>
    %168 = vector.shape_cast %167 : vector<1x2x8x512xf32> to vector<2x8x512xf32>
    %169 = vector.shape_cast %166 : vector<2x8x512xf32> to vector<1x2x8x512xf32>
    tpu.vector_store %arg5[%c0_73, %c0_74, %c0_75, %c0_76], %169 {strides = array<i32>} : memref<1x2x8x512xf32, #tpu.memory_space<vmem>>, vector<1x2x8x512xf32>,
    return
  }
  func.func @transform_0(%arg0: i32) -> (i32, i32, i32, i32) {
    %c0_i32 = arith.constant 0 : i32
    %c0_i32_0 = arith.constant 0 : i32
    %c0_i32_1 = arith.constant 0 : i32
    %c0_i32_2 = arith.constant 0 : i32
    return %arg0, %c0_i32, %c0_i32_0, %c0_i32_1 : i32, i32, i32, i32
  }
  func.func @transform_1(%arg0: i32) -> (i32, i32, i32, i32) {
    %c0_i32 = arith.constant 0 : i32
    %c0_i32_0 = arith.constant 0 : i32
    %c0_i32_1 = arith.constant 0 : i32
    %c0_i32_2 = arith.constant 0 : i32
    return %arg0, %c0_i32, %c0_i32_0, %c0_i32_1 : i32, i32, i32, i32
  }
  func.func @transform_2(%arg0: i32) -> (i32, i32, i32) {
    %c0_i32 = arith.constant 0 : i32
    %c0_i32_0 = arith.constant 0 : i32
    %c0_i32_1 = arith.constant 0 : i32
    return %arg0, %c0_i32, %c0_i32_0 : i32, i32, i32
  }
  func.func @transform_3(%arg0: i32) -> (i32, i32, i32, i32) {
    %c0_i32 = arith.constant 0 : i32
    %c0_i32_0 = arith.constant 0 : i32
    %c0_i32_1 = arith.constant 0 : i32
    %c0_i32_2 = arith.constant 0 : i32
    return %arg0, %c0_i32, %c0_i32_0, %c0_i32_1 : i32, i32, i32, i32
  }
  func.func @transform_4(%arg0: i32) -> (i32, i32, i32, i32) {
    %c0_i32 = arith.constant 0 : i32
    %c0_i32_0 = arith.constant 0 : i32
    %c0_i32_1 = arith.constant 0 : i32
    %c0_i32_2 = arith.constant 0 : i32
    return %arg0, %c0_i32, %c0_i32_0, %c0_i32_1 : i32, i32, i32, i32
  }
}

</mosaic_0001>

<bundles_post_ra>
// kernel: multi_view_clip_gnn_forward.1
= control target key start
LH: loop header
LB: loop body
LE: loop exit
PB: predicated region body
PF: predicated region fallthrough
CT: control target
= control target key end

     0   :  { %10 = vsyncpa [#allocation3], 0  ;;  %s9818_s0 = inlined_call_operand.vmem [shape: f32[2,2,8,512], index: 0, kind: input, shape index: {}]   ;;  %s9819_s1 = inlined_call_operand.hbm [shape: bf16[2,5,512,512], index: 1, kind: input, shape index: {}]   ;;  %s9820_s2 = inlined_call_operand.vmem [shape: f32[2,9,512], index: 2, kind: input, shape index: {}]   ;;  %s9821_s3 = inlined_call_operand.vmem [shape: f32[2,2,8,512], index: 3, kind: output, shape index: {0}]   ;;  %s9822_s4 = inlined_call_operand.vmem [shape: f32[2,2,8,512], index: 4, kind: output, shape index: {1}]  }
   0x1   :  { %12 = vsyncpa [#allocation3 + $0x1], 0  ;;  %s8574_s15 = smov 0   ;;  %s8576_s16 = smov 0  }
   0x2   :  { %s8578_s17 = smov 0   ;;  %s8580_s18 = smov 0  }
   0x3 LB: > { %s8593_s19 = sadd.s32 4294967295, %s8543_s18   ;;  %s8596_s20 = sadd.s32 1, %s8543_s18   ;;  %s8543_s18 = sphi %s8580_s18, %s9829_s18   ;;  %s8539_s17 = sphi %s8578_s17, %s9828_s17   ;;  %s8535_s16 = sphi %s8576_s16, %s9827_s16   ;;  %s8531_s15 = sphi %s8574_s15, %s9826_s15  }
   0x4   : > { %s48_s21 = ssub.s32 %s8543_s18, %s8596_s20  ;;  %s51_s22 = sadd.s32 1, %s8539_s17 }
   0x5   : > { %p49_p0 = scmp.eq.s32.totalorder %s48_s21, 0  ;;  %p58_p1 = scmp.ne.s32.totalorder %s8539_s17, %s8535_s16 }
   0x6   : > { %p59_p2 = scmp.eq.s32.totalorder %s8543_s18, 0  ;;  %p64_p3 = scmp.ne.s32.totalorder %s8535_s16, %s8531_s15 }
   0x7   : > { %s8606_s23 = scalar_select %p49_p0, %s8539_s17, %s51_s22  }
   0x8   : > { %p60_p4 = por %p59_p2, %p58_p1  ;;  %p65_p5 = scmp.eq.s32.totalorder %s8593_s19, 0 }
   0x9   : > { %p7419_p6 = scmp.lt.s32.totalorder %s8543_s18, 2  ;;  %s174_s25 = sand.u32 1, %s8539_s17  }
   0xa   : > { %p8610_p7 = por %p65_p5, %p64_p3  ;;  %s7410_s26 = smul.u32 5120, %s174_s25 }
   0xb   : > { %s7411_s27 = smul.u32 81920, %s8543_s18  ;;  %p8616_p8 = pnand %p7419_p6, %p60_p4 }
   0xc   : > { %s178_s6 = scalar_lea.vmem [#allocation2], %s7410_s26  ;;  %s8628_s8 = scalar_lea.sflag [#allocation3], %s174_s25 }
   0xd   : > { %s8623_s5 = scalar_lea.hbm %s9819_s1, %s7411_s27  ;;  %s185_s7 = sshll.u32 %s178_s6, 4  ;;  %s8625_s7 = int_to_ptr.vmem [resolvable:$true] %s185_s7 }
   0xe   : > { %s8479_s9 = scalar_lea.hbm %s8623_s5, 81920  ;;  %p8481_p11 = pneg %p8616_p8 }
   0xf   : > { %p8480_p10 = scmp.ne.s32.totalorder %s8623_s5, %s8479_s9  ;;  %s8484_s12 = scalar_lea.hbm %s9819_s1, 163840 }
  0x10   : > { %p8485_p0 = scmp.lt.u32.totalorder %s8623_s5, %s9819_s1  ;;  %p8486_p1 = scmp.lt.u32.totalorder %s8484_s12, %s8479_s9 }
  0x11   : > { %p8482_p12 = pnand %p8481_p11, %p8480_p10  ;;  %p8488_p3 = scmp.lt.u32.totalorder %s8479_s9, %s8623_s5 }
  0x12   : > { %p8487_p2 = por %p8486_p1, %p8485_p0 }
  0x13   : > { %p8483_p13 = pneg %p8482_p12 }
  0x14   : > { %p8489_p4 = por %p8488_p3, %p8487_p2 }
  0x16   : > { %p8490_p5 = pnand %p8489_p4, %p8483_p13 }
  0x18   : > { %8493 = shalt.err (!%p8490_p5)
}
  0x19   : > { %s8494_s15 = scalar_lea.vmem %s8625_s7, 81920  ;;  %s8545_s21 = smov [#allocation2]  }
  0x1a   : > { %p8495_p6 = scmp.ne.s32.totalorder %s8625_s7, %s8494_s15  ;;  %s8499_s22 = sshll.u32 %s8545_s21, 4  ;;  %s8500_s22 = int_to_ptr.vmem [resolvable:$false] %s8499_s22 }
  0x1b   : > { %s8501_s25 = scalar_lea.vmem %s8500_s22, 163840  ;;  %p8502_p9 = scmp.lt.s32.totalorder %s8625_s7, %s8500_s22 }
  0x1c   : > { %p8497_p10 = pnand %p8495_p6, %p8481_p11  ;;  %p8503_p0 = scmp.lt.s32.totalorder %s8501_s25, %s8494_s15 }
  0x1e   : > { %p8498_p12 = pneg %p8497_p10  ;;  %p8504_p1 = por %p8503_p0, %p8502_p9 }
  0x20   : > { %p8505_p2 = pnand %p8504_p1, %p8498_p12 }
  0x22   : > { %8508 = shalt.err (!%p8505_p2)
}
  0x23   : > { %s8546_s26 = smov 256   ;;  %s8547_s27 = smov 16  }
  0x24   : > { %7418 = dma.hbm_to_vmem [thread:$0]  (!%p8616_p8), %s8623_s5, 81920, %s8625_s7, %s8628_s8, %s8546_s26, %s8546_s26, %s8547_s27  }
  0x25   : > { %p201_p11 = scmp.lt.s32.totalorder %s8543_s18, 3  ;;  %p9825_p13 = scmp.ge.s32.totalorder %s8543_s18, 1 }
  0x27   : > { %p202_p3 = pnand %p9825_p13, %p201_p11 }
  0x28   : > { %s207_s29 = sand.u32 (!%p202_p3), 1, %s8535_s16  }
  0x29   : > { %205 = sbr.rel (%p202_p3) target bundleno = 1761 (0x6e1), region = 32  ;;  %s208_s6 = scalar_lea.sflag (!%p202_p3), [#allocation3], %s207_s29 }
  0x2a   : > { %s7412_s30 = smul.u32 (!%p202_p3), 5120, %s207_s29 }
  0x2c   : > { %s8660_s9 = scalar_lea.vmem (!%p202_p3), [#allocation2], %s7412_s30 }
  0x30   : > { %8526 = dma.done.wait (%p8610_p7), %s208_s6, 81920  }
  0x31   : > { %8528 = vsyncadd (%p8610_p7), %s208_s6, 4294885376  ;;  %v7455_v0 = vld [vmem:[%s8660_s9 + $0x4] ss:$16 sps:$4 sm:$0xff]   ;;  %v7457_v1 = vld [vmem:[%s8660_s9 + $0xc] ss:$16 sps:$4 sm:$0xff]   ;;  %p251_p7 = scmp.lt.s32.totalorder %s8593_s19, 1 }
  0x32   : > { %1084 = vmatprep.subr.bf16.mxu0 %v7455_v0  ;;  %v7459_v2 = vld [vmem:[%s8660_s9] ss:$16 sps:$4 sm:$0xff]   ;;  %v7460_v3 = vld [vmem:[%s8660_s9 + $0x8] ss:$16 sps:$4 sm:$0xff]   ;;  %1170 = vmatprep.subr.bf16.mxu1 %v7457_v1  ;;  %v7461_v4 = vld [vmem:[%s8660_s9 + $0x24] ss:$16 sps:$4 sm:$0xff]  }
  0x33   : > { %1085 = vmatpush1.bf16.msra.mxu0 %v7459_v2  ;;  %1171 = vmatpush1.bf16.msra.mxu1 %v7460_v3  ;;  %v7463_v5 = vld [vmem:[%s8660_s9 + $0x2c] ss:$16 sps:$4 sm:$0xff]   ;;  %v7465_v6 = vld [vmem:[%s8660_s9 + $0x20] ss:$16 sps:$4 sm:$0xff]   ;;  %v7466_v7 = vld [vmem:[%s8660_s9 + $0x28] ss:$16 sps:$4 sm:$0xff]  }
  0x34   : > { %1086 = vmatprep.subr.bf16.mxu0 %v7461_v4  ;;  %1172 = vmatprep.subr.bf16.mxu1 %v7463_v5  ;;  %v7467_v8 = vld [vmem:[%s8660_s9 + $0x44] ss:$16 sps:$4 sm:$0xff]   ;;  %v7469_v9 = vld [vmem:[%s8660_s9 + $0x4c] ss:$16 sps:$4 sm:$0xff]   ;;  %v7471_v10 = vld [vmem:[%s8660_s9 + $0x40] ss:$16 sps:$4 sm:$0xff]  }
  0x35   : > { %v7472_v11 = vld [vmem:[%s8660_s9 + $0x48] ss:$16 sps:$4 sm:$0xff]   ;;  %v7473_v12 = vld [vmem:[%s8660_s9 + $0x64] ss:$16 sps:$4 sm:$0xff]   ;;  %v7475_v13 = vld [vmem:[%s8660_s9 + $0x6c] ss:$16 sps:$4 sm:$0xff]  }
  0x36   : > { %v7477_v14 = vld [vmem:[%s8660_s9 + $0x60] ss:$16 sps:$4 sm:$0xff]   ;;  %v7478_v15 = vld [vmem:[%s8660_s9 + $0x68] ss:$16 sps:$4 sm:$0xff]   ;;  %v7479_v16 = vld [vmem:[%s8660_s9 + $0x84] ss:$16 sps:$4 sm:$0xff]  }
  0x37   : > { %1087 = vmatpush1.bf16.msra.mxu0 %v7465_v6  ;;  %1173 = vmatpush1.bf16.msra.mxu1 %v7466_v7  ;;  %v7481_v17 = vld [vmem:[%s8660_s9 + $0x8c] ss:$16 sps:$4 sm:$0xff]   ;;  %v7483_v18 = vld [vmem:[%s8660_s9 + $0x80] ss:$16 sps:$4 sm:$0xff]   ;;  %v7484_v19 = vld [vmem:[%s8660_s9 + $0x88] ss:$16 sps:$4 sm:$0xff]  }
  0x38   : > { %1088 = vmatprep.subr.bf16.mxu0 %v7467_v8  ;;  %1174 = vmatprep.subr.bf16.mxu1 %v7469_v9  ;;  %v7485_v20 = vld [vmem:[%s8660_s9 + $0xa4] ss:$16 sps:$4 sm:$0xff]   ;;  %v7487_v21 = vld [vmem:[%s8660_s9 + $0xac] ss:$16 sps:$4 sm:$0xff]   ;;  %v7489_v22 = vld [vmem:[%s8660_s9 + $0xa0] ss:$16 sps:$4 sm:$0xff]  }
  0x39   : > { %v7490_v23 = vld [vmem:[%s8660_s9 + $0xa8] ss:$16 sps:$4 sm:$0xff]   ;;  %v7491_v24 = vld [vmem:[%s8660_s9 + $0xc4] ss:$16 sps:$4 sm:$0xff]   ;;  %v7493_v25 = vld [vmem:[%s8660_s9 + $0xcc] ss:$16 sps:$4 sm:$0xff]  }
  0x3a   : > { %v7495_v26 = vld [vmem:[%s8660_s9 + $0xc0] ss:$16 sps:$4 sm:$0xff]   ;;  %v7496_v27 = vld [vmem:[%s8660_s9 + $0xc8] ss:$16 sps:$4 sm:$0xff]   ;;  %v7497_v28 = vld [vmem:[%s8660_s9 + $0xe4] ss:$16 sps:$4 sm:$0xff]  }
  0x3b   : > { %1089 = vmatpush1.bf16.msra.mxu0 %v7471_v10  ;;  %1175 = vmatpush1.bf16.msra.mxu1 %v7472_v11  ;;  %v7499_v29 = vld [vmem:[%s8660_s9 + $0xec] ss:$16 sps:$4 sm:$0xff]   ;;  %v7501_v30 = vld [vmem:[%s8660_s9 + $0xe0] ss:$16 sps:$4 sm:$0xff]   ;;  %v7502_v31 = vld [vmem:[%s8660_s9 + $0xe8] ss:$16 sps:$4 sm:$0xff]  }
  0x3c   : > { %1090 = vmatprep.subr.bf16.mxu0 %v7473_v12  ;;  %1176 = vmatprep.subr.bf16.mxu1 %v7475_v13  ;;  %v7503_v32 = vld [vmem:[%s8660_s9 + $0x104] ss:$16 sps:$4 sm:$0xff]   ;;  %v7505_v33 = vld [vmem:[%s8660_s9 + $0x10c] ss:$16 sps:$4 sm:$0xff]   ;;  %v7507_v34 = vld [vmem:[%s8660_s9 + $0x100] ss:$16 sps:$4 sm:$0xff]  }
  0x3d   : > { %v7508_v35 = vld [vmem:[%s8660_s9 + $0x108] ss:$16 sps:$4 sm:$0xff]   ;;  %v7509_v36 = vld [vmem:[%s8660_s9 + $0x124] ss:$16 sps:$4 sm:$0xff]   ;;  %s9831_s19 = smov (!%p251_p7, %s8593_s19), 1 }
  0x3e   : > { %v7511_v37 = vld [vmem:[%s8660_s9 + $0x12c] ss:$16 sps:$4 sm:$0xff]   ;;  %v7513_v38 = vld [vmem:[%s8660_s9 + $0x120] ss:$16 sps:$4 sm:$0xff]   ;;  %v7514_v39 = vld [vmem:[%s8660_s9 + $0x128] ss:$16 sps:$4 sm:$0xff]  }
  0x3f   : > { %1091 = vmatpush1.bf16.msra.mxu0 %v7477_v14  ;;  %1177 = vmatpush1.bf16.msra.mxu1 %v7478_v15  ;;  %v7515_v40 = vld [vmem:[%s8660_s9 + $0x144] ss:$16 sps:$4 sm:$0xff]   ;;  %s8709_s18 = sshll.u32 %s9831_s19, 6  ;;  %v7517_v41 = vld [vmem:[%s8660_s9 + $0x14c] ss:$16 sps:$4 sm:$0xff]  }
  0x40   : > { %1092 = vmatprep.subr.bf16.mxu0 %v7479_v16  ;;  %1178 = vmatprep.subr.bf16.mxu1 %v7481_v17  ;;  %v7519_v42 = vld [vmem:[%s8660_s9 + $0x140] ss:$16 sps:$4 sm:$0xff]   ;;  %v7520_v43 = vld [vmem:[%s8660_s9 + $0x148] ss:$16 sps:$4 sm:$0xff]   ;;  %s8718_s5 = scalar_lea.vmem %s9818_s0, %s8709_s18  ;;  %v7521_v44 = vld [vmem:[%s8660_s9 + $0x164] ss:$16 sps:$4 sm:$0xff]   ;;  %s8915_s8 = scalar_lea.vmem %s9820_s2, %s8709_s18 }
  0x41   : > { %v7523_v45 = vld [vmem:[%s8660_s9 + $0x16c] ss:$16 sps:$4 sm:$0xff]   ;;  %v7525_v48 = vld [vmem:[%s8660_s9 + $0x160] ss:$16 sps:$4 sm:$0xff]   ;;  %v7526_v49 = vld [vmem:[%s8660_s9 + $0x168] ss:$16 sps:$4 sm:$0xff]   ;;  %s9469_s12 = scalar_lea.vmem %s9821_s3, %s8709_s18  ;;  %s270_s15 = scalar_lea.vmem %s9822_s4, %s8709_s18 }
  0x42   : > { %v277_v46 = vld [vmem:[%s8718_s5 + $0x8] sm:$0xff]  ;;  %v7527_v51 = vld [vmem:[%s8660_s9 + $0x184] ss:$16 sps:$4 sm:$0xff]   ;;  %v7531_v53 = vld [vmem:[%s8660_s9 + $0x180] ss:$16 sps:$4 sm:$0xff]  }
  0x43   : > { %1093 = vmatpush1.bf16.msra.mxu0 %v7483_v18  ;;  %1179 = vmatpush1.bf16.msra.mxu1 %v7484_v19  ;;  %v281_v47 = vld [vmem:[%s8718_s5 + $0x28] sm:$0xff]  ;;  %v7533_v55 = vld [vmem:[%s8660_s9 + $0x1a4] ss:$16 sps:$4 sm:$0xff]   ;;  %v7537_v57 = vld [vmem:[%s8660_s9 + $0x1a0] ss:$16 sps:$4 sm:$0xff]  }
  0x44   : > { %1094 = vmatprep.subr.bf16.mxu0 %v7485_v20  ;;  %1180 = vmatprep.subr.bf16.mxu1 %v7487_v21  ;;  %v7359_v50 = vpack.c.bf16 %v281_v47, %v277_v46  ;;  %v7529_v52 = vld [vmem:[%s8660_s9 + $0x18c] ss:$16 sps:$4 sm:$0xff]   ;;  %v7532_v54 = vld [vmem:[%s8660_s9 + $0x188] ss:$16 sps:$4 sm:$0xff]   ;;  %v7539_v59 = vld [vmem:[%s8660_s9 + $0x1c4] ss:$16 sps:$4 sm:$0xff]  }
  0x45   : > { %v7535_v56 = vld [vmem:[%s8660_s9 + $0x1ac] ss:$16 sps:$4 sm:$0xff]   ;;  %v7538_v58 = vld [vmem:[%s8660_s9 + $0x1a8] ss:$16 sps:$4 sm:$0xff]   ;;  %v7543_v61 = vld [vmem:[%s8660_s9 + $0x1c0] ss:$16 sps:$4 sm:$0xff]  }
  0x46   : > { %1116 = vmatprep.mubr.bf16.mxu0 %v7359_v50  ;;  %1202 = vmatprep.mubr.bf16.mxu1 %v7359_v50  ;;  %v7541_v60 = vld [vmem:[%s8660_s9 + $0x1cc] ss:$16 sps:$4 sm:$0xff]   ;;  %v7544_v62 = vld [vmem:[%s8660_s9 + $0x1c8] ss:$16 sps:$4 sm:$0xff]   ;;  %v7545_v63 = vld [vmem:[%s8660_s9 + $0x1e4] ss:$16 sps:$4 sm:$0xff]  }
  0x47   : > { %1095 = vmatpush1.bf16.msra.mxu0 %v7489_v22  ;;  %1181 = vmatpush1.bf16.msra.mxu1 %v7490_v23  ;;  %v7547_v0 = vld [vmem:[%s8660_s9 + $0x1ec] ss:$16 sps:$4 sm:$0xff]   ;;  %v7549_v1 = vld [vmem:[%s8660_s9 + $0x1e0] ss:$16 sps:$4 sm:$0xff]   ;;  %v7550_v2 = vld [vmem:[%s8660_s9 + $0x1e8] ss:$16 sps:$4 sm:$0xff]  }
  0x48   : > { %1096 = vmatprep.subr.bf16.mxu0 %v7491_v24  ;;  %1182 = vmatprep.subr.bf16.mxu1 %v7493_v25  ;;  %v7553_v3 = vld [vmem:[%s8660_s9 + $0x204] ss:$16 sps:$4 sm:$0xff]   ;;  %v7556_v6 = vld [vmem:[%s8660_s9 + $0x20c] ss:$16 sps:$4 sm:$0xff]   ;;  %v7551_v7 = vld [vmem:[%s8660_s9 + $0x200] ss:$16 sps:$4 sm:$0xff]  }
  0x49   : > { %v276_v4 = vld [vmem:[%s8718_s5] sm:$0xff]  ;;  %v7554_v8 = vld [vmem:[%s8660_s9 + $0x208] ss:$16 sps:$4 sm:$0xff]   ;;  %v7562_v11 = vld [vmem:[%s8660_s9 + $0x22c] ss:$16 sps:$4 sm:$0xff]  }
  0x4a   : > { %v280_v5 = vld [vmem:[%s8718_s5 + $0x20] sm:$0xff]  ;;  %v7560_v13 = vld [vmem:[%s8660_s9 + $0x228] ss:$16 sps:$4 sm:$0xff]   ;;  %v7568_v15 = vld [vmem:[%s8660_s9 + $0x24c] ss:$16 sps:$4 sm:$0xff]  }
  0x4b   : > { %1097 = vmatpush1.bf16.msra.mxu0 %v7495_v26  ;;  %1183 = vmatpush1.bf16.msra.mxu1 %v7496_v27  ;;  %v7358_v9 = vpack.c.bf16 %v280_v5, %v276_v4  ;;  %v7559_v10 = vld [vmem:[%s8660_s9 + $0x224] ss:$16 sps:$4 sm:$0xff]   ;;  %v7557_v12 = vld [vmem:[%s8660_s9 + $0x220] ss:$16 sps:$4 sm:$0xff]   ;;  %v7566_v17 = vld [vmem:[%s8660_s9 + $0x248] ss:$16 sps:$4 sm:$0xff]  }
  0x4c   : > { %1098 = vmatprep.subr.bf16.mxu0 %v7497_v28  ;;  %1184 = vmatprep.subr.bf16.mxu1 %v7499_v29  ;;  %v7565_v14 = vld [vmem:[%s8660_s9 + $0x244] ss:$16 sps:$4 sm:$0xff]   ;;  %v7563_v16 = vld [vmem:[%s8660_s9 + $0x240] ss:$16 sps:$4 sm:$0xff]   ;;  %v7574_v19 = vld [vmem:[%s8660_s9 + $0x26c] ss:$16 sps:$4 sm:$0xff]  }
  0x4d   : > { %v7571_v18 = vld [vmem:[%s8660_s9 + $0x264] ss:$16 sps:$4 sm:$0xff]   ;;  %v7569_v20 = vld [vmem:[%s8660_s9 + $0x260] ss:$16 sps:$4 sm:$0xff]   ;;  %v7572_v21 = vld [vmem:[%s8660_s9 + $0x268] ss:$16 sps:$4 sm:$0xff]  }
  0x4e   : > { %v7577_v22 = vld [vmem:[%s8660_s9 + $0x284] ss:$16 sps:$4 sm:$0xff]   ;;  %v7580_v23 = vld [vmem:[%s8660_s9 + $0x28c] ss:$16 sps:$4 sm:$0xff]   ;;  %v7575_v24 = vld [vmem:[%s8660_s9 + $0x280] ss:$16 sps:$4 sm:$0xff]  }
  0x4f   : > { %1099 = vmatpush1.bf16.msra.mxu0 %v7501_v30  ;;  %1185 = vmatpush1.bf16.msra.mxu1 %v7502_v31  ;;  %v7578_v25 = vld [vmem:[%s8660_s9 + $0x288] ss:$16 sps:$4 sm:$0xff]   ;;  %v7583_v26 = vld [vmem:[%s8660_s9 + $0x2a4] ss:$16 sps:$4 sm:$0xff]   ;;  %v7586_v27 = vld [vmem:[%s8660_s9 + $0x2ac] ss:$16 sps:$4 sm:$0xff]  }
  0x50   : > { %1100 = vmatprep.subr.bf16.mxu0 %v7503_v32  ;;  %1186 = vmatprep.subr.bf16.mxu1 %v7505_v33  ;;  %v7581_v28 = vld [vmem:[%s8660_s9 + $0x2a0] ss:$16 sps:$4 sm:$0xff]   ;;  %v7584_v29 = vld [vmem:[%s8660_s9 + $0x2a8] ss:$16 sps:$4 sm:$0xff]   ;;  %v7589_v30 = vld [vmem:[%s8660_s9 + $0x2c4] ss:$16 sps:$4 sm:$0xff]  }
  0x51   : > { %v7592_v31 = vld [vmem:[%s8660_s9 + $0x2cc] ss:$16 sps:$4 sm:$0xff]   ;;  %v7587_v33 = vld [vmem:[%s8660_s9 + $0x2c0] ss:$16 sps:$4 sm:$0xff]   ;;  %v7638_v4 = vld [vmem:[%s8660_s9 + $0x3c8] ss:$16 sps:$4 sm:$0xff]  }
  0x52   : > { %v279_v32 = vld [vmem:[%s8718_s5 + $0x18] sm:$0xff]  ;;  %v7605_v47 = vld [vmem:[%s8660_s9 + $0x320] ss:$16 sps:$4 sm:$0xff]   ;;  %v7643_v5 = vld [vmem:[%s8660_s9 + $0x3e4] ss:$16 sps:$4 sm:$0xff]  }
  0x53   : > { %1101 = vmatpush1.bf16.msra.mxu0 %v7507_v34  ;;  %1187 = vmatpush1.bf16.msra.mxu1 %v7508_v35  ;;  %v7590_v34 = vld [vmem:[%s8660_s9 + $0x2c8] ss:$16 sps:$4 sm:$0xff]   ;;  %v7610_v46 = vld [vmem:[%s8660_s9 + $0x32c] ss:$16 sps:$4 sm:$0xff]  }
  0x54   : > { %1102 = vmatprep.subr.bf16.mxu0 %v7509_v36  ;;  %1188 = vmatprep.subr.bf16.mxu1 %v7511_v37  ;;  %v283_v35 = vld [vmem:[%s8718_s5 + $0x38] sm:$0xff]  ;;  %v7595_v36 = vld [vmem:[%s8660_s9 + $0x2e4] ss:$16 sps:$4 sm:$0xff]  }
  0x55   : > { %v7361_v37 = vpack.c.bf16 %v283_v35, %v279_v32  ;;  %v7616_v50 = vld [vmem:[%s8660_s9 + $0x34c] ss:$16 sps:$4 sm:$0xff]   ;;  %v7679_v32 = vld [vmem:[%s8660_s9 + $0x4a4] ss:$16 sps:$4 sm:$0xff]   ;;  %v7680_v35 = vld [vmem:[%s8660_s9 + $0x4a8] ss:$16 sps:$4 sm:$0xff]  }
  0x57   : > { %1103 = vmatpush1.bf16.msra.mxu0 %v7513_v38  ;;  %1189 = vmatpush1.bf16.msra.mxu1 %v7514_v39  ;;  %v7598_v38 = vld [vmem:[%s8660_s9 + $0x2ec] ss:$16 sps:$4 sm:$0xff]   ;;  %v7593_v39 = vld [vmem:[%s8660_s9 + $0x2e0] ss:$16 sps:$4 sm:$0xff]  }
  0x58   : > { %1104 = vmatprep.subr.bf16.mxu0 %v7515_v40  ;;  %1190 = vmatprep.subr.bf16.mxu1 %v7517_v41  ;;  %v7596_v40 = vld [vmem:[%s8660_s9 + $0x2e8] ss:$16 sps:$4 sm:$0xff]   ;;  %v7601_v41 = vld [vmem:[%s8660_s9 + $0x304] ss:$16 sps:$4 sm:$0xff]  }
  0x5b   : > { %1105 = vmatpush1.bf16.msra.mxu0 %v7519_v42  ;;  %1191 = vmatpush1.bf16.msra.mxu1 %v7520_v43  ;;  %v7604_v42 = vld [vmem:[%s8660_s9 + $0x30c] ss:$16 sps:$4 sm:$0xff]   ;;  %v7599_v43 = vld [vmem:[%s8660_s9 + $0x300] ss:$16 sps:$4 sm:$0xff]  }
  0x5c   : > { %1106 = vmatprep.subr.bf16.mxu0 %v7521_v44  ;;  %1192 = vmatprep.subr.bf16.mxu1 %v7523_v45  ;;  %v7602_v44 = vld [vmem:[%s8660_s9 + $0x308] ss:$16 sps:$4 sm:$0xff]   ;;  %v7607_v45 = vld [vmem:[%s8660_s9 + $0x324] ss:$16 sps:$4 sm:$0xff]  }
  0x5f   : > { %1107 = vmatpush1.bf16.msra.mxu0 %v7525_v48  ;;  %1193 = vmatpush1.bf16.msra.mxu1 %v7526_v49  ;;  %v7608_v48 = vld [vmem:[%s8660_s9 + $0x328] ss:$16 sps:$4 sm:$0xff]   ;;  %v7613_v49 = vld [vmem:[%s8660_s9 + $0x344] ss:$16 sps:$4 sm:$0xff]  }
  0x60   : > { %1108 = vmatprep.subr.bf16.mxu0 %v7527_v51  ;;  %1194 = vmatprep.subr.bf16.mxu1 %v7529_v52  ;;  %v7611_v51 = vld [vmem:[%s8660_s9 + $0x340] ss:$16 sps:$4 sm:$0xff]   ;;  %v7614_v52 = vld [vmem:[%s8660_s9 + $0x348] ss:$16 sps:$4 sm:$0xff]  }
  0x63   : > { %1109 = vmatpush1.bf16.msra.mxu0 %v7531_v53  ;;  %1195 = vmatpush1.bf16.msra.mxu1 %v7532_v54  ;;  %v7619_v53 = vld [vmem:[%s8660_s9 + $0x364] ss:$16 sps:$4 sm:$0xff]   ;;  %v7622_v54 = vld [vmem:[%s8660_s9 + $0x36c] ss:$16 sps:$4 sm:$0xff]  }
  0x64   : > { %1110 = vmatprep.subr.bf16.mxu0 %v7533_v55  ;;  %1196 = vmatprep.subr.bf16.mxu1 %v7535_v56  ;;  %v7617_v55 = vld [vmem:[%s8660_s9 + $0x360] ss:$16 sps:$4 sm:$0xff]   ;;  %v7620_v56 = vld [vmem:[%s8660_s9 + $0x368] ss:$16 sps:$4 sm:$0xff]  }
  0x67   : > { %1111 = vmatpush1.bf16.msra.mxu0 %v7537_v57  ;;  %1197 = vmatpush1.bf16.msra.mxu1 %v7538_v58  ;;  %v7625_v57 = vld [vmem:[%s8660_s9 + $0x384] ss:$16 sps:$4 sm:$0xff]   ;;  %v7628_v58 = vld [vmem:[%s8660_s9 + $0x38c] ss:$16 sps:$4 sm:$0xff]  }
  0x68   : > { %1112 = vmatprep.subr.bf16.mxu0 %v7539_v59  ;;  %1198 = vmatprep.subr.bf16.mxu1 %v7541_v60  ;;  %v7623_v59 = vld [vmem:[%s8660_s9 + $0x380] ss:$16 sps:$4 sm:$0xff]   ;;  %v7626_v60 = vld [vmem:[%s8660_s9 + $0x388] ss:$16 sps:$4 sm:$0xff]  }
  0x6b   : > { %1113 = vmatpush1.bf16.msra.mxu0 %v7543_v61  ;;  %1199 = vmatpush1.bf16.msra.mxu1 %v7544_v62  ;;  %v7631_v61 = vld [vmem:[%s8660_s9 + $0x3a4] ss:$16 sps:$4 sm:$0xff]   ;;  %v7634_v62 = vld [vmem:[%s8660_s9 + $0x3ac] ss:$16 sps:$4 sm:$0xff]  }
  0x6c   : > { %1114 = vmatprep.subr.bf16.mxu0 %v7545_v63  ;;  %1200 = vmatprep.subr.bf16.mxu1 %v7547_v0  ;;  %v7629_v63 = vld [vmem:[%s8660_s9 + $0x3a0] ss:$16 sps:$4 sm:$0xff]   ;;  %v7632_v0 = vld [vmem:[%s8660_s9 + $0x3a8] ss:$16 sps:$4 sm:$0xff]  }
  0x6f   : > { %1115 = vmatpush1.bf16.msra.mxu0 %v7549_v1  ;;  %1201 = vmatpush1.bf16.msra.mxu1 %v7550_v2  ;;  %v7637_v1 = vld [vmem:[%s8660_s9 + $0x3c4] ss:$16 sps:$4 sm:$0xff]   ;;  %v7640_v2 = vld [vmem:[%s8660_s9 + $0x3cc] ss:$16 sps:$4 sm:$0xff]  }
  0x70   : > { %1127 = vmatprep.subr.bf16.mxu0 %v7553_v3  ;;  %1213 = vmatprep.subr.bf16.mxu1 %v7556_v6  ;;  %v7635_v3 = vld [vmem:[%s8660_s9 + $0x3c0] ss:$16 sps:$4 sm:$0xff]   ;;  %v7646_v6 = vld [vmem:[%s8660_s9 + $0x3ec] ss:$16 sps:$4 sm:$0xff]  }
  0x72   : > { %1117 = vmatmul.mubr.bf16.vlgmr.msra.gmra.mrb[0].mxu0 %v7358_v9  ;;  %1203 = vmatmul.mubr.bf16.vlgmr.msra.gmra.mrb[0].mxu1 %v7358_v9  ;;  %v278_v9 = vld [vmem:[%s8718_s5 + $0x10] sm:$0xff] }
  0x73   : > { %1128 = vmatpush1.bf16.msra.mxu0 %v7551_v7  ;;  %1214 = vmatpush1.bf16.msra.mxu1 %v7554_v8  ;;  %v7641_v7 = vld [vmem:[%s8660_s9 + $0x3e0] ss:$16 sps:$4 sm:$0xff]   ;;  %v7644_v8 = vld [vmem:[%s8660_s9 + $0x3e8] ss:$16 sps:$4 sm:$0xff]  }
  0x74   : > { %1129 = vmatprep.subr.bf16.mxu0 %v7559_v10  ;;  %1215 = vmatprep.subr.bf16.mxu1 %v7562_v11  ;;  %v282_v10 = vld [vmem:[%s8718_s5 + $0x30] sm:$0xff] }
  0x75   : > { %1159 = vmatprep.mubr.bf16.mxu0 %v7361_v37  ;;  %1245 = vmatprep.mubr.bf16.mxu1 %v7361_v37  ;;  %v7649_v11 = vld [vmem:[%s8660_s9 + $0x404] ss:$16 sps:$4 sm:$0xff]   ;;  %v7688_v37 = vld [vmem:[%s8660_s9 + $0x4cc] ss:$16 sps:$4 sm:$0xff]  }
  0x77   : > { %1130 = vmatpush1.bf16.msra.mxu0 %v7557_v12  ;;  %1216 = vmatpush1.bf16.msra.mxu1 %v7560_v13  ;;  %v7652_v12 = vld [vmem:[%s8660_s9 + $0x40c] ss:$16 sps:$4 sm:$0xff]   ;;  %v7647_v13 = vld [vmem:[%s8660_s9 + $0x400] ss:$16 sps:$4 sm:$0xff]  }
  0x78   : > { %1131 = vmatprep.subr.bf16.mxu0 %v7565_v14  ;;  %1217 = vmatprep.subr.bf16.mxu1 %v7568_v15  ;;  %v7650_v14 = vld [vmem:[%s8660_s9 + $0x408] ss:$16 sps:$4 sm:$0xff]   ;;  %v7360_v15 = vpack.c.bf16 %v282_v10, %v278_v9  ;;  %v7737_v9 = vld [vmem:[%s8660_s9 + $0x5e0] ss:$16 sps:$4 sm:$0xff]  }
  0x79   : > { %v7740_v10 = vld [vmem:[%s8660_s9 + $0x5e8] ss:$16 sps:$4 sm:$0xff]  }
  0x7b   : > { %1132 = vmatpush1.bf16.msra.mxu0 %v7563_v16  ;;  %1218 = vmatpush1.bf16.msra.mxu1 %v7566_v17  ;;  %v7655_v16 = vld [vmem:[%s8660_s9 + $0x424] ss:$16 sps:$4 sm:$0xff]   ;;  %v7658_v17 = vld [vmem:[%s8660_s9 + $0x42c] ss:$16 sps:$4 sm:$0xff]  }
  0x7c   : > { %1133 = vmatprep.subr.bf16.mxu0 %v7571_v18  ;;  %1219 = vmatprep.subr.bf16.mxu1 %v7574_v19  ;;  %v7653_v18 = vld [vmem:[%s8660_s9 + $0x420] ss:$16 sps:$4 sm:$0xff]   ;;  %v7656_v19 = vld [vmem:[%s8660_s9 + $0x428] ss:$16 sps:$4 sm:$0xff]  }
  0x7f   : > { %1134 = vmatpush1.bf16.msra.mxu0 %v7569_v20  ;;  %1220 = vmatpush1.bf16.msra.mxu1 %v7572_v21  ;;  %v7661_v20 = vld [vmem:[%s8660_s9 + $0x444] ss:$16 sps:$4 sm:$0xff]   ;;  %v7664_v21 = vld [vmem:[%s8660_s9 + $0x44c] ss:$16 sps:$4 sm:$0xff]  }
  0x80   : > { %1135 = vmatprep.subr.bf16.mxu0 %v7577_v22  ;;  %1221 = vmatprep.subr.bf16.mxu1 %v7580_v23  ;;  %v7659_v22 = vld [vmem:[%s8660_s9 + $0x440] ss:$16 sps:$4 sm:$0xff]   ;;  %v7662_v23 = vld [vmem:[%s8660_s9 + $0x448] ss:$16 sps:$4 sm:$0xff]  }
  0x83   : > { %1136 = vmatpush1.bf16.msra.mxu0 %v7575_v24  ;;  %1222 = vmatpush1.bf16.msra.mxu1 %v7578_v25  ;;  %v7667_v24 = vld [vmem:[%s8660_s9 + $0x464] ss:$16 sps:$4 sm:$0xff]   ;;  %v7670_v25 = vld [vmem:[%s8660_s9 + $0x46c] ss:$16 sps:$4 sm:$0xff]  }
  0x84   : > { %1137 = vmatprep.subr.bf16.mxu0 %v7583_v26  ;;  %1223 = vmatprep.subr.bf16.mxu1 %v7586_v27  ;;  %v7665_v26 = vld [vmem:[%s8660_s9 + $0x460] ss:$16 sps:$4 sm:$0xff]   ;;  %v7668_v27 = vld [vmem:[%s8660_s9 + $0x468] ss:$16 sps:$4 sm:$0xff]  }
  0x87   : > { %1138 = vmatpush1.bf16.msra.mxu0 %v7581_v28  ;;  %1224 = vmatpush1.bf16.msra.mxu1 %v7584_v29  ;;  %v7673_v28 = vld [vmem:[%s8660_s9 + $0x484] ss:$16 sps:$4 sm:$0xff]   ;;  %v7676_v29 = vld [vmem:[%s8660_s9 + $0x48c] ss:$16 sps:$4 sm:$0xff]  }
  0x88   : > { %1139 = vmatprep.subr.bf16.mxu0 %v7589_v30  ;;  %1225 = vmatprep.subr.bf16.mxu1 %v7592_v31  ;;  %v7671_v30 = vld [vmem:[%s8660_s9 + $0x480] ss:$16 sps:$4 sm:$0xff]   ;;  %v7674_v31 = vld [vmem:[%s8660_s9 + $0x488] ss:$16 sps:$4 sm:$0xff]  }
  0x8b   : > { %1140 = vmatpush1.bf16.msra.mxu0 %v7587_v33  ;;  %1226 = vmatpush1.bf16.msra.mxu1 %v7590_v34  ;;  %v7682_v33 = vld [vmem:[%s8660_s9 + $0x4ac] ss:$16 sps:$4 sm:$0xff]   ;;  %v7677_v34 = vld [vmem:[%s8660_s9 + $0x4a0] ss:$16 sps:$4 sm:$0xff]  }
  0x8c   : > { %1141 = vmatprep.subr.bf16.mxu0 %v7595_v36  ;;  %1227 = vmatprep.subr.bf16.mxu1 %v7598_v38  ;;  %v7685_v36 = vld [vmem:[%s8660_s9 + $0x4c4] ss:$16 sps:$4 sm:$0xff]   ;;  %v7683_v38 = vld [vmem:[%s8660_s9 + $0x4c0] ss:$16 sps:$4 sm:$0xff]  }
  0x8f   : > { %1142 = vmatpush1.bf16.msra.mxu0 %v7593_v39  ;;  %1228 = vmatpush1.bf16.msra.mxu1 %v7596_v40  ;;  %v7686_v39 = vld [vmem:[%s8660_s9 + $0x4c8] ss:$16 sps:$4 sm:$0xff]   ;;  %v7691_v40 = vld [vmem:[%s8660_s9 + $0x4e4] ss:$16 sps:$4 sm:$0xff]  }
  0x90   : > { %1143 = vmatprep.subr.bf16.mxu0 %v7601_v41  ;;  %1229 = vmatprep.subr.bf16.mxu1 %v7604_v42  ;;  %v7694_v41 = vld [vmem:[%s8660_s9 + $0x4ec] ss:$16 sps:$4 sm:$0xff]   ;;  %v7689_v42 = vld [vmem:[%s8660_s9 + $0x4e0] ss:$16 sps:$4 sm:$0xff]  }
  0x93   : > { %1144 = vmatpush1.bf16.msra.mxu0 %v7599_v43  ;;  %1230 = vmatpush1.bf16.msra.mxu1 %v7602_v44  ;;  %v7692_v43 = vld [vmem:[%s8660_s9 + $0x4e8] ss:$16 sps:$4 sm:$0xff]   ;;  %v7697_v44 = vld [vmem:[%s8660_s9 + $0x504] ss:$16 sps:$4 sm:$0xff]  }
  0x94   : > { %1145 = vmatprep.subr.bf16.mxu0 %v7607_v45  ;;  %1231 = vmatprep.subr.bf16.mxu1 %v7610_v46  ;;  %v7700_v45 = vld [vmem:[%s8660_s9 + $0x50c] ss:$16 sps:$4 sm:$0xff]   ;;  %v7695_v46 = vld [vmem:[%s8660_s9 + $0x500] ss:$16 sps:$4 sm:$0xff]  }
  0x97   : > { %1146 = vmatpush1.bf16.msra.mxu0 %v7605_v47  ;;  %1232 = vmatpush1.bf16.msra.mxu1 %v7608_v48  ;;  %v7698_v47 = vld [vmem:[%s8660_s9 + $0x508] ss:$16 sps:$4 sm:$0xff]   ;;  %v7703_v48 = vld [vmem:[%s8660_s9 + $0x524] ss:$16 sps:$4 sm:$0xff]  }
  0x98   : > { %1147 = vmatprep.subr.bf16.mxu0 %v7613_v49  ;;  %1233 = vmatprep.subr.bf16.mxu1 %v7616_v50  ;;  %v7706_v49 = vld [vmem:[%s8660_s9 + $0x52c] ss:$16 sps:$4 sm:$0xff]   ;;  %v7701_v50 = vld [vmem:[%s8660_s9 + $0x520] ss:$16 sps:$4 sm:$0xff]  }
  0x9b   : > { %1148 = vmatpush1.bf16.msra.mxu0 %v7611_v51  ;;  %1234 = vmatpush1.bf16.msra.mxu1 %v7614_v52  ;;  %v7704_v51 = vld [vmem:[%s8660_s9 + $0x528] ss:$16 sps:$4 sm:$0xff]   ;;  %v7709_v52 = vld [vmem:[%s8660_s9 + $0x544] ss:$16 sps:$4 sm:$0xff]  }
  0x9c   : > { %1149 = vmatprep.subr.bf16.mxu0 %v7619_v53  ;;  %1235 = vmatprep.subr.bf16.mxu1 %v7622_v54  ;;  %v7712_v53 = vld [vmem:[%s8660_s9 + $0x54c] ss:$16 sps:$4 sm:$0xff]   ;;  %v7707_v54 = vld [vmem:[%s8660_s9 + $0x540] ss:$16 sps:$4 sm:$0xff]  }
  0x9f   : > { %1150 = vmatpush1.bf16.msra.mxu0 %v7617_v55  ;;  %1236 = vmatpush1.bf16.msra.mxu1 %v7620_v56  ;;  %v7710_v55 = vld [vmem:[%s8660_s9 + $0x548] ss:$16 sps:$4 sm:$0xff]   ;;  %v7715_v56 = vld [vmem:[%s8660_s9 + $0x564] ss:$16 sps:$4 sm:$0xff]  }
  0xa0   : > { %1151 = vmatprep.subr.bf16.mxu0 %v7625_v57  ;;  %1237 = vmatprep.subr.bf16.mxu1 %v7628_v58  ;;  %v7718_v57 = vld [vmem:[%s8660_s9 + $0x56c] ss:$16 sps:$4 sm:$0xff]   ;;  %v7713_v58 = vld [vmem:[%s8660_s9 + $0x560] ss:$16 sps:$4 sm:$0xff]  }
  0xa3   : > { %1152 = vmatpush1.bf16.msra.mxu0 %v7623_v59  ;;  %1238 = vmatpush1.bf16.msra.mxu1 %v7626_v60  ;;  %v7716_v59 = vld [vmem:[%s8660_s9 + $0x568] ss:$16 sps:$4 sm:$0xff]   ;;  %v7721_v60 = vld [vmem:[%s8660_s9 + $0x584] ss:$16 sps:$4 sm:$0xff]  }
  0xa4   : > { %1153 = vmatprep.subr.bf16.mxu0 %v7631_v61  ;;  %1239 = vmatprep.subr.bf16.mxu1 %v7634_v62  ;;  %v7724_v61 = vld [vmem:[%s8660_s9 + $0x58c] ss:$16 sps:$4 sm:$0xff]   ;;  %v7719_v62 = vld [vmem:[%s8660_s9 + $0x580] ss:$16 sps:$4 sm:$0xff]  }
  0xa7   : > { %1154 = vmatpush1.bf16.msra.mxu0 %v7629_v63  ;;  %1240 = vmatpush1.bf16.msra.mxu1 %v7632_v0  ;;  %v7722_v63 = vld [vmem:[%s8660_s9 + $0x588] ss:$16 sps:$4 sm:$0xff]   ;;  %v7727_v0 = vld [vmem:[%s8660_s9 + $0x5a4] ss:$16 sps:$4 sm:$0xff]  }
  0xa8   : > { %1155 = vmatprep.subr.bf16.mxu0 %v7637_v1  ;;  %1241 = vmatprep.subr.bf16.mxu1 %v7640_v2  ;;  %v7730_v1 = vld [vmem:[%s8660_s9 + $0x5ac] ss:$16 sps:$4 sm:$0xff]   ;;  %v7725_v2 = vld [vmem:[%s8660_s9 + $0x5a0] ss:$16 sps:$4 sm:$0xff]  }
  0xab   : > { %1156 = vmatpush1.bf16.msra.mxu0 %v7635_v3  ;;  %1242 = vmatpush1.bf16.msra.mxu1 %v7638_v4  ;;  %v7728_v3 = vld [vmem:[%s8660_s9 + $0x5a8] ss:$16 sps:$4 sm:$0xff]   ;;  %v7733_v4 = vld [vmem:[%s8660_s9 + $0x5c4] ss:$16 sps:$4 sm:$0xff]  }
  0xac   : > { %1157 = vmatprep.subr.bf16.mxu0 %v7643_v5  ;;  %1243 = vmatprep.subr.bf16.mxu1 %v7646_v6  ;;  %v7736_v5 = vld [vmem:[%s8660_s9 + $0x5cc] ss:$16 sps:$4 sm:$0xff]   ;;  %v7731_v6 = vld [vmem:[%s8660_s9 + $0x5c0] ss:$16 sps:$4 sm:$0xff]  }
  0xaf   : > { %1158 = vmatpush1.bf16.msra.mxu0 %v7641_v7  ;;  %1244 = vmatpush1.bf16.msra.mxu1 %v7644_v8  ;;  %v7734_v7 = vld [vmem:[%s8660_s9 + $0x5c8] ss:$16 sps:$4 sm:$0xff]   ;;  %v7739_v8 = vld [vmem:[%s8660_s9 + $0x5e4] ss:$16 sps:$4 sm:$0xff]  }
  0xb0   : > { %2274 = vmatprep.subr.bf16.mxu0 %v7649_v11  ;;  %2360 = vmatprep.subr.bf16.mxu1 %v7652_v12  ;;  %v7742_v11 = vld [vmem:[%s8660_s9 + $0x5ec] ss:$16 sps:$4 sm:$0xff]   ;;  %v7745_v12 = vld [vmem:[%s8660_s9 + $0x604] ss:$16 sps:$4 sm:$0xff]  }
  0xb2   : > { %1160 = vmatmul.mubr.bf16.vlgmr.msra.gmra.mrb[0].mxu0 %v7360_v15  ;;  %1246 = vmatmul.mubr.bf16.vlgmr.msra.gmra.mrb[0].mxu1 %v7360_v15 }
  0xb3   : > { %2275 = vmatpush1.bf16.msra.mxu0 %v7647_v13  ;;  %2361 = vmatpush1.bf16.msra.mxu1 %v7650_v14  ;;  %v7748_v13 = vld [vmem:[%s8660_s9 + $0x60c] ss:$16 sps:$4 sm:$0xff]   ;;  %v271_v14 = vlaneseq }
  0xb4   : > { %2276 = vmatprep.subr.bf16.mxu0 %v7655_v16  ;;  %2362 = vmatprep.subr.bf16.mxu1 %v7658_v17  ;;  %v8548_v16 = vmov 0.0  }
  0xb5   : > { %v8878_v15 = vshrl.u32 %v271_v14, 7 }
  0xb7   : > { %2277 = vmatpush1.bf16.msra.mxu0 %v7653_v18  ;;  %2363 = vmatpush1.bf16.msra.mxu1 %v7656_v19  ;;  %vm273_vm0 = vcmp.lt.s32.totalorder %v8878_v15, 2 }
  0xb8   : > { %2278 = vmatprep.subr.bf16.mxu0 %v7661_v20  ;;  %2364 = vmatprep.subr.bf16.mxu1 %v7664_v21  ;;  %v8881_v17 = vsel %vm273_vm0, 1.0, %v8548_v16  ;;  %v8923_v16 = vld [vmem:[%s8915_s8] ss:$8 sm:$0xf] }
  0xbb   : > { %2279 = vmatpush1.bf16.msra.mxu0 %v7659_v22  ;;  %2365 = vmatpush1.bf16.msra.mxu1 %v7662_v23 }
  0xbc   : > { %2280 = vmatprep.subr.bf16.mxu0 %v7667_v24  ;;  %2366 = vmatprep.subr.bf16.mxu1 %v7670_v25 }
  0xbf   : > { %2281 = vmatpush1.bf16.msra.mxu0 %v7665_v26  ;;  %2367 = vmatpush1.bf16.msra.mxu1 %v7668_v27 }
  0xc0   : > { %2282 = vmatprep.subr.bf16.mxu0 %v7673_v28  ;;  %2368 = vmatprep.subr.bf16.mxu1 %v7676_v29 }
  0xc3   : > { %2283 = vmatpush1.bf16.msra.mxu0 %v7671_v30  ;;  %2369 = vmatpush1.bf16.msra.mxu1 %v7674_v31 }
  0xc4   : > { %2284 = vmatprep.subr.bf16.mxu0 %v7679_v32  ;;  %2370 = vmatprep.subr.bf16.mxu1 %v7682_v33 }
  0xc7   : > { %2285 = vmatpush1.bf16.msra.mxu0 %v7677_v34  ;;  %2371 = vmatpush1.bf16.msra.mxu1 %v7680_v35 }
  0xc8   : > { %2286 = vmatprep.subr.bf16.mxu0 %v7685_v36  ;;  %2372 = vmatprep.subr.bf16.mxu1 %v7688_v37 }
  0xcb   : > { %2287 = vmatpush1.bf16.msra.mxu0 %v7683_v38  ;;  %2373 = vmatpush1.bf16.msra.mxu1 %v7686_v39 }
  0xcc   : > { %2288 = vmatprep.subr.bf16.mxu0 %v7691_v40  ;;  %2374 = vmatprep.subr.bf16.mxu1 %v7694_v41 }
  0xcf   : > { %2289 = vmatpush1.bf16.msra.mxu0 %v7689_v42  ;;  %2375 = vmatpush1.bf16.msra.mxu1 %v7692_v43 }
  0xd0   : > { %2290 = vmatprep.subr.bf16.mxu0 %v7697_v44  ;;  %2376 = vmatprep.subr.bf16.mxu1 %v7700_v45 }
  0xd3   : > { %2291 = vmatpush1.bf16.msra.mxu0 %v7695_v46  ;;  %2377 = vmatpush1.bf16.msra.mxu1 %v7698_v47 }
  0xd4   : > { %2292 = vmatprep.subr.bf16.mxu0 %v7703_v48  ;;  %2378 = vmatprep.subr.bf16.mxu1 %v7706_v49 }
  0xd7   : > { %2293 = vmatpush1.bf16.msra.mxu0 %v7701_v50  ;;  %2379 = vmatpush1.bf16.msra.mxu1 %v7704_v51 }
  0xd8   : > { %2294 = vmatprep.subr.bf16.mxu0 %v7709_v52  ;;  %2380 = vmatprep.subr.bf16.mxu1 %v7712_v53 }
  0xdb   : > { %2295 = vmatpush1.bf16.msra.mxu0 %v7707_v54  ;;  %2381 = vmatpush1.bf16.msra.mxu1 %v7710_v55 }
  0xdc   : > { %2296 = vmatprep.subr.bf16.mxu0 %v7715_v56  ;;  %2382 = vmatprep.subr.bf16.mxu1 %v7718_v57 }
  0xdf   : > { %2297 = vmatpush1.bf16.msra.mxu0 %v7713_v58  ;;  %2383 = vmatpush1.bf16.msra.mxu1 %v7716_v59 }
  0xe0   : > { %2298 = vmatprep.subr.bf16.mxu0 %v7721_v60  ;;  %2384 = vmatprep.subr.bf16.mxu1 %v7724_v61 }
  0xe3   : > { %2299 = vmatpush1.bf16.msra.mxu0 %v7719_v62  ;;  %2385 = vmatpush1.bf16.msra.mxu1 %v7722_v63 }
  0xe4   : > { %2300 = vmatprep.subr.bf16.mxu0 %v7727_v0  ;;  %2386 = vmatprep.subr.bf16.mxu1 %v7730_v1 }
  0xe7   : > { %2301 = vmatpush1.bf16.msra.mxu0 %v7725_v2  ;;  %2387 = vmatpush1.bf16.msra.mxu1 %v7728_v3 }
  0xe8   : > { %2302 = vmatprep.subr.bf16.mxu0 %v7733_v4  ;;  %2388 = vmatprep.subr.bf16.mxu1 %v7736_v5 }
  0xeb   : > { %2303 = vmatpush1.bf16.msra.mxu0 %v7731_v6  ;;  %2389 = vmatpush1.bf16.msra.mxu1 %v7734_v7 }
  0xec   : > { %2304 = vmatprep.subr.bf16.mxu0 %v7739_v8  ;;  %2390 = vmatprep.subr.bf16.mxu1 %v7742_v11 }
  0xef   : > { %2305 = vmatpush1.bf16.msra.mxu0 %v7737_v9  ;;  %2391 = vmatpush1.bf16.msra.mxu1 %v7740_v10  ;;  %v8918_v10 = vsub.s32 2, %v8878_v15 }
  0xf0   : > { %2317 = vmatprep.subr.bf16.mxu0 %v7745_v12  ;;  %2403 = vmatprep.subr.bf16.mxu1 %v7748_v13 }
 0x185   : > { %v8883_v18 = vpop.f32.mrb[0].mxu0  ;;  %v8885_v19 = vpop.f32.mrb[0].mxu1 }
 0x186   : > { %v1259_v20 = vmul.f32 %v8881_v17, %v8883_v18  ;;  %v1261_v21 = vmul.f32 %v8881_v17, %v8885_v19  ;;  %v8891_v22 = vpop.f32.mrb[1].mxu0  ;;  %v8893_v23 = vpop.f32.mrb[1].mxu1 }
 0x187   : > { %v1260_v24 = vmul.f32 %v8881_v17, %v8891_v22  ;;  %v1262_v25 = vmul.f32 %v8881_v17, %v8893_v23  ;;  %v8899_v26 = vpop.f32.mrb[2].mxu0  ;;  %v8901_v27 = vpop.f32.mrb[2].mxu1 }
 0x188   : > { %v1267_v28 = vrot.slane %v1259_v20, 4  ;;  %v1323_v29 = vmul.f32 %v1259_v20, %v8883_v18  ;;  %v1279_v30 = vrot.slane %v1261_v21, 4  ;;  %v1325_v31 = vmul.f32 %v1261_v21, %v8885_v19  ;;  %v8905_v32 = vpop.f32.mrb[3].mxu0  ;;  %v8907_v33 = vpop.f32.mrb[3].mxu1 }
 0x189   : > { %v1273_v34 = vrot.slane %v1260_v24, 4  ;;  %v1324_v35 = vmul.f32 %v1260_v24, %v8891_v22  ;;  %v1285_v36 = vrot.slane %v1262_v25, 4  ;;  %v1326_v37 = vmul.f32 %v1262_v25, %v8893_v23 }
 0x18a   : > { %v1268_v38 = vadd.f32 %v1267_v28, %v1259_v20  ;;  %v1331_v39 = vrot.slane %v1323_v29, 4  ;;  %v1280_v40 = vadd.f32 %v1279_v30, %v1261_v21  ;;  %v1343_v41 = vrot.slane %v1325_v31, 4  ;;  %v8926_v21 = vld [vmem:[%s8915_s8 + $0x1] ss:$8 sm:$0xf] }
 0x18b   : > { %v1274_v42 = vadd.f32 %v1273_v34, %v1260_v24  ;;  %v1337_v43 = vrot.slane %v1324_v35, 4  ;;  %v1286_v44 = vadd.f32 %v1285_v36, %v1262_v25  ;;  %v1349_v45 = vrot.slane %v1326_v37, 4 }
 0x18c   : > { %v1269_v46 = vrot.slane %v1268_v38, 2  ;;  %v1332_v47 = vadd.f32 %v1331_v39, %v1323_v29  ;;  %v1281_v48 = vrot.slane %v1280_v40, 2  ;;  %v1344_v49 = vadd.f32 %v1343_v41, %v1325_v31 }
 0x18d   : > { %v1275_v50 = vrot.slane %v1274_v42, 2  ;;  %v1338_v51 = vadd.f32 %v1337_v43, %v1324_v35  ;;  %v1287_v52 = vrot.slane %v1286_v44, 2  ;;  %v1350_v53 = vadd.f32 %v1349_v45, %v1326_v37 }
 0x18e   : > { %v1270_v54 = vadd.f32 %v1269_v46, %v1268_v38  ;;  %v1333_v55 = vrot.slane %v1332_v47, 2  ;;  %v1282_v56 = vadd.f32 %v1281_v48, %v1280_v40  ;;  %v1345_v57 = vrot.slane %v1344_v49, 2 }
 0x18f   : > { %v1276_v58 = vadd.f32 %v1275_v50, %v1274_v42  ;;  %v1339_v59 = vrot.slane %v1338_v51, 2  ;;  %v1288_v60 = vadd.f32 %v1287_v52, %v1286_v44  ;;  %v1351_v61 = vrot.slane %v1350_v53, 2 }
 0x190   : > { %v1271_v62 = vrot.slane %v1270_v54, 1  ;;  %v1334_v63 = vadd.f32 %v1333_v55, %v1332_v47  ;;  %v1283_v0 = vrot.slane %v1282_v56, 1  ;;  %v1346_v1 = vadd.f32 %v1345_v57, %v1344_v49 }
 0x191   : > { %v1277_v2 = vrot.slane %v1276_v58, 1  ;;  %v1340_v3 = vadd.f32 %v1339_v59, %v1338_v51  ;;  %v1289_v4 = vrot.slane %v1288_v60, 1  ;;  %v1352_v8 = vadd.f32 %v1351_v61, %v1350_v53 }
 0x192   : > { %v1335_v5 = vrot.slane %v1334_v63, 1  ;;  %v1284_v6 = vadd.f32 %v1283_v0, %v1282_v56  ;;  %v1347_v7 = vrot.slane %v1346_v1, 1  ;;  %v1272_v9 = vadd.f32 %v1271_v62, %v1270_v54 }
 0x193   : > { %v1278_v13 = vadd.f32 %v1277_v2, %v1276_v58  ;;  %v1341_v14 = vrot.slane %v1340_v3, 1  ;;  %v1290_v20 = vadd.f32 %v1289_v4, %v1288_v60  ;;  %v1353_v28 = vrot.slane %v1352_v8, 1 }
 0x194   : > { %v8920_v11 = vmul.f32 0.5, %v1284_v6  ;;  %v1348_v12 = vadd.f32 %v1347_v7, %v1346_v1  ;;  %v1336_v24 = vadd.f32 %v1335_v5, %v1334_v63  ;;  %v8928_v29 = vmul.f32 0.5, %v1272_v9 }
 0x195   : > { %v8934_v31 = vrot.slane %v8923_v16, %v8918_v10  ;;  %v8936_v34 = vmul.f32 0.5, %v1278_v13  ;;  %v1342_v35 = vadd.f32 %v1341_v14, %v1340_v3  ;;  %v8940_v37 = vrot.slane %v8926_v21, %v8918_v10 }
 0x196   : > { %v1381_v25 = vmul.f32 0.5, %v1348_v12  ;;  %v1389_v30 = vmul.f32 %v8920_v11, %v8920_v11  ;;  %v8942_v38 = vmul.f32 0.5, %v1290_v20  ;;  %v1263_v39 = vmul.f32 %v8881_v17, %v8899_v26 }
 0x197   : > { %v1379_v40 = vmul.f32 0.5, %v1336_v24  ;;  %v1354_v41 = vadd.f32 %v1353_v28, %v1352_v8  ;;  %v1265_v42 = vmul.f32 %v8881_v17, %v8901_v27  ;;  %v1264_v43 = vmul.f32 %v8881_v17, %v8905_v32 }
 0x198   : > { %v1397_v36 = vsub.f32 %v1381_v25, %v1389_v30  ;;  %v1387_v44 = vmul.f32 %v8928_v29, %v8928_v29  ;;  %v1291_v46 = vrot.slane %v1263_v39, 4  ;;  %v1327_v47 = vmul.f32 %v1263_v39, %v8899_v26 }
 0x199   : > { %v1380_v48 = vmul.f32 0.5, %v1342_v35  ;;  %v1388_v49 = vmul.f32 %v8936_v34, %v8936_v34  ;;  %v1303_v50 = vrot.slane %v1265_v42, 4  ;;  %v1329_v51 = vmul.f32 %v1265_v42, %v8901_v27 }
 0x19a   : > { %v1413_v45 = vadd.f32 1e-05, %v1397_v36  ;;  %v1292_v52 = vadd.f32 %v1291_v46, %v1263_v39  ;;  %v1355_v53 = vrot.slane %v1327_v47, 4  ;;  %v1297_v54 = vrot.slane %v1264_v43, 4 }
 0x19b   : > { %v1405_v55 = vsub.f32 %v8885_v19, %v8920_v11  ;;  %v1304_v56 = vadd.f32 %v1303_v50, %v1265_v42  ;;  %v1367_v57 = vrot.slane %v1329_v51, 4  ;;  %v1328_v58 = vmul.f32 %v1264_v43, %v8905_v32 }
 0x19c   : > { %8415 = vrsqrt.f32 %v1413_v45  ;;  %v1395_v59 = vsub.f32 %v1379_v40, %v1387_v44  ;;  %v1293_v60 = vrot.slane %v1292_v52, 2  ;;  %v1356_v61 = vadd.f32 %v1355_v53, %v1327_v47 }
 0x19d   : > { %v1298_v62 = vadd.f32 %v1297_v54, %v1264_v43  ;;  %v1305_v63 = vrot.slane %v1304_v56, 2  ;;  %v1368_v0 = vadd.f32 %v1367_v57, %v1329_v51  ;;  %v1361_v1 = vrot.slane %v1328_v58, 4 }
 0x19e   : > { %v1266_v2 = vmul.f32 %v8881_v17, %v8907_v33  ;;  %v1396_v3 = vsub.f32 %v1380_v48, %v1388_v49  ;;  %v1294_v4 = vadd.f32 %v1293_v60, %v1292_v52  ;;  %v1357_v5 = vrot.slane %v1356_v61, 2 }
 0x19f   : > { %v1299_v6 = vrot.slane %v1298_v62, 2  ;;  %v1306_v7 = vadd.f32 %v1305_v63, %v1304_v56  ;;  %v1369_v19 = vrot.slane %v1368_v0, 2  ;;  %v1362_v8 = vadd.f32 %v1361_v1, %v1328_v58 }
 0x1a0   : > { %v1309_v9 = vrot.slane %v1266_v2, 4  ;;  %v1411_v11 = vadd.f32 1e-05, %v1395_v59  ;;  %v1295_v12 = vrot.slane %v1294_v4, 1  ;;  %v1358_v13 = vadd.f32 %v1357_v5, %v1356_v61 }
 0x1a1   : > { %v1300_v14 = vadd.f32 %v1299_v6, %v1298_v62  ;;  %v1382_v20 = vmul.f32 0.5, %v1354_v41  ;;  %v1307_v24 = vrot.slane %v1306_v7, 1  ;;  %v1370_v25 = vadd.f32 %v1369_v19, %v1368_v0 }
 0x1a2   : > { %v1363_v28 = vrot.slane %v1362_v8, 2  ;;  %v1296_v30 = vadd.f32 %v1295_v12, %v1294_v4  ;;  %v1359_v35 = vrot.slane %v1358_v13, 1  ;;  %v1310_v39 = vadd.f32 %v1309_v9, %v1266_v2 }
 0x1a3   : > { %v1301_v36 = vrot.slane %v1300_v14, 1  ;;  %v1308_v40 = vadd.f32 %v1307_v24, %v1306_v7  ;;  %v1371_v42 = vrot.slane %v1370_v25, 1  ;;  %v1330_v44 = vmul.f32 %v1266_v2, %v8907_v33 }
 0x1a4   : > { %v1364_v43 = vadd.f32 %v1363_v28, %v1362_v8  ;;  %8417 = vrsqrt.f32 %v1411_v11  ;;  %v1412_v46 = vadd.f32 1e-05, %v1396_v3  ;;  %v1319_v47 = vmul.f32 0.5, %v1296_v30 }
 0x1a5   : > { %v1360_v48 = vadd.f32 %v1359_v35, %v1358_v13  ;;  %v1321_v50 = vmul.f32 0.5, %v1308_v40  ;;  %v1372_v41 = vadd.f32 %v1371_v42, %v1370_v25  ;;  %v1302_v51 = vadd.f32 %v1301_v36, %v1300_v14 }
 0x1a6   : > { %v8416_v45 = vpop.eup %8415  ;;  %v1391_v53 = vmul.f32 %v1319_v47, %v1319_v47  ;;  %v1365_v54 = vrot.slane %v1364_v43, 1  ;;  %v1311_v56 = vrot.slane %v1310_v39, 2  ;;  %v1390_v58 = vmul.f32 %v8942_v38, %v8942_v38 }
 0x1a7   : > { %v1429_v49 = vmul.f32 %v8416_v45, %v1405_v55  ;;  %v1383_v52 = vmul.f32 0.5, %v1360_v48  ;;  %v1385_v59 = vmul.f32 0.5, %v1372_v41  ;;  %v1373_v60 = vrot.slane %v1330_v44, 4 }
 0x1a8   : > { %v1393_v62 = vmul.f32 %v1321_v50, %v1321_v50  ;;  %8419 = vrsqrt.f32 %v1412_v46  ;;  %v1320_v55 = vmul.f32 0.5, %v1302_v51  ;;  %v1366_v2 = vadd.f32 %v1365_v54, %v1364_v43 }
 0x1a9   : > { %v1458_v57 = vmul.f32 %v8934_v31, %v1429_v49  ;;  %v1399_v61 = vsub.f32 %v1383_v52, %v1391_v53  ;;  %v1312_v3 = vadd.f32 %v1311_v56, %v1310_v39  ;;  %v1398_v4 = vsub.f32 %v1382_v20, %v1390_v58 }
 0x1aa   : > { %v1401_v1 = vsub.f32 %v1385_v59, %v1393_v62  ;;  %v1392_v5 = vmul.f32 %v1320_v55, %v1320_v55  ;;  %v1374_v6 = vadd.f32 %v1373_v60, %v1330_v44  ;;  %v1384_v19 = vmul.f32 0.5, %v1366_v2 }
 0x1ab   : > { %v8966_v63 = vadd.f32 %v8940_v37, %v1458_v57  ;;  %v1415_v0 = vadd.f32 1e-05, %v1399_v61  ;;  %v1313_v8 = vrot.slane %v1312_v3, 1  ;;  %v8969_v9 = vsub.s32 0, %v8878_v15 }
 0x1ac   : > { %v1417_v7 = vadd.f32 1e-05, %v1401_v1  ;;  %v1375_v11 = vrot.slane %v1374_v6, 2  ;;  %v1400_v13 = vsub.f32 %v1384_v19, %v1392_v5  ;;  %v1403_v24 = vsub.f32 %v8883_v18, %v8928_v29 }
 0x1ad   : > { %8421 = vrsqrt.f32 %v1415_v0  ;;  %v1314_v14 = vadd.f32 %v1313_v8, %v1312_v3  ;;  %v1414_v25 = vadd.f32 1e-05, %v1398_v4  ;;  %v1439_v36 = vrot.slane %v8923_v16, %v8969_v9 }
 0x1ae   : > { %v8418_v12 = vpop.eup %8417  ;;  %8423 = vrsqrt.f32 %v1417_v7  ;;  %v1376_v28 = vadd.f32 %v1375_v11, %v1374_v6  ;;  %v1416_v20 = vadd.f32 1e-05, %v1400_v13  ;;  %v8976_v40 = vsub.s32 1, %v8878_v15 }
 0x1af   : > { %v1322_v30 = vmul.f32 0.5, %v1314_v14  ;;  %v1427_v35 = vmul.f32 %v8418_v12, %v1403_v24  ;;  %v1404_v18 = vsub.f32 %v8891_v22, %v8936_v34  ;;  %v1468_v45 = vrot.slane %v8926_v21, %v8969_v9  ;;  %v7743_v14 = vld [vmem:[%s8660_s9 + $0x600] ss:$16 sps:$4 sm:$0xff]   ;;  %v7746_v24 = vld [vmem:[%s8660_s9 + $0x608] ss:$16 sps:$4 sm:$0xff]  }
 0x1b0   : > { %v1377_v39 = vrot.slane %v1376_v28, 1  ;;  %8425 = vrsqrt.f32 %v1416_v20  ;;  %v1407_v46 = vsub.f32 %v8899_v26, %v1319_v47  ;;  %v1443_v51 = vrot.slane %v8923_v16, %v8976_v40 }
 0x1b1   : > { %8427 = vrsqrt.f32 %v1414_v25  ;;  %v1394_v44 = vmul.f32 %v1322_v30, %v1322_v30  ;;  %v1456_v29 = vmul.f32 %v1439_v36, %v1427_v35  ;;  %v1409_v53 = vsub.f32 %v8901_v27, %v1321_v50 }
 0x1b2   : > { %v8420_v42 = vpop.eup %8419  ;;  %v1378_v43 = vadd.f32 %v1377_v39, %v1376_v28  ;;  %v1472_v60 = vrot.slane %v8926_v21, %v8976_v40  ;;  %v1408_v61 = vsub.f32 %v8905_v32, %v1320_v55  ;;  %v8991_v0 = vsub.s32 3, %v8878_v15  ;;  %v7754_v28 = vld [vmem:[%s8660_s9 + $0x62c] ss:$16 sps:$4 sm:$0xff]  }
 0x1b3   : > { %v1428_v41 = vmul.f32 %v8420_v42, %v1404_v18  ;;  %v1485_v57 = vadd.f32 %v1468_v45, %v1456_v29  ;;  %v1406_v4 = vsub.f32 %v8893_v23, %v8942_v38  ;;  %v1495_v32 = vmax.f32 %v8966_v63, 0.0  ;;  %v7760_v39 = vld [vmem:[%s8660_s9 + $0x64c] ss:$16 sps:$4 sm:$0xff]   ;;  %v7758_v18 = vld [vmem:[%s8660_s9 + $0x648] ss:$16 sps:$4 sm:$0xff]  }
 0x1b4   : > { %v1386_v48 = vmul.f32 0.5, %v1378_v43  ;;  %v1410_v38 = vsub.f32 %v8907_v33, %v1322_v30  ;;  %v1480_v12 = vrot.slane %v8926_v21, %v8991_v0  ;;  %v7749_v21 = vld [vmem:[%s8660_s9 + $0x620] ss:$16 sps:$4 sm:$0xff]   ;;  %v7752_v30 = vld [vmem:[%s8660_s9 + $0x628] ss:$16 sps:$4 sm:$0xff]  }
 0x1b5   : > { %v1457_v59 = vmul.f32 %v1443_v51, %v1428_v41  ;;  %v1493_v2 = vmax.f32 %v1485_v57, 0.0  ;;  %v7769_v41 = vld [vmem:[%s8660_s9 + $0x684] ss:$16 sps:$4 sm:$0xff]   ;;  %v7773_v57 = vld [vmem:[%s8660_s9 + $0x6a0] ss:$16 sps:$4 sm:$0xff]  }
 0x1b6   : > { %v1402_v54 = vsub.f32 %v1386_v48, %v1394_v44  ;;  %v7755_v44 = vld [vmem:[%s8660_s9 + $0x640] ss:$16 sps:$4 sm:$0xff]  }
 0x1b7   : > { %v8422_v49 = vpop.eup %8421  ;;  %v1486_v5 = vadd.f32 %v1472_v60, %v1457_v59  ;;  %v7761_v48 = vld [vmem:[%s8660_s9 + $0x660] ss:$16 sps:$4 sm:$0xff]  }
 0x1b8   : > { %v1431_v52 = vmul.f32 %v8422_v49, %v1407_v46  ;;  %v8424_v56 = vpop.eup %8423  ;;  %v1418_v34 = vadd.f32 1e-05, %v1402_v54  ;;  %v7766_v46 = vld [vmem:[%s8660_s9 + $0x66c] ss:$16 sps:$4 sm:$0xff]   ;;  %v7764_v49 = vld [vmem:[%s8660_s9 + $0x668] ss:$16 sps:$4 sm:$0xff]  }
 0x1b9   : > { %v1433_v22 = vmul.f32 %v8424_v56, %v1409_v53  ;;  %v1494_v8 = vmax.f32 %v1486_v5, 0.0  ;;  %v7770_v53 = vld [vmem:[%s8660_s9 + $0x688] ss:$16 sps:$4 sm:$0xff]   ;;  %v7775_v54 = vld [vmem:[%s8660_s9 + $0x6a4] ss:$16 sps:$4 sm:$0xff]  }
 0x1ba   : > { %v1460_v58 = vmul.f32 %v1439_v36, %v1431_v52  ;;  %8429 = vrsqrt.f32 %v1418_v34  ;;  %v8426_v62 = vpop.eup %8425  ;;  %v7757_v36 = vld [vmem:[%s8660_s9 + $0x644] ss:$16 sps:$4 sm:$0xff]   ;;  %v7767_v52 = vld [vmem:[%s8660_s9 + $0x680] ss:$16 sps:$4 sm:$0xff]   ;;  %v7778_v56 = vld [vmem:[%s8660_s9 + $0x6ac] ss:$16 sps:$4 sm:$0xff]  }
 0x1bb   : > { %v1462_v47 = vmul.f32 %v8934_v31, %v1433_v22  ;;  %v8428_v27 = vpop.eup %8427  ;;  %v1432_v1 = vmul.f32 %v8426_v62, %v1408_v61  ;;  %v7781_v22 = vld [vmem:[%s8660_s9 + $0x6c4] ss:$16 sps:$4 sm:$0xff]   ;;  %v7784_v34 = vld [vmem:[%s8660_s9 + $0x6cc] ss:$16 sps:$4 sm:$0xff]   ;;  %v7779_v59 = vld [vmem:[%s8660_s9 + $0x6c0] ss:$16 sps:$4 sm:$0xff]  }
 0x1bc   : > { %v1489_v26 = vadd.f32 %v1468_v45, %v1460_v58  ;;  %v1430_v15 = vmul.f32 %v8428_v27, %v1406_v4  ;;  %v7763_v45 = vld [vmem:[%s8660_s9 + $0x664] ss:$16 sps:$4 sm:$0xff]   ;;  %v7776_v58 = vld [vmem:[%s8660_s9 + $0x6a8] ss:$16 sps:$4 sm:$0xff]   ;;  %v7785_v61 = vld [vmem:[%s8660_s9 + $0x6e0] ss:$16 sps:$4 sm:$0xff]  }
 0x1bd   : > { %v1491_v50 = vadd.f32 %v8940_v37, %v1462_v47  ;;  %v1461_v6 = vmul.f32 %v1443_v51, %v1432_v1  ;;  %v1451_v37 = vrot.slane %v8923_v16, %v8991_v0  ;;  %v7751_v16 = vld [vmem:[%s8660_s9 + $0x624] ss:$16 sps:$4 sm:$0xff]   ;;  %v7772_v51 = vld [vmem:[%s8660_s9 + $0x68c] ss:$16 sps:$4 sm:$0xff]   ;;  %v7788_v62 = vld [vmem:[%s8660_s9 + $0x6e8] ss:$16 sps:$4 sm:$0xff]  }
 0x1be   : > { %v1497_v3 = vmax.f32 %v1489_v26, 0.0  ;;  %v7787_v26 = vld [vmem:[%s8660_s9 + $0x6e4] ss:$16 sps:$4 sm:$0xff]   ;;  %v7790_v47 = vld [vmem:[%s8660_s9 + $0x6ec] ss:$16 sps:$4 sm:$0xff]  }
 0x1bf   : > { %v1499_v55 = vmax.f32 %v1491_v50, 0.0  ;;  %v1490_v7 = vadd.f32 %v1472_v60, %v1461_v6  ;;  %v1459_v23 = vmul.f32 %v1451_v37, %v1430_v15  ;;  %v7782_v60 = vld [vmem:[%s8660_s9 + $0x6c8] ss:$16 sps:$4 sm:$0xff]   ;;  %v7793_v27 = vld [vmem:[%s8660_s9 + $0x704] ss:$16 sps:$4 sm:$0xff]  }
 0x1c0   : > { %v1501_v31 = vpack.c.bf16 %v1497_v3, %v1493_v2  ;;  %v7796_v50 = vld [vmem:[%s8660_s9 + $0x70c] ss:$16 sps:$4 sm:$0xff]   ;;  %v7791_v1 = vld [vmem:[%s8660_s9 + $0x700] ss:$16 sps:$4 sm:$0xff]   ;;  %v7794_v2 = vld [vmem:[%s8660_s9 + $0x708] ss:$16 sps:$4 sm:$0xff]  }
 0x1c1   : > { %v8999_v19 = vpack.c.bf16 %v1499_v55, %v1495_v32  ;;  %v1498_v11 = vmax.f32 %v1490_v7, 0.0  ;;  %v1488_v33 = vadd.f32 %v1480_v12, %v1459_v23  ;;  %v7799_v3 = vld [vmem:[%s8660_s9 + $0x724] ss:$16 sps:$4 sm:$0xff]   ;;  %v7802_v4 = vld [vmem:[%s8660_s9 + $0x72c] ss:$16 sps:$4 sm:$0xff]  }
 0x1c2   : > { %v7797_v5 = vld [vmem:[%s8660_s9 + $0x720] ss:$16 sps:$4 sm:$0xff]   ;;  %v7800_v6 = vld [vmem:[%s8660_s9 + $0x728] ss:$16 sps:$4 sm:$0xff]   ;;  %v7808_v32 = vld [vmem:[%s8660_s9 + $0x74c] ss:$16 sps:$4 sm:$0xff]  }
 0x1c3   : > { %v1502_v13 = vpack.c.bf16 %v1498_v11, %v1494_v8  ;;  %v1496_v42 = vmax.f32 %v1488_v33, 0.0  ;;  %v7803_v55 = vld [vmem:[%s8660_s9 + $0x740] ss:$16 sps:$4 sm:$0xff]   ;;  %v7806_v15 = vld [vmem:[%s8660_s9 + $0x748] ss:$16 sps:$4 sm:$0xff]  }
 0x1c4   : > { %v8430_v63 = vpop.eup %8429  ;;  %v7814_v7 = vld [vmem:[%s8660_s9 + $0x76c] ss:$16 sps:$4 sm:$0xff]   ;;  %v7809_v8 = vld [vmem:[%s8660_s9 + $0x760] ss:$16 sps:$4 sm:$0xff]   ;;  %v7812_v11 = vld [vmem:[%s8660_s9 + $0x768] ss:$16 sps:$4 sm:$0xff]  }
 0x1c5   : > { %v1434_v25 = vmul.f32 %v8430_v63, %v1410_v38  ;;  %2306 = vmatprep.mubr.bf16.mxu0 %v1502_v13  ;;  %2392 = vmatprep.mubr.bf16.mxu1 %v1502_v13  ;;  %v7817_v23 = vld [vmem:[%s8660_s9 + $0x784] ss:$16 sps:$4 sm:$0xff]   ;;  %v7820_v38 = vld [vmem:[%s8660_s9 + $0x78c] ss:$16 sps:$4 sm:$0xff]   ;;  %v7818_v63 = vld [vmem:[%s8660_s9 + $0x788] ss:$16 sps:$4 sm:$0xff]  }
 0x1c6   : > { %2307 = vmatmul.mubr.bf16.vlgmr.msra.gmra.mrb[4].mxu0 %v1501_v31  ;;  %2393 = vmatmul.mubr.bf16.vlgmr.msra.gmra.mrb[4].mxu1 %v1501_v31  ;;  %v7805_v31 = vld [vmem:[%s8660_s9 + $0x744] ss:$16 sps:$4 sm:$0xff]   ;;  %v7830_v33 = vld [vmem:[%s8660_s9 + $0x7c8] ss:$16 sps:$4 sm:$0xff]  }
 0x1c7   : > { %v1463_v20 = vmul.f32 %v1451_v37, %v1434_v25  ;;  %2318 = vmatpush1.bf16.msra.mxu0 %v7743_v14  ;;  %2404 = vmatpush1.bf16.msra.mxu1 %v7746_v24  ;;  %v7811_v37 = vld [vmem:[%s8660_s9 + $0x764] ss:$16 sps:$4 sm:$0xff]   ;;  %v7826_v14 = vld [vmem:[%s8660_s9 + $0x7ac] ss:$16 sps:$4 sm:$0xff]   ;;  %v7821_v24 = vld [vmem:[%s8660_s9 + $0x7a0] ss:$16 sps:$4 sm:$0xff]  }
 0x1c8   : > { %2319 = vmatprep.subr.bf16.mxu0 %v7751_v16  ;;  %2405 = vmatprep.subr.bf16.mxu1 %v7754_v28  ;;  %v7823_v13 = vld [vmem:[%s8660_s9 + $0x7a4] ss:$16 sps:$4 sm:$0xff]   ;;  %v7824_v25 = vld [vmem:[%s8660_s9 + $0x7a8] ss:$16 sps:$4 sm:$0xff]   ;;  %v7832_v28 = vld [vmem:[%s8660_s9 + $0x7cc] ss:$16 sps:$4 sm:$0xff]  }
 0x1c9   : > { %v1492_v35 = vadd.f32 %v1480_v12, %v1463_v20  ;;  %v7815_v12 = vld [vmem:[%s8660_s9 + $0x780] ss:$16 sps:$4 sm:$0xff]   ;;  %v7829_v16 = vld [vmem:[%s8660_s9 + $0x7c4] ss:$16 sps:$4 sm:$0xff]  }
 0x1ca   : > { %v7827_v20 = vld [vmem:[%s8660_s9 + $0x7c0] ss:$16 sps:$4 sm:$0xff]  }
 0x1cb   : > { %v1500_v43 = vmax.f32 %v1492_v35, 0.0  ;;  %2320 = vmatpush1.bf16.msra.mxu0 %v7749_v21  ;;  %2406 = vmatpush1.bf16.msra.mxu1 %v7752_v30  ;;  %v7835_v21 = vld [vmem:[%s8660_s9 + $0x7e4] ss:$16 sps:$4 sm:$0xff]   ;;  %v7838_v30 = vld [vmem:[%s8660_s9 + $0x7ec] ss:$16 sps:$4 sm:$0xff]  }
 0x1cc   : > { %2321 = vmatprep.subr.bf16.mxu0 %v7757_v36  ;;  %2407 = vmatprep.subr.bf16.mxu1 %v7760_v39  ;;  %v7833_v35 = vld [vmem:[%s8660_s9 + $0x7e0] ss:$16 sps:$4 sm:$0xff]   ;;  %v7836_v36 = vld [vmem:[%s8660_s9 + $0x7e8] ss:$16 sps:$4 sm:$0xff]   ;;  %v7841_v39 = vld [vmem:[%s8660_s9 + $0x804] ss:$16 sps:$4 sm:$0xff]  }
 0x1cd   : > { %v1504_v29 = vpack.c.bf16 %v1500_v43, %v1496_v42  ;;  %v7844_v42 = vld [vmem:[%s8660_s9 + $0x80c] ss:$16 sps:$4 sm:$0xff]   ;;  %v7839_v43 = vld [vmem:[%s8660_s9 + $0x800] ss:$16 sps:$4 sm:$0xff]  }
 0x1cf   : > { %2349 = vmatprep.mubr.bf16.mxu0 %v1504_v29  ;;  %2435 = vmatprep.mubr.bf16.mxu1 %v1504_v29  ;;  %v7850_v29 = vld [vmem:[%s8660_s9 + $0x82c] ss:$16 sps:$4 sm:$0xff]  }
 0x1d0   : > { %2322 = vmatpush1.bf16.msra.mxu0 %v7755_v44  ;;  %2408 = vmatpush1.bf16.msra.mxu1 %v7758_v18  ;;  %v7842_v44 = vld [vmem:[%s8660_s9 + $0x808] ss:$16 sps:$4 sm:$0xff]   ;;  %v7847_v18 = vld [vmem:[%s8660_s9 + $0x824] ss:$16 sps:$4 sm:$0xff]  }
 0x1d1   : > { %2323 = vmatprep.subr.bf16.mxu0 %v7763_v45  ;;  %2409 = vmatprep.subr.bf16.mxu1 %v7766_v46  ;;  %v7845_v45 = vld [vmem:[%s8660_s9 + $0x820] ss:$16 sps:$4 sm:$0xff]   ;;  %v7848_v46 = vld [vmem:[%s8660_s9 + $0x828] ss:$16 sps:$4 sm:$0xff]  }
 0x1d4   : > { %2324 = vmatpush1.bf16.msra.mxu0 %v7761_v48  ;;  %2410 = vmatpush1.bf16.msra.mxu1 %v7764_v49  ;;  %v7853_v48 = vld [vmem:[%s8660_s9 + $0x844] ss:$16 sps:$4 sm:$0xff]   ;;  %v7856_v49 = vld [vmem:[%s8660_s9 + $0x84c] ss:$16 sps:$4 sm:$0xff]  }
 0x1d5   : > { %2325 = vmatprep.subr.bf16.mxu0 %v7769_v41  ;;  %2411 = vmatprep.subr.bf16.mxu1 %v7772_v51  ;;  %v7851_v41 = vld [vmem:[%s8660_s9 + $0x840] ss:$16 sps:$4 sm:$0xff]   ;;  %v7854_v51 = vld [vmem:[%s8660_s9 + $0x848] ss:$16 sps:$4 sm:$0xff]  }
 0x1d8   : > { %2326 = vmatpush1.bf16.msra.mxu0 %v7767_v52  ;;  %2412 = vmatpush1.bf16.msra.mxu1 %v7770_v53  ;;  %v7862_v52 = vld [vmem:[%s8660_s9 + $0x86c] ss:$16 sps:$4 sm:$0xff]   ;;  %v7857_v53 = vld [vmem:[%s8660_s9 + $0x860] ss:$16 sps:$4 sm:$0xff]  }
 0x1d9   : > { %2327 = vmatprep.subr.bf16.mxu0 %v7775_v54  ;;  %2413 = vmatprep.subr.bf16.mxu1 %v7778_v56  ;;  %v7860_v54 = vld [vmem:[%s8660_s9 + $0x868] ss:$16 sps:$4 sm:$0xff]   ;;  %v7865_v56 = vld [vmem:[%s8660_s9 + $0x884] ss:$16 sps:$4 sm:$0xff]  }
 0x1dc   : > { %2328 = vmatpush1.bf16.msra.mxu0 %v7773_v57  ;;  %2414 = vmatpush1.bf16.msra.mxu1 %v7776_v58  ;;  %v7868_v57 = vld [vmem:[%s8660_s9 + $0x88c] ss:$16 sps:$4 sm:$0xff]   ;;  %v7863_v58 = vld [vmem:[%s8660_s9 + $0x880] ss:$16 sps:$4 sm:$0xff]  }
 0x1dd   : > { %2329 = vmatprep.subr.bf16.mxu0 %v7781_v22  ;;  %2415 = vmatprep.subr.bf16.mxu1 %v7784_v34  ;;  %v7866_v22 = vld [vmem:[%s8660_s9 + $0x888] ss:$16 sps:$4 sm:$0xff]   ;;  %v7871_v34 = vld [vmem:[%s8660_s9 + $0x8a4] ss:$16 sps:$4 sm:$0xff]  }
 0x1e0   : > { %2330 = vmatpush1.bf16.msra.mxu0 %v7779_v59  ;;  %2416 = vmatpush1.bf16.msra.mxu1 %v7782_v60  ;;  %v7874_v59 = vld [vmem:[%s8660_s9 + $0x8ac] ss:$16 sps:$4 sm:$0xff]   ;;  %v7869_v60 = vld [vmem:[%s8660_s9 + $0x8a0] ss:$16 sps:$4 sm:$0xff]  }
 0x1e1   : > { %2331 = vmatprep.subr.bf16.mxu0 %v7787_v26  ;;  %2417 = vmatprep.subr.bf16.mxu1 %v7790_v47  ;;  %v7872_v26 = vld [vmem:[%s8660_s9 + $0x8a8] ss:$16 sps:$4 sm:$0xff]   ;;  %v7877_v47 = vld [vmem:[%s8660_s9 + $0x8c4] ss:$16 sps:$4 sm:$0xff]  }
 0x1e4   : > { %2332 = vmatpush1.bf16.msra.mxu0 %v7785_v61  ;;  %2418 = vmatpush1.bf16.msra.mxu1 %v7788_v62  ;;  %v7880_v61 = vld [vmem:[%s8660_s9 + $0x8cc] ss:$16 sps:$4 sm:$0xff]   ;;  %v7875_v62 = vld [vmem:[%s8660_s9 + $0x8c0] ss:$16 sps:$4 sm:$0xff]  }
 0x1e5   : > { %2333 = vmatprep.subr.bf16.mxu0 %v7793_v27  ;;  %2419 = vmatprep.subr.bf16.mxu1 %v7796_v50  ;;  %v7878_v27 = vld [vmem:[%s8660_s9 + $0x8c8] ss:$16 sps:$4 sm:$0xff]   ;;  %v7883_v50 = vld [vmem:[%s8660_s9 + $0x8e4] ss:$16 sps:$4 sm:$0xff]  }
 0x1e8   : > { %2334 = vmatpush1.bf16.msra.mxu0 %v7791_v1  ;;  %2420 = vmatpush1.bf16.msra.mxu1 %v7794_v2  ;;  %v7886_v1 = vld [vmem:[%s8660_s9 + $0x8ec] ss:$16 sps:$4 sm:$0xff]   ;;  %v7881_v2 = vld [vmem:[%s8660_s9 + $0x8e0] ss:$16 sps:$4 sm:$0xff]  }
 0x1e9   : > { %2335 = vmatprep.subr.bf16.mxu0 %v7799_v3  ;;  %2421 = vmatprep.subr.bf16.mxu1 %v7802_v4  ;;  %v7884_v3 = vld [vmem:[%s8660_s9 + $0x8e8] ss:$16 sps:$4 sm:$0xff]   ;;  %v7889_v4 = vld [vmem:[%s8660_s9 + $0x904] ss:$16 sps:$4 sm:$0xff]  }
 0x1ec   : > { %2336 = vmatpush1.bf16.msra.mxu0 %v7797_v5  ;;  %2422 = vmatpush1.bf16.msra.mxu1 %v7800_v6  ;;  %v7892_v5 = vld [vmem:[%s8660_s9 + $0x90c] ss:$16 sps:$4 sm:$0xff]   ;;  %v7887_v6 = vld [vmem:[%s8660_s9 + $0x900] ss:$16 sps:$4 sm:$0xff]  }
 0x1ed   : > { %2337 = vmatprep.subr.bf16.mxu0 %v7805_v31  ;;  %2423 = vmatprep.subr.bf16.mxu1 %v7808_v32  ;;  %v7890_v31 = vld [vmem:[%s8660_s9 + $0x908] ss:$16 sps:$4 sm:$0xff]   ;;  %v7895_v32 = vld [vmem:[%s8660_s9 + $0x924] ss:$16 sps:$4 sm:$0xff]  }
 0x1f0   : > { %2338 = vmatpush1.bf16.msra.mxu0 %v7803_v55  ;;  %2424 = vmatpush1.bf16.msra.mxu1 %v7806_v15  ;;  %v7898_v55 = vld [vmem:[%s8660_s9 + $0x92c] ss:$16 sps:$4 sm:$0xff]   ;;  %v7893_v15 = vld [vmem:[%s8660_s9 + $0x920] ss:$16 sps:$4 sm:$0xff]  }
 0x1f1   : > { %2339 = vmatprep.subr.bf16.mxu0 %v7811_v37  ;;  %2425 = vmatprep.subr.bf16.mxu1 %v7814_v7  ;;  %v7896_v37 = vld [vmem:[%s8660_s9 + $0x928] ss:$16 sps:$4 sm:$0xff]   ;;  %v7901_v7 = vld [vmem:[%s8660_s9 + $0x944] ss:$16 sps:$4 sm:$0xff]  }
 0x1f4   : > { %2340 = vmatpush1.bf16.msra.mxu0 %v7809_v8  ;;  %2426 = vmatpush1.bf16.msra.mxu1 %v7812_v11  ;;  %v7904_v8 = vld [vmem:[%s8660_s9 + $0x94c] ss:$16 sps:$4 sm:$0xff]   ;;  %v7899_v11 = vld [vmem:[%s8660_s9 + $0x940] ss:$16 sps:$4 sm:$0xff]  }
 0x1f5   : > { %2341 = vmatprep.subr.bf16.mxu0 %v7817_v23  ;;  %2427 = vmatprep.subr.bf16.mxu1 %v7820_v38  ;;  %v7902_v23 = vld [vmem:[%s8660_s9 + $0x948] ss:$16 sps:$4 sm:$0xff]   ;;  %v7907_v38 = vld [vmem:[%s8660_s9 + $0x964] ss:$16 sps:$4 sm:$0xff]  }
 0x1f8   : > { %2342 = vmatpush1.bf16.msra.mxu0 %v7815_v12  ;;  %2428 = vmatpush1.bf16.msra.mxu1 %v7818_v63  ;;  %v7910_v12 = vld [vmem:[%s8660_s9 + $0x96c] ss:$16 sps:$4 sm:$0xff]   ;;  %v7905_v63 = vld [vmem:[%s8660_s9 + $0x960] ss:$16 sps:$4 sm:$0xff]  }
 0x1f9   : > { %2343 = vmatprep.subr.bf16.mxu0 %v7823_v13  ;;  %2429 = vmatprep.subr.bf16.mxu1 %v7826_v14  ;;  %v7908_v13 = vld [vmem:[%s8660_s9 + $0x968] ss:$16 sps:$4 sm:$0xff]   ;;  %v7913_v14 = vld [vmem:[%s8660_s9 + $0x984] ss:$16 sps:$4 sm:$0xff]  }
 0x1fc   : > { %2344 = vmatpush1.bf16.msra.mxu0 %v7821_v24  ;;  %2430 = vmatpush1.bf16.msra.mxu1 %v7824_v25  ;;  %v7916_v24 = vld [vmem:[%s8660_s9 + $0x98c] ss:$16 sps:$4 sm:$0xff]   ;;  %v7911_v25 = vld [vmem:[%s8660_s9 + $0x980] ss:$16 sps:$4 sm:$0xff]  }
 0x1fd   : > { %2345 = vmatprep.subr.bf16.mxu0 %v7829_v16  ;;  %2431 = vmatprep.subr.bf16.mxu1 %v7832_v28  ;;  %v7914_v16 = vld [vmem:[%s8660_s9 + $0x988] ss:$16 sps:$4 sm:$0xff]   ;;  %v7919_v28 = vld [vmem:[%s8660_s9 + $0x9a4] ss:$16 sps:$4 sm:$0xff]  }
 0x200   : > { %2346 = vmatpush1.bf16.msra.mxu0 %v7827_v20  ;;  %2432 = vmatpush1.bf16.msra.mxu1 %v7830_v33  ;;  %v7922_v20 = vld [vmem:[%s8660_s9 + $0x9ac] ss:$16 sps:$4 sm:$0xff]   ;;  %v7917_v33 = vld [vmem:[%s8660_s9 + $0x9a0] ss:$16 sps:$4 sm:$0xff]  }
 0x201   : > { %2347 = vmatprep.subr.bf16.mxu0 %v7835_v21  ;;  %2433 = vmatprep.subr.bf16.mxu1 %v7838_v30  ;;  %v7920_v21 = vld [vmem:[%s8660_s9 + $0x9a8] ss:$16 sps:$4 sm:$0xff]   ;;  %v7925_v30 = vld [vmem:[%s8660_s9 + $0x9c4] ss:$16 sps:$4 sm:$0xff]  }
 0x204   : > { %2348 = vmatpush1.bf16.msra.mxu0 %v7833_v35  ;;  %2434 = vmatpush1.bf16.msra.mxu1 %v7836_v36  ;;  %v7928_v35 = vld [vmem:[%s8660_s9 + $0x9cc] ss:$16 sps:$4 sm:$0xff]   ;;  %v7923_v36 = vld [vmem:[%s8660_s9 + $0x9c0] ss:$16 sps:$4 sm:$0xff]  }
 0x205   : > { %3465 = vmatprep.subr.bf16.mxu0 %v7841_v39  ;;  %3551 = vmatprep.subr.bf16.mxu1 %v7844_v42  ;;  %v7926_v39 = vld [vmem:[%s8660_s9 + $0x9c8] ss:$16 sps:$4 sm:$0xff]   ;;  %v7931_v42 = vld [vmem:[%s8660_s9 + $0x9e4] ss:$16 sps:$4 sm:$0xff]  }
 0x207   : > { %2350 = vmatmul.mubr.bf16.vlgmr.msra.gmra.mrb[4].mxu0 %v8999_v19  ;;  %2436 = vmatmul.mubr.bf16.vlgmr.msra.gmra.mrb[4].mxu1 %v8999_v19  ;;  %v7859_v19 = vld [vmem:[%s8660_s9 + $0x864] ss:$16 sps:$4 sm:$0xff]  }
 0x208   : > { %3466 = vmatpush1.bf16.msra.mxu0 %v7839_v43  ;;  %3552 = vmatpush1.bf16.msra.mxu1 %v7842_v44  ;;  %v7929_v43 = vld [vmem:[%s8660_s9 + $0x9e0] ss:$16 sps:$4 sm:$0xff]   ;;  %v7932_v44 = vld [vmem:[%s8660_s9 + $0x9e8] ss:$16 sps:$4 sm:$0xff]  }
 0x209   : > { %3467 = vmatprep.subr.bf16.mxu0 %v7847_v18  ;;  %3553 = vmatprep.subr.bf16.mxu1 %v7850_v29  ;;  %v7934_v18 = vld [vmem:[%s8660_s9 + $0x9ec] ss:$16 sps:$4 sm:$0xff]   ;;  %v7937_v29 = vld [vmem:[%s8660_s9 + $0xa04] ss:$16 sps:$4 sm:$0xff]  }
 0x20c   : > { %3468 = vmatpush1.bf16.msra.mxu0 %v7845_v45  ;;  %3554 = vmatpush1.bf16.msra.mxu1 %v7848_v46  ;;  %v7940_v45 = vld [vmem:[%s8660_s9 + $0xa0c] ss:$16 sps:$4 sm:$0xff]  }
 0x20d   : > { %3469 = vmatprep.subr.bf16.mxu0 %v7853_v48  ;;  %3555 = vmatprep.subr.bf16.mxu1 %v7856_v49 }
 0x210   : > { %3470 = vmatpush1.bf16.msra.mxu0 %v7851_v41  ;;  %3556 = vmatpush1.bf16.msra.mxu1 %v7854_v51 }
 0x211   : > { %3471 = vmatprep.subr.bf16.mxu0 %v7859_v19  ;;  %3557 = vmatprep.subr.bf16.mxu1 %v7862_v52 }
 0x214   : > { %3472 = vmatpush1.bf16.msra.mxu0 %v7857_v53  ;;  %3558 = vmatpush1.bf16.msra.mxu1 %v7860_v54 }
 0x215   : > { %3473 = vmatprep.subr.bf16.mxu0 %v7865_v56  ;;  %3559 = vmatprep.subr.bf16.mxu1 %v7868_v57 }
 0x218   : > { %3474 = vmatpush1.bf16.msra.mxu0 %v7863_v58  ;;  %3560 = vmatpush1.bf16.msra.mxu1 %v7866_v22 }
 0x219   : > { %3475 = vmatprep.subr.bf16.mxu0 %v7871_v34  ;;  %3561 = vmatprep.subr.bf16.mxu1 %v7874_v59 }
 0x21c   : > { %3476 = vmatpush1.bf16.msra.mxu0 %v7869_v60  ;;  %3562 = vmatpush1.bf16.msra.mxu1 %v7872_v26 }
 0x21d   : > { %3477 = vmatprep.subr.bf16.mxu0 %v7877_v47  ;;  %3563 = vmatprep.subr.bf16.mxu1 %v7880_v61 }
 0x220   : > { %3478 = vmatpush1.bf16.msra.mxu0 %v7875_v62  ;;  %3564 = vmatpush1.bf16.msra.mxu1 %v7878_v27 }
 0x221   : > { %3479 = vmatprep.subr.bf16.mxu0 %v7883_v50  ;;  %3565 = vmatprep.subr.bf16.mxu1 %v7886_v1 }
 0x224   : > { %3480 = vmatpush1.bf16.msra.mxu0 %v7881_v2  ;;  %3566 = vmatpush1.bf16.msra.mxu1 %v7884_v3 }
 0x225   : > { %3481 = vmatprep.subr.bf16.mxu0 %v7889_v4  ;;  %3567 = vmatprep.subr.bf16.mxu1 %v7892_v5 }
 0x228   : > { %3482 = vmatpush1.bf16.msra.mxu0 %v7887_v6  ;;  %3568 = vmatpush1.bf16.msra.mxu1 %v7890_v31 }
 0x229   : > { %3483 = vmatprep.subr.bf16.mxu0 %v7895_v32  ;;  %3569 = vmatprep.subr.bf16.mxu1 %v7898_v55 }
 0x22c   : > { %3484 = vmatpush1.bf16.msra.mxu0 %v7893_v15  ;;  %3570 = vmatpush1.bf16.msra.mxu1 %v7896_v37 }
 0x22d   : > { %3485 = vmatprep.subr.bf16.mxu0 %v7901_v7  ;;  %3571 = vmatprep.subr.bf16.mxu1 %v7904_v8 }
 0x230   : > { %3486 = vmatpush1.bf16.msra.mxu0 %v7899_v11  ;;  %3572 = vmatpush1.bf16.msra.mxu1 %v7902_v23 }
 0x231   : > { %3487 = vmatprep.subr.bf16.mxu0 %v7907_v38  ;;  %3573 = vmatprep.subr.bf16.mxu1 %v7910_v12 }
 0x234   : > { %3488 = vmatpush1.bf16.msra.mxu0 %v7905_v63  ;;  %3574 = vmatpush1.bf16.msra.mxu1 %v7908_v13 }
 0x235   : > { %3489 = vmatprep.subr.bf16.mxu0 %v7913_v14  ;;  %3575 = vmatprep.subr.bf16.mxu1 %v7916_v24 }
 0x238   : > { %3490 = vmatpush1.bf16.msra.mxu0 %v7911_v25  ;;  %3576 = vmatpush1.bf16.msra.mxu1 %v7914_v16 }
 0x239   : > { %3491 = vmatprep.subr.bf16.mxu0 %v7919_v28  ;;  %3577 = vmatprep.subr.bf16.mxu1 %v7922_v20 }
 0x23c   : > { %3492 = vmatpush1.bf16.msra.mxu0 %v7917_v33  ;;  %3578 = vmatpush1.bf16.msra.mxu1 %v7920_v21 }
 0x23d   : > { %3493 = vmatprep.subr.bf16.mxu0 %v7925_v30  ;;  %3579 = vmatprep.subr.bf16.mxu1 %v7928_v35 }
 0x240   : > { %3494 = vmatpush1.bf16.msra.mxu0 %v7923_v36  ;;  %3580 = vmatpush1.bf16.msra.mxu1 %v7926_v39 }
 0x241   : > { %3495 = vmatprep.subr.bf16.mxu0 %v7931_v42  ;;  %3581 = vmatprep.subr.bf16.mxu1 %v7934_v18 }
 0x244   : > { %3496 = vmatpush1.bf16.msra.mxu0 %v7929_v43  ;;  %3582 = vmatpush1.bf16.msra.mxu1 %v7932_v44 }
 0x245   : > { %3508 = vmatprep.subr.bf16.mxu0 %v7937_v29  ;;  %3594 = vmatprep.subr.bf16.mxu1 %v7940_v45 }
 0x2da   : > { %v9134_v46 = vpop.f32.mrb[4].mxu0  ;;  %v9136_v48 = vpop.f32.mrb[4].mxu1 }
 0x2db   : > { %v2450_v49 = vmul.f32 %v8881_v17, %v9134_v46  ;;  %v2452_v41 = vmul.f32 %v8881_v17, %v9136_v48  ;;  %v9142_v51 = vpop.f32.mrb[5].mxu0  ;;  %v9144_v19 = vpop.f32.mrb[5].mxu1 }
 0x2dc   : > { %v2451_v52 = vmul.f32 %v8881_v17, %v9142_v51  ;;  %v2453_v53 = vmul.f32 %v8881_v17, %v9144_v19  ;;  %v9150_v54 = vpop.f32.mrb[6].mxu0  ;;  %v9152_v56 = vpop.f32.mrb[6].mxu1 }
 0x2dd   : > { %v2458_v57 = vrot.slane %v2450_v49, 4  ;;  %v2514_v58 = vmul.f32 %v2450_v49, %v9134_v46  ;;  %v2470_v22 = vrot.slane %v2452_v41, 4  ;;  %v2516_v34 = vmul.f32 %v2452_v41, %v9136_v48  ;;  %v9156_v59 = vpop.f32.mrb[7].mxu0  ;;  %v9158_v60 = vpop.f32.mrb[7].mxu1 }
 0x2de   : > { %v2464_v26 = vrot.slane %v2451_v52, 4  ;;  %v2515_v47 = vmul.f32 %v2451_v52, %v9142_v51  ;;  %v2476_v61 = vrot.slane %v2453_v53, 4  ;;  %v2517_v62 = vmul.f32 %v2453_v53, %v9144_v19 }
 0x2df   : > { %v2459_v27 = vadd.f32 %v2458_v57, %v2450_v49  ;;  %v2522_v50 = vrot.slane %v2514_v58, 4  ;;  %v2471_v1 = vadd.f32 %v2470_v22, %v2452_v41  ;;  %v2534_v2 = vrot.slane %v2516_v34, 4  ;;  %v9165_v41 = vld [vmem:[%s8915_s8 + $0x2] ss:$8 sm:$0xf] }
 0x2e0   : > { %v2465_v3 = vadd.f32 %v2464_v26, %v2451_v52  ;;  %v2528_v4 = vrot.slane %v2515_v47, 4  ;;  %v2477_v5 = vadd.f32 %v2476_v61, %v2453_v53  ;;  %v2540_v6 = vrot.slane %v2517_v62, 4  ;;  %v9168_v53 = vld [vmem:[%s8915_s8 + $0x3] ss:$8 sm:$0xf] }
 0x2e1   : > { %v2460_v31 = vrot.slane %v2459_v27, 2  ;;  %v2523_v32 = vadd.f32 %v2522_v50, %v2514_v58  ;;  %v2472_v55 = vrot.slane %v2471_v1, 2  ;;  %v2535_v15 = vadd.f32 %v2534_v2, %v2516_v34 }
 0x2e2   : > { %v2466_v37 = vrot.slane %v2465_v3, 2  ;;  %v2529_v7 = vadd.f32 %v2528_v4, %v2515_v47  ;;  %v2478_v8 = vrot.slane %v2477_v5, 2  ;;  %v2541_v11 = vadd.f32 %v2540_v6, %v2517_v62 }
 0x2e3   : > { %v2461_v23 = vadd.f32 %v2460_v31, %v2459_v27  ;;  %v2524_v38 = vrot.slane %v2523_v32, 2  ;;  %v2473_v12 = vadd.f32 %v2472_v55, %v2471_v1  ;;  %v2536_v63 = vrot.slane %v2535_v15, 2 }
 0x2e4   : > { %v2467_v13 = vadd.f32 %v2466_v37, %v2465_v3  ;;  %v2530_v14 = vrot.slane %v2529_v7, 2  ;;  %v2479_v24 = vadd.f32 %v2478_v8, %v2477_v5  ;;  %v2542_v25 = vrot.slane %v2541_v11, 2 }
 0x2e5   : > { %v2462_v16 = vrot.slane %v2461_v23, 1  ;;  %v2525_v28 = vadd.f32 %v2524_v38, %v2523_v32  ;;  %v2474_v20 = vrot.slane %v2473_v12, 1  ;;  %v2537_v33 = vadd.f32 %v2536_v63, %v2535_v15 }
 0x2e6   : > { %v2468_v21 = vrot.slane %v2467_v13, 1  ;;  %v2531_v30 = vadd.f32 %v2530_v14, %v2529_v7  ;;  %v2480_v35 = vrot.slane %v2479_v24, 1  ;;  %v2543_v43 = vadd.f32 %v2542_v25, %v2541_v11 }
 0x2e7   : > { %v2526_v36 = vrot.slane %v2525_v28, 1  ;;  %v2475_v39 = vadd.f32 %v2474_v20, %v2473_v12  ;;  %v2538_v42 = vrot.slane %v2537_v33, 1  ;;  %v2463_v44 = vadd.f32 %v2462_v16, %v2461_v23 }
 0x2e8   : > { %v2469_v45 = vadd.f32 %v2468_v21, %v2467_v13  ;;  %v2532_v49 = vrot.slane %v2531_v30, 1  ;;  %v2481_v52 = vadd.f32 %v2480_v35, %v2479_v24  ;;  %v2544_v22 = vrot.slane %v2543_v43, 1 }
 0x2e9   : > { %v9162_v18 = vmul.f32 0.5, %v2475_v39  ;;  %v2539_v29 = vadd.f32 %v2538_v42, %v2537_v33  ;;  %v2527_v57 = vadd.f32 %v2526_v36, %v2525_v28  ;;  %v9170_v34 = vmul.f32 0.5, %v2463_v44 }
 0x2ea   : > { %v9176_v47 = vrot.slane %v9165_v41, %v8918_v10  ;;  %v9178_v61 = vmul.f32 0.5, %v2469_v45  ;;  %v2533_v62 = vadd.f32 %v2532_v49, %v2531_v30  ;;  %v9182_v50 = vrot.slane %v9168_v53, %v8918_v10 }
 0x2eb   : > { %v2572_v58 = vmul.f32 0.5, %v2539_v29  ;;  %v2580_v26 = vmul.f32 %v9162_v18, %v9162_v18  ;;  %v9184_v1 = vmul.f32 0.5, %v2481_v52  ;;  %v2454_v2 = vmul.f32 %v8881_v17, %v9150_v54 }
 0x2ec   : > { %v2570_v3 = vmul.f32 0.5, %v2527_v57  ;;  %v2545_v4 = vadd.f32 %v2544_v22, %v2543_v43  ;;  %v2456_v5 = vmul.f32 %v8881_v17, %v9152_v56  ;;  %v2455_v6 = vmul.f32 %v8881_v17, %v9156_v59 }
 0x2ed   : > { %v2588_v27 = vsub.f32 %v2572_v58, %v2580_v26  ;;  %v2578_v31 = vmul.f32 %v9170_v34, %v9170_v34  ;;  %v2482_v55 = vrot.slane %v2454_v2, 4  ;;  %v2518_v15 = vmul.f32 %v2454_v2, %v9150_v54 }
 0x2ee   : > { %v2571_v37 = vmul.f32 0.5, %v2533_v62  ;;  %v2579_v7 = vmul.f32 %v9178_v61, %v9178_v61  ;;  %v2494_v8 = vrot.slane %v2456_v5, 4  ;;  %v2520_v11 = vmul.f32 %v2456_v5, %v9152_v56 }
 0x2ef   : > { %v2604_v32 = vadd.f32 1e-05, %v2588_v27  ;;  %v2483_v23 = vadd.f32 %v2482_v55, %v2454_v2  ;;  %v2546_v38 = vrot.slane %v2518_v15, 4  ;;  %v2488_v12 = vrot.slane %v2455_v6, 4 }
 0x2f0   : > { %v2596_v63 = vsub.f32 %v9136_v48, %v9162_v18  ;;  %v2495_v13 = vadd.f32 %v2494_v8, %v2456_v5  ;;  %v2558_v14 = vrot.slane %v2520_v11, 4  ;;  %v2519_v24 = vmul.f32 %v2455_v6, %v9156_v59 }
 0x2f1   : > { %8431 = vrsqrt.f32 %v2604_v32  ;;  %v2586_v25 = vsub.f32 %v2570_v3, %v2578_v31  ;;  %v2484_v16 = vrot.slane %v2483_v23, 2  ;;  %v2547_v28 = vadd.f32 %v2546_v38, %v2518_v15 }
 0x2f2   : > { %v2489_v20 = vadd.f32 %v2488_v12, %v2455_v6  ;;  %v2496_v33 = vrot.slane %v2495_v13, 2  ;;  %v2559_v21 = vadd.f32 %v2558_v14, %v2520_v11  ;;  %v2552_v30 = vrot.slane %v2519_v24, 4 }
 0x2f3   : > { %v2457_v35 = vmul.f32 %v8881_v17, %v9158_v60  ;;  %v2587_v36 = vsub.f32 %v2571_v37, %v2579_v7  ;;  %v2485_v39 = vadd.f32 %v2484_v16, %v2483_v23  ;;  %v2548_v42 = vrot.slane %v2547_v28, 2 }
 0x2f4   : > { %v2490_v43 = vrot.slane %v2489_v20, 2  ;;  %v2497_v44 = vadd.f32 %v2496_v33, %v2495_v13  ;;  %v2560_v48 = vrot.slane %v2559_v21, 2  ;;  %v2553_v18 = vadd.f32 %v2552_v30, %v2519_v24 }
 0x2f5   : > { %v2500_v29 = vrot.slane %v2457_v35, 4  ;;  %v2602_v45 = vadd.f32 1e-05, %v2586_v25  ;;  %v2486_v49 = vrot.slane %v2485_v39, 1  ;;  %v2549_v52 = vadd.f32 %v2548_v42, %v2547_v28 }
 0x2f6   : > { %v2491_v57 = vadd.f32 %v2490_v43, %v2489_v20  ;;  %v2573_v58 = vmul.f32 0.5, %v2545_v4  ;;  %v2498_v22 = vrot.slane %v2497_v44, 1  ;;  %v2561_v26 = vadd.f32 %v2560_v48, %v2559_v21 }
 0x2f7   : > { %v2554_v62 = vrot.slane %v2553_v18, 2  ;;  %v2487_v27 = vadd.f32 %v2486_v49, %v2485_v39  ;;  %v2550_v2 = vrot.slane %v2549_v52, 1  ;;  %v2501_v5 = vadd.f32 %v2500_v29, %v2457_v35 }
 0x2f8   : > { %v2492_v3 = vrot.slane %v2491_v57, 1  ;;  %v2499_v6 = vadd.f32 %v2498_v22, %v2497_v44  ;;  %v2562_v31 = vrot.slane %v2561_v26, 1  ;;  %v2521_v55 = vmul.f32 %v2457_v35, %v9158_v60 }
 0x2f9   : > { %v2555_v32 = vadd.f32 %v2554_v62, %v2553_v18  ;;  %8433 = vrsqrt.f32 %v2602_v45  ;;  %v2603_v37 = vadd.f32 1e-05, %v2587_v36  ;;  %v2510_v7 = vmul.f32 0.5, %v2487_v27 }
 0x2fa   : > { %v2551_v8 = vadd.f32 %v2550_v2, %v2549_v52  ;;  %v2512_v23 = vmul.f32 0.5, %v2499_v6  ;;  %v2563_v4 = vadd.f32 %v2562_v31, %v2561_v26  ;;  %v2493_v38 = vadd.f32 %v2492_v3, %v2491_v57 }
 0x2fb   : > { %v8432_v15 = vpop.eup %8431  ;;  %v2582_v13 = vmul.f32 %v2510_v7, %v2510_v7  ;;  %v2556_v14 = vrot.slane %v2555_v32, 1  ;;  %v2502_v24 = vrot.slane %v2501_v5, 2  ;;  %v2581_v16 = vmul.f32 %v9184_v1, %v9184_v1 }
 0x2fc   : > { %v2620_v11 = vmul.f32 %v8432_v15, %v2596_v63  ;;  %v2574_v12 = vmul.f32 0.5, %v2551_v8  ;;  %v2576_v28 = vmul.f32 0.5, %v2563_v4  ;;  %v2564_v20 = vrot.slane %v2521_v55, 4 }
 0x2fd   : > { %v2584_v21 = vmul.f32 %v2512_v23, %v2512_v23  ;;  %8435 = vrsqrt.f32 %v2603_v37  ;;  %v2511_v63 = vmul.f32 0.5, %v2493_v38  ;;  %v2557_v39 = vadd.f32 %v2556_v14, %v2555_v32 }
 0x2fe   : > { %v2649_v25 = vmul.f32 %v9176_v47, %v2620_v11  ;;  %v2590_v33 = vsub.f32 %v2574_v12, %v2582_v13  ;;  %v2503_v42 = vadd.f32 %v2502_v24, %v2501_v5  ;;  %v2589_v43 = vsub.f32 %v2573_v58, %v2581_v16 }
 0x2ff   : > { %v2592_v36 = vsub.f32 %v2576_v28, %v2584_v21  ;;  %v2583_v44 = vmul.f32 %v2511_v63, %v2511_v63  ;;  %v2565_v48 = vadd.f32 %v2564_v20, %v2521_v55  ;;  %v2575_v29 = vmul.f32 0.5, %v2557_v39 }
 0x300   : > { %v9208_v30 = vadd.f32 %v9182_v50, %v2649_v25  ;;  %v2606_v35 = vadd.f32 1e-05, %v2590_v33  ;;  %v2504_v45 = vrot.slane %v2503_v42, 1  ;;  %v2594_v26 = vsub.f32 %v9134_v46, %v9170_v34 }
 0x301   : > { %v2608_v18 = vadd.f32 1e-05, %v2592_v36  ;;  %v2566_v49 = vrot.slane %v2565_v48, 2  ;;  %v2591_v57 = vsub.f32 %v2575_v29, %v2583_v44  ;;  %v2605_v62 = vadd.f32 1e-05, %v2589_v43 }
 0x302   : > { %8437 = vrsqrt.f32 %v2606_v35  ;;  %v2505_v22 = vadd.f32 %v2504_v45, %v2503_v42  ;;  %v2630_v58 = vrot.slane %v9165_v41, %v8969_v9  ;;  %v2595_v15 = vsub.f32 %v9142_v51, %v9178_v61 }
 0x303   : > { %v8434_v52 = vpop.eup %8433  ;;  %8439 = vrsqrt.f32 %v2608_v18  ;;  %v2567_v27 = vadd.f32 %v2566_v49, %v2565_v48  ;;  %v2607_v2 = vadd.f32 1e-05, %v2591_v57  ;;  %v2659_v46 = vrot.slane %v9168_v53, %v8969_v9 }
 0x304   : > { %v2513_v3 = vmul.f32 0.5, %v2505_v22  ;;  %v2618_v5 = vmul.f32 %v8434_v52, %v2594_v26  ;;  %v2598_v34 = vsub.f32 %v9150_v54, %v2510_v7  ;;  %v2634_v38 = vrot.slane %v9165_v41, %v8976_v40  ;;  %v7935_v22 = vld [vmem:[%s8660_s9 + $0xa00] ss:$16 sps:$4 sm:$0xff]   ;;  %v7938_v26 = vld [vmem:[%s8660_s9 + $0xa08] ss:$16 sps:$4 sm:$0xff]  }
 0x305   : > { %v2568_v6 = vrot.slane %v2567_v27, 1  ;;  %8441 = vrsqrt.f32 %v2607_v2  ;;  %v2600_v13 = vsub.f32 %v9152_v56, %v2512_v23  ;;  %v2663_v20 = vrot.slane %v9168_v53, %v8976_v40 }
 0x306   : > { %8443 = vrsqrt.f32 %v2605_v62  ;;  %v2585_v55 = vmul.f32 %v2513_v3, %v2513_v3  ;;  %v2647_v37 = vmul.f32 %v2630_v58, %v2618_v5  ;;  %v2599_v33 = vsub.f32 %v9156_v59, %v2511_v63 }
 0x307   : > { %v8436_v31 = vpop.eup %8435  ;;  %v2569_v32 = vadd.f32 %v2568_v6, %v2567_v27  ;;  %v2597_v42 = vsub.f32 %v9144_v19, %v9184_v1  ;;  %v2601_v1 = vsub.f32 %v9158_v60, %v2513_v3  ;;  %v2671_v52 = vrot.slane %v9168_v53, %v8991_v0  ;;  %v7946_v27 = vld [vmem:[%s8660_s9 + $0xa2c] ss:$16 sps:$4 sm:$0xff]   ;;  %v7941_v53 = vld [vmem:[%s8660_s9 + $0xa20] ss:$16 sps:$4 sm:$0xff]   ;;  %v7944_v3 = vld [vmem:[%s8660_s9 + $0xa28] ss:$16 sps:$4 sm:$0xff]  }
 0x308   : > { %v2619_v4 = vmul.f32 %v8436_v31, %v2595_v15  ;;  %v2676_v25 = vadd.f32 %v2659_v46, %v2647_v37  ;;  %v7952_v6 = vld [vmem:[%s8660_s9 + $0xa4c] ss:$16 sps:$4 sm:$0xff]   ;;  %v7950_v15 = vld [vmem:[%s8660_s9 + $0xa48] ss:$16 sps:$4 sm:$0xff]  }
 0x309   : > { %v2577_v8 = vmul.f32 0.5, %v2569_v32 }
 0x30a   : > { %v2648_v28 = vmul.f32 %v2634_v38, %v2619_v4  ;;  %v2684_v36 = vmax.f32 %v2676_v25, 0.0  ;;  %v7961_v4 = vld [vmem:[%s8660_s9 + $0xa84] ss:$16 sps:$4 sm:$0xff]   ;;  %v7965_v25 = vld [vmem:[%s8660_s9 + $0xaa0] ss:$16 sps:$4 sm:$0xff]  }
 0x30b   : > { %v2593_v14 = vsub.f32 %v2577_v8, %v2585_v55  ;;  %v7947_v55 = vld [vmem:[%s8660_s9 + $0xa40] ss:$16 sps:$4 sm:$0xff]  }
 0x30c   : > { %v8438_v11 = vpop.eup %8437  ;;  %v2677_v43 = vadd.f32 %v2663_v20, %v2648_v28  ;;  %v7953_v8 = vld [vmem:[%s8660_s9 + $0xa60] ss:$16 sps:$4 sm:$0xff]  }
 0x30d   : > { %v2622_v12 = vmul.f32 %v8438_v11, %v2598_v34  ;;  %v8440_v24 = vpop.eup %8439  ;;  %v2609_v61 = vadd.f32 1e-05, %v2593_v14  ;;  %v7958_v34 = vld [vmem:[%s8660_s9 + $0xa6c] ss:$16 sps:$4 sm:$0xff]   ;;  %v7956_v11 = vld [vmem:[%s8660_s9 + $0xa68] ss:$16 sps:$4 sm:$0xff]  }
 0x30e   : > { %v2624_v51 = vmul.f32 %v8440_v24, %v2600_v13  ;;  %v2685_v45 = vmax.f32 %v2677_v43, 0.0  ;;  %v7962_v13 = vld [vmem:[%s8660_s9 + $0xa88] ss:$16 sps:$4 sm:$0xff]   ;;  %v7967_v14 = vld [vmem:[%s8660_s9 + $0xaa4] ss:$16 sps:$4 sm:$0xff]  }
 0x30f   : > { %v2651_v16 = vmul.f32 %v2630_v58, %v2622_v12  ;;  %8445 = vrsqrt.f32 %v2609_v61  ;;  %v8442_v21 = vpop.eup %8441  ;;  %v7949_v58 = vld [vmem:[%s8660_s9 + $0xa44] ss:$16 sps:$4 sm:$0xff]   ;;  %v7959_v12 = vld [vmem:[%s8660_s9 + $0xa80] ss:$16 sps:$4 sm:$0xff]   ;;  %v7970_v24 = vld [vmem:[%s8660_s9 + $0xaac] ss:$16 sps:$4 sm:$0xff]  }
 0x310   : > { %v2653_v7 = vmul.f32 %v9176_v47, %v2624_v51  ;;  %v8444_v35 = vpop.eup %8443  ;;  %v2623_v23 = vmul.f32 %v8442_v21, %v2599_v33  ;;  %v2686_v47 = vmax.f32 %v9208_v30, 0.0  ;;  %v7973_v51 = vld [vmem:[%s8660_s9 + $0xac4] ss:$16 sps:$4 sm:$0xff]   ;;  %v7976_v61 = vld [vmem:[%s8660_s9 + $0xacc] ss:$16 sps:$4 sm:$0xff]  }
 0x311   : > { %v2680_v54 = vadd.f32 %v2659_v46, %v2651_v16  ;;  %v2621_v63 = vmul.f32 %v8444_v35, %v2597_v42  ;;  %v7955_v46 = vld [vmem:[%s8660_s9 + $0xa64] ss:$16 sps:$4 sm:$0xff]   ;;  %v7968_v16 = vld [vmem:[%s8660_s9 + $0xaa8] ss:$16 sps:$4 sm:$0xff]   ;;  %v7971_v28 = vld [vmem:[%s8660_s9 + $0xac0] ss:$16 sps:$4 sm:$0xff]  }
 0x312   : > { %v2682_v56 = vadd.f32 %v9182_v50, %v2653_v7  ;;  %v2652_v44 = vmul.f32 %v2634_v38, %v2623_v23  ;;  %v2642_v50 = vrot.slane %v9165_v41, %v8991_v0  ;;  %v7943_v41 = vld [vmem:[%s8660_s9 + $0xa24] ss:$16 sps:$4 sm:$0xff]   ;;  %v7964_v38 = vld [vmem:[%s8660_s9 + $0xa8c] ss:$16 sps:$4 sm:$0xff]   ;;  %v7977_v33 = vld [vmem:[%s8660_s9 + $0xae0] ss:$16 sps:$4 sm:$0xff]  }
 0x313   : > { %v2688_v39 = vmax.f32 %v2680_v54, 0.0  ;;  %v7979_v54 = vld [vmem:[%s8660_s9 + $0xae4] ss:$16 sps:$4 sm:$0xff]   ;;  %v7982_v7 = vld [vmem:[%s8660_s9 + $0xaec] ss:$16 sps:$4 sm:$0xff]  }
 0x314   : > { %v2690_v59 = vmax.f32 %v2682_v56, 0.0  ;;  %v2681_v18 = vadd.f32 %v2663_v20, %v2652_v44  ;;  %v2650_v19 = vmul.f32 %v2642_v50, %v2621_v63  ;;  %v7974_v20 = vld [vmem:[%s8660_s9 + $0xac8] ss:$16 sps:$4 sm:$0xff]   ;;  %v7985_v35 = vld [vmem:[%s8660_s9 + $0xb04] ss:$16 sps:$4 sm:$0xff]  }
 0x315   : > { %v2692_v48 = vpack.c.bf16 %v2688_v39, %v2684_v36  ;;  %v7980_v21 = vld [vmem:[%s8660_s9 + $0xae8] ss:$16 sps:$4 sm:$0xff]   ;;  %v7988_v56 = vld [vmem:[%s8660_s9 + $0xb0c] ss:$16 sps:$4 sm:$0xff]   ;;  %v7983_v23 = vld [vmem:[%s8660_s9 + $0xb00] ss:$16 sps:$4 sm:$0xff]  }
 0x316   : > { %v9232_v29 = vpack.c.bf16 %v2690_v59, %v2686_v47  ;;  %v2689_v49 = vmax.f32 %v2681_v18, 0.0  ;;  %v2679_v60 = vadd.f32 %v2671_v52, %v2650_v19  ;;  %v7986_v36 = vld [vmem:[%s8660_s9 + $0xb08] ss:$16 sps:$4 sm:$0xff]   ;;  %v7991_v39 = vld [vmem:[%s8660_s9 + $0xb24] ss:$16 sps:$4 sm:$0xff]  }
 0x317   : > { %v7994_v42 = vld [vmem:[%s8660_s9 + $0xb2c] ss:$16 sps:$4 sm:$0xff]   ;;  %v7989_v43 = vld [vmem:[%s8660_s9 + $0xb20] ss:$16 sps:$4 sm:$0xff]   ;;  %v7992_v44 = vld [vmem:[%s8660_s9 + $0xb28] ss:$16 sps:$4 sm:$0xff]  }
 0x318   : > { %v2693_v57 = vpack.c.bf16 %v2689_v49, %v2685_v45  ;;  %v2687_v31 = vmax.f32 %v2679_v60, 0.0  ;;  %v8000_v47 = vld [vmem:[%s8660_s9 + $0xb4c] ss:$16 sps:$4 sm:$0xff]   ;;  %v7995_v59 = vld [vmem:[%s8660_s9 + $0xb40] ss:$16 sps:$4 sm:$0xff]  }
 0x319   : > { %v8446_v30 = vpop.eup %8445  ;;  %v7998_v63 = vld [vmem:[%s8660_s9 + $0xb48] ss:$16 sps:$4 sm:$0xff]   ;;  %v8006_v18 = vld [vmem:[%s8660_s9 + $0xb6c] ss:$16 sps:$4 sm:$0xff]   ;;  %v8001_v45 = vld [vmem:[%s8660_s9 + $0xb60] ss:$16 sps:$4 sm:$0xff]  }
 0x31a   : > { %v2625_v62 = vmul.f32 %v8446_v30, %v2601_v1  ;;  %3497 = vmatprep.mubr.bf16.mxu0 %v2693_v57  ;;  %3583 = vmatprep.mubr.bf16.mxu1 %v2693_v57  ;;  %v8004_v49 = vld [vmem:[%s8660_s9 + $0xb68] ss:$16 sps:$4 sm:$0xff]   ;;  %v8009_v19 = vld [vmem:[%s8660_s9 + $0xb84] ss:$16 sps:$4 sm:$0xff]   ;;  %v8012_v1 = vld [vmem:[%s8660_s9 + $0xb8c] ss:$16 sps:$4 sm:$0xff]  }
 0x31b   : > { %3498 = vmatmul.mubr.bf16.vlgmr.msra.gmra.mrb[8].mxu0 %v2692_v48  ;;  %3584 = vmatmul.mubr.bf16.vlgmr.msra.gmra.mrb[8].mxu1 %v2692_v48  ;;  %v7997_v48 = vld [vmem:[%s8660_s9 + $0xb44] ss:$16 sps:$4 sm:$0xff]   ;;  %v8010_v30 = vld [vmem:[%s8660_s9 + $0xb88] ss:$16 sps:$4 sm:$0xff]  }
 0x31c   : > { %v2654_v2 = vmul.f32 %v2642_v50, %v2625_v62  ;;  %3509 = vmatpush1.bf16.msra.mxu0 %v7935_v22  ;;  %3595 = vmatpush1.bf16.msra.mxu1 %v7938_v26  ;;  %v8003_v50 = vld [vmem:[%s8660_s9 + $0xb64] ss:$16 sps:$4 sm:$0xff]   ;;  %v8018_v22 = vld [vmem:[%s8660_s9 + $0xbac] ss:$16 sps:$4 sm:$0xff]   ;;  %v8013_v26 = vld [vmem:[%s8660_s9 + $0xba0] ss:$16 sps:$4 sm:$0xff]  }
 0x31d   : > { %3510 = vmatprep.subr.bf16.mxu0 %v7943_v41  ;;  %3596 = vmatprep.subr.bf16.mxu1 %v7946_v27  ;;  %v8015_v57 = vld [vmem:[%s8660_s9 + $0xba4] ss:$16 sps:$4 sm:$0xff]   ;;  %v8016_v62 = vld [vmem:[%s8660_s9 + $0xba8] ss:$16 sps:$4 sm:$0xff]   ;;  %v8024_v27 = vld [vmem:[%s8660_s9 + $0xbcc] ss:$16 sps:$4 sm:$0xff]  }
 0x31e   : > { %v2683_v5 = vadd.f32 %v2671_v52, %v2654_v2  ;;  %v8007_v52 = vld [vmem:[%s8660_s9 + $0xb80] ss:$16 sps:$4 sm:$0xff]   ;;  %v8021_v41 = vld [vmem:[%s8660_s9 + $0xbc4] ss:$16 sps:$4 sm:$0xff]   ;;  %v8022_v60 = vld [vmem:[%s8660_s9 + $0xbc8] ss:$16 sps:$4 sm:$0xff]  }
 0x31f   : > { %v8019_v2 = vld [vmem:[%s8660_s9 + $0xbc0] ss:$16 sps:$4 sm:$0xff]  }
 0x320   : > { %v2691_v32 = vmax.f32 %v2683_v5, 0.0  ;;  %3511 = vmatpush1.bf16.msra.mxu0 %v7941_v53  ;;  %3597 = vmatpush1.bf16.msra.mxu1 %v7944_v3  ;;  %v8027_v53 = vld [vmem:[%s8660_s9 + $0xbe4] ss:$16 sps:$4 sm:$0xff]   ;;  %v8030_v3 = vld [vmem:[%s8660_s9 + $0xbec] ss:$16 sps:$4 sm:$0xff]  }
 0x321   : > { %3512 = vmatprep.subr.bf16.mxu0 %v7949_v58  ;;  %3598 = vmatprep.subr.bf16.mxu1 %v7952_v6  ;;  %v8025_v5 = vld [vmem:[%s8660_s9 + $0xbe0] ss:$16 sps:$4 sm:$0xff]   ;;  %v8028_v58 = vld [vmem:[%s8660_s9 + $0xbe8] ss:$16 sps:$4 sm:$0xff]   ;;  %v8033_v6 = vld [vmem:[%s8660_s9 + $0xc04] ss:$16 sps:$4 sm:$0xff]  }
 0x322   : > { %v2695_v37 = vpack.c.bf16 %v2691_v32, %v2687_v31  ;;  %v8036_v31 = vld [vmem:[%s8660_s9 + $0xc0c] ss:$16 sps:$4 sm:$0xff]   ;;  %v8031_v32 = vld [vmem:[%s8660_s9 + $0xc00] ss:$16 sps:$4 sm:$0xff]  }
 0x324   : > { %3540 = vmatprep.mubr.bf16.mxu0 %v2695_v37  ;;  %3626 = vmatprep.mubr.bf16.mxu1 %v2695_v37  ;;  %v8042_v37 = vld [vmem:[%s8660_s9 + $0xc2c] ss:$16 sps:$4 sm:$0xff]  }
 0x325   : > { %3513 = vmatpush1.bf16.msra.mxu0 %v7947_v55  ;;  %3599 = vmatpush1.bf16.msra.mxu1 %v7950_v15  ;;  %v8034_v55 = vld [vmem:[%s8660_s9 + $0xc08] ss:$16 sps:$4 sm:$0xff]   ;;  %v8039_v15 = vld [vmem:[%s8660_s9 + $0xc24] ss:$16 sps:$4 sm:$0xff]  }
 0x326   : > { %3514 = vmatprep.subr.bf16.mxu0 %v7955_v46  ;;  %3600 = vmatprep.subr.bf16.mxu1 %v7958_v34  ;;  %v8037_v46 = vld [vmem:[%s8660_s9 + $0xc20] ss:$16 sps:$4 sm:$0xff]   ;;  %v8040_v34 = vld [vmem:[%s8660_s9 + $0xc28] ss:$16 sps:$4 sm:$0xff]  }
 0x329   : > { %3515 = vmatpush1.bf16.msra.mxu0 %v7953_v8  ;;  %3601 = vmatpush1.bf16.msra.mxu1 %v7956_v11  ;;  %v8045_v8 = vld [vmem:[%s8660_s9 + $0xc44] ss:$16 sps:$4 sm:$0xff]   ;;  %v8048_v11 = vld [vmem:[%s8660_s9 + $0xc4c] ss:$16 sps:$4 sm:$0xff]  }
 0x32a   : > { %3516 = vmatprep.subr.bf16.mxu0 %v7961_v4  ;;  %3602 = vmatprep.subr.bf16.mxu1 %v7964_v38  ;;  %v8043_v4 = vld [vmem:[%s8660_s9 + $0xc40] ss:$16 sps:$4 sm:$0xff]   ;;  %v8046_v38 = vld [vmem:[%s8660_s9 + $0xc48] ss:$16 sps:$4 sm:$0xff]  }
 0x32d   : > { %3517 = vmatpush1.bf16.msra.mxu0 %v7959_v12  ;;  %3603 = vmatpush1.bf16.msra.mxu1 %v7962_v13  ;;  %v8054_v12 = vld [vmem:[%s8660_s9 + $0xc6c] ss:$16 sps:$4 sm:$0xff]   ;;  %v8049_v13 = vld [vmem:[%s8660_s9 + $0xc60] ss:$16 sps:$4 sm:$0xff]  }
 0x32e   : > { %3518 = vmatprep.subr.bf16.mxu0 %v7967_v14  ;;  %3604 = vmatprep.subr.bf16.mxu1 %v7970_v24  ;;  %v8052_v14 = vld [vmem:[%s8660_s9 + $0xc68] ss:$16 sps:$4 sm:$0xff]   ;;  %v8057_v24 = vld [vmem:[%s8660_s9 + $0xc84] ss:$16 sps:$4 sm:$0xff]  }
 0x331   : > { %3519 = vmatpush1.bf16.msra.mxu0 %v7965_v25  ;;  %3605 = vmatpush1.bf16.msra.mxu1 %v7968_v16  ;;  %v8060_v25 = vld [vmem:[%s8660_s9 + $0xc8c] ss:$16 sps:$4 sm:$0xff]   ;;  %v8055_v16 = vld [vmem:[%s8660_s9 + $0xc80] ss:$16 sps:$4 sm:$0xff]  }
 0x332   : > { %3520 = vmatprep.subr.bf16.mxu0 %v7973_v51  ;;  %3606 = vmatprep.subr.bf16.mxu1 %v7976_v61  ;;  %v8058_v51 = vld [vmem:[%s8660_s9 + $0xc88] ss:$16 sps:$4 sm:$0xff]   ;;  %v8063_v61 = vld [vmem:[%s8660_s9 + $0xca4] ss:$16 sps:$4 sm:$0xff]  }
 0x335   : > { %3521 = vmatpush1.bf16.msra.mxu0 %v7971_v28  ;;  %3607 = vmatpush1.bf16.msra.mxu1 %v7974_v20  ;;  %v8066_v28 = vld [vmem:[%s8660_s9 + $0xcac] ss:$16 sps:$4 sm:$0xff]   ;;  %v8061_v20 = vld [vmem:[%s8660_s9 + $0xca0] ss:$16 sps:$4 sm:$0xff]  }
 0x336   : > { %3522 = vmatprep.subr.bf16.mxu0 %v7979_v54  ;;  %3608 = vmatprep.subr.bf16.mxu1 %v7982_v7  ;;  %v8064_v54 = vld [vmem:[%s8660_s9 + $0xca8] ss:$16 sps:$4 sm:$0xff]   ;;  %v8069_v7 = vld [vmem:[%s8660_s9 + $0xcc4] ss:$16 sps:$4 sm:$0xff]  }
 0x339   : > { %3523 = vmatpush1.bf16.msra.mxu0 %v7977_v33  ;;  %3609 = vmatpush1.bf16.msra.mxu1 %v7980_v21  ;;  %v8072_v33 = vld [vmem:[%s8660_s9 + $0xccc] ss:$16 sps:$4 sm:$0xff]   ;;  %v8067_v21 = vld [vmem:[%s8660_s9 + $0xcc0] ss:$16 sps:$4 sm:$0xff]  }
 0x33a   : > { %3524 = vmatprep.subr.bf16.mxu0 %v7985_v35  ;;  %3610 = vmatprep.subr.bf16.mxu1 %v7988_v56  ;;  %v8070_v35 = vld [vmem:[%s8660_s9 + $0xcc8] ss:$16 sps:$4 sm:$0xff]   ;;  %v8075_v56 = vld [vmem:[%s8660_s9 + $0xce4] ss:$16 sps:$4 sm:$0xff]  }
 0x33d   : > { %3525 = vmatpush1.bf16.msra.mxu0 %v7983_v23  ;;  %3611 = vmatpush1.bf16.msra.mxu1 %v7986_v36  ;;  %v8078_v23 = vld [vmem:[%s8660_s9 + $0xcec] ss:$16 sps:$4 sm:$0xff]   ;;  %v8073_v36 = vld [vmem:[%s8660_s9 + $0xce0] ss:$16 sps:$4 sm:$0xff]  }
 0x33e   : > { %3526 = vmatprep.subr.bf16.mxu0 %v7991_v39  ;;  %3612 = vmatprep.subr.bf16.mxu1 %v7994_v42  ;;  %v8076_v39 = vld [vmem:[%s8660_s9 + $0xce8] ss:$16 sps:$4 sm:$0xff]   ;;  %v8081_v42 = vld [vmem:[%s8660_s9 + $0xd04] ss:$16 sps:$4 sm:$0xff]  }
 0x341   : > { %3527 = vmatpush1.bf16.msra.mxu0 %v7989_v43  ;;  %3613 = vmatpush1.bf16.msra.mxu1 %v7992_v44  ;;  %v8084_v43 = vld [vmem:[%s8660_s9 + $0xd0c] ss:$16 sps:$4 sm:$0xff]   ;;  %v8079_v44 = vld [vmem:[%s8660_s9 + $0xd00] ss:$16 sps:$4 sm:$0xff]  }
 0x342   : > { %3528 = vmatprep.subr.bf16.mxu0 %v7997_v48  ;;  %3614 = vmatprep.subr.bf16.mxu1 %v8000_v47  ;;  %v8082_v48 = vld [vmem:[%s8660_s9 + $0xd08] ss:$16 sps:$4 sm:$0xff]   ;;  %v8087_v47 = vld [vmem:[%s8660_s9 + $0xd24] ss:$16 sps:$4 sm:$0xff]  }
 0x345   : > { %3529 = vmatpush1.bf16.msra.mxu0 %v7995_v59  ;;  %3615 = vmatpush1.bf16.msra.mxu1 %v7998_v63  ;;  %v8090_v59 = vld [vmem:[%s8660_s9 + $0xd2c] ss:$16 sps:$4 sm:$0xff]   ;;  %v8085_v63 = vld [vmem:[%s8660_s9 + $0xd20] ss:$16 sps:$4 sm:$0xff]  }
 0x346   : > { %3530 = vmatprep.subr.bf16.mxu0 %v8003_v50  ;;  %3616 = vmatprep.subr.bf16.mxu1 %v8006_v18  ;;  %v8088_v50 = vld [vmem:[%s8660_s9 + $0xd28] ss:$16 sps:$4 sm:$0xff]   ;;  %v8093_v18 = vld [vmem:[%s8660_s9 + $0xd44] ss:$16 sps:$4 sm:$0xff]  }
 0x349   : > { %3531 = vmatpush1.bf16.msra.mxu0 %v8001_v45  ;;  %3617 = vmatpush1.bf16.msra.mxu1 %v8004_v49  ;;  %v8096_v45 = vld [vmem:[%s8660_s9 + $0xd4c] ss:$16 sps:$4 sm:$0xff]   ;;  %v8091_v49 = vld [vmem:[%s8660_s9 + $0xd40] ss:$16 sps:$4 sm:$0xff]  }
 0x34a   : > { %3532 = vmatprep.subr.bf16.mxu0 %v8009_v19  ;;  %3618 = vmatprep.subr.bf16.mxu1 %v8012_v1  ;;  %v8094_v19 = vld [vmem:[%s8660_s9 + $0xd48] ss:$16 sps:$4 sm:$0xff]   ;;  %v8099_v1 = vld [vmem:[%s8660_s9 + $0xd64] ss:$16 sps:$4 sm:$0xff]  }
 0x34d   : > { %3533 = vmatpush1.bf16.msra.mxu0 %v8007_v52  ;;  %3619 = vmatpush1.bf16.msra.mxu1 %v8010_v30  ;;  %v8102_v52 = vld [vmem:[%s8660_s9 + $0xd6c] ss:$16 sps:$4 sm:$0xff]   ;;  %v8097_v30 = vld [vmem:[%s8660_s9 + $0xd60] ss:$16 sps:$4 sm:$0xff]  }
 0x34e   : > { %3534 = vmatprep.subr.bf16.mxu0 %v8015_v57  ;;  %3620 = vmatprep.subr.bf16.mxu1 %v8018_v22  ;;  %v8100_v57 = vld [vmem:[%s8660_s9 + $0xd68] ss:$16 sps:$4 sm:$0xff]   ;;  %v8105_v22 = vld [vmem:[%s8660_s9 + $0xd84] ss:$16 sps:$4 sm:$0xff]  }
 0x351   : > { %3535 = vmatpush1.bf16.msra.mxu0 %v8013_v26  ;;  %3621 = vmatpush1.bf16.msra.mxu1 %v8016_v62  ;;  %v8108_v26 = vld [vmem:[%s8660_s9 + $0xd8c] ss:$16 sps:$4 sm:$0xff]   ;;  %v8103_v62 = vld [vmem:[%s8660_s9 + $0xd80] ss:$16 sps:$4 sm:$0xff]  }
 0x352   : > { %3536 = vmatprep.subr.bf16.mxu0 %v8021_v41  ;;  %3622 = vmatprep.subr.bf16.mxu1 %v8024_v27  ;;  %v8106_v41 = vld [vmem:[%s8660_s9 + $0xd88] ss:$16 sps:$4 sm:$0xff]   ;;  %v8111_v27 = vld [vmem:[%s8660_s9 + $0xda4] ss:$16 sps:$4 sm:$0xff]  }
 0x355   : > { %3537 = vmatpush1.bf16.msra.mxu0 %v8019_v2  ;;  %3623 = vmatpush1.bf16.msra.mxu1 %v8022_v60  ;;  %v8114_v2 = vld [vmem:[%s8660_s9 + $0xdac] ss:$16 sps:$4 sm:$0xff]   ;;  %v8109_v60 = vld [vmem:[%s8660_s9 + $0xda0] ss:$16 sps:$4 sm:$0xff]  }
 0x356   : > { %3538 = vmatprep.subr.bf16.mxu0 %v8027_v53  ;;  %3624 = vmatprep.subr.bf16.mxu1 %v8030_v3  ;;  %v8112_v53 = vld [vmem:[%s8660_s9 + $0xda8] ss:$16 sps:$4 sm:$0xff]   ;;  %v8117_v3 = vld [vmem:[%s8660_s9 + $0xdc4] ss:$16 sps:$4 sm:$0xff]  }
 0x359   : > { %3539 = vmatpush1.bf16.msra.mxu0 %v8025_v5  ;;  %3625 = vmatpush1.bf16.msra.mxu1 %v8028_v58  ;;  %v8120_v5 = vld [vmem:[%s8660_s9 + $0xdcc] ss:$16 sps:$4 sm:$0xff]   ;;  %v8115_v58 = vld [vmem:[%s8660_s9 + $0xdc0] ss:$16 sps:$4 sm:$0xff]  }
 0x35a   : > { %4656 = vmatprep.subr.bf16.mxu0 %v8033_v6  ;;  %4742 = vmatprep.subr.bf16.mxu1 %v8036_v31  ;;  %v8118_v6 = vld [vmem:[%s8660_s9 + $0xdc8] ss:$16 sps:$4 sm:$0xff]   ;;  %v8121_v31 = vld [vmem:[%s8660_s9 + $0xde0] ss:$16 sps:$4 sm:$0xff]  }
 0x35c   : > { %3541 = vmatmul.mubr.bf16.vlgmr.msra.gmra.mrb[8].mxu0 %v9232_v29  ;;  %3627 = vmatmul.mubr.bf16.vlgmr.msra.gmra.mrb[8].mxu1 %v9232_v29  ;;  %v8051_v29 = vld [vmem:[%s8660_s9 + $0xc64] ss:$16 sps:$4 sm:$0xff]  }
 0x35d   : > { %4657 = vmatpush1.bf16.msra.mxu0 %v8031_v32  ;;  %4743 = vmatpush1.bf16.msra.mxu1 %v8034_v55  ;;  %v8123_v32 = vld [vmem:[%s8660_s9 + $0xde4] ss:$16 sps:$4 sm:$0xff]   ;;  %v8124_v55 = vld [vmem:[%s8660_s9 + $0xde8] ss:$16 sps:$4 sm:$0xff]  }
 0x35e   : > { %4658 = vmatprep.subr.bf16.mxu0 %v8039_v15  ;;  %4744 = vmatprep.subr.bf16.mxu1 %v8042_v37  ;;  %v8126_v15 = vld [vmem:[%s8660_s9 + $0xdec] ss:$16 sps:$4 sm:$0xff]   ;;  %v8129_v37 = vld [vmem:[%s8660_s9 + $0xe04] ss:$16 sps:$4 sm:$0xff]  }
 0x361   : > { %4659 = vmatpush1.bf16.msra.mxu0 %v8037_v46  ;;  %4745 = vmatpush1.bf16.msra.mxu1 %v8040_v34  ;;  %v8132_v46 = vld [vmem:[%s8660_s9 + $0xe0c] ss:$16 sps:$4 sm:$0xff]  }
 0x362   : > { %4660 = vmatprep.subr.bf16.mxu0 %v8045_v8  ;;  %4746 = vmatprep.subr.bf16.mxu1 %v8048_v11  ;;  %v6835_v34 = vld [vmem:[%s8915_s8 + $0x4] ss:$8 sm:$0xf]  ;;  %v9369_v8 = vld [vmem:[%s8915_s8 + $0x5] ss:$8 sm:$0xf] }
 0x365   : > { %4661 = vmatpush1.bf16.msra.mxu0 %v8043_v4  ;;  %4747 = vmatpush1.bf16.msra.mxu1 %v8046_v38  ;;  %v9374_v4 = vrot.slane %v6835_v34, %v8969_v9 }
 0x366   : > { %4662 = vmatprep.subr.bf16.mxu0 %v8051_v29  ;;  %4748 = vmatprep.subr.bf16.mxu1 %v8054_v12 }
 0x369   : > { %4663 = vmatpush1.bf16.msra.mxu0 %v8049_v13  ;;  %4749 = vmatpush1.bf16.msra.mxu1 %v8052_v14  ;;  %v9383_v13 = vrot.slane %v6835_v34, %v8918_v10 }
 0x36a   : > { %4664 = vmatprep.subr.bf16.mxu0 %v8057_v24  ;;  %4750 = vmatprep.subr.bf16.mxu1 %v8060_v25  ;;  %v9388_v24 = vrot.slane %v6835_v34, %v8976_v40 }
 0x36d   : > { %4665 = vmatpush1.bf16.msra.mxu0 %v8055_v16  ;;  %4751 = vmatpush1.bf16.msra.mxu1 %v8058_v51 }
 0x36e   : > { %4666 = vmatprep.subr.bf16.mxu0 %v8063_v61  ;;  %4752 = vmatprep.subr.bf16.mxu1 %v8066_v28  ;;  %v9397_v61 = vrot.slane %v6835_v34, %v8991_v0 }
 0x371   : > { %4667 = vmatpush1.bf16.msra.mxu0 %v8061_v20  ;;  %4753 = vmatpush1.bf16.msra.mxu1 %v8064_v54  ;;  %v9405_v54 = vrot.slane %v9369_v8, %v8976_v40 }
 0x372   : > { %4668 = vmatprep.subr.bf16.mxu0 %v8069_v7  ;;  %4754 = vmatprep.subr.bf16.mxu1 %v8072_v33 }
 0x375   : > { %4669 = vmatpush1.bf16.msra.mxu0 %v8067_v21  ;;  %4755 = vmatpush1.bf16.msra.mxu1 %v8070_v35 }
 0x376   : > { %4670 = vmatprep.subr.bf16.mxu0 %v8075_v56  ;;  %4756 = vmatprep.subr.bf16.mxu1 %v8078_v23 }
 0x379   : > { %4671 = vmatpush1.bf16.msra.mxu0 %v8073_v36  ;;  %4757 = vmatpush1.bf16.msra.mxu1 %v8076_v39 }
 0x37a   : > { %4672 = vmatprep.subr.bf16.mxu0 %v8081_v42  ;;  %4758 = vmatprep.subr.bf16.mxu1 %v8084_v43 }
 0x37d   : > { %4673 = vmatpush1.bf16.msra.mxu0 %v8079_v44  ;;  %4759 = vmatpush1.bf16.msra.mxu1 %v8082_v48 }
 0x37e   : > { %4674 = vmatprep.subr.bf16.mxu0 %v8087_v47  ;;  %4760 = vmatprep.subr.bf16.mxu1 %v8090_v59 }
 0x381   : > { %4675 = vmatpush1.bf16.msra.mxu0 %v8085_v63  ;;  %4761 = vmatpush1.bf16.msra.mxu1 %v8088_v50 }
 0x382   : > { %4676 = vmatprep.subr.bf16.mxu0 %v8093_v18  ;;  %4762 = vmatprep.subr.bf16.mxu1 %v8096_v45 }
 0x385   : > { %4677 = vmatpush1.bf16.msra.mxu0 %v8091_v49  ;;  %4763 = vmatpush1.bf16.msra.mxu1 %v8094_v19 }
 0x386   : > { %4678 = vmatprep.subr.bf16.mxu0 %v8099_v1  ;;  %4764 = vmatprep.subr.bf16.mxu1 %v8102_v52 }
 0x389   : > { %4679 = vmatpush1.bf16.msra.mxu0 %v8097_v30  ;;  %4765 = vmatpush1.bf16.msra.mxu1 %v8100_v57 }
 0x38a   : > { %4680 = vmatprep.subr.bf16.mxu0 %v8105_v22  ;;  %4766 = vmatprep.subr.bf16.mxu1 %v8108_v26 }
 0x38d   : > { %4681 = vmatpush1.bf16.msra.mxu0 %v8103_v62  ;;  %4767 = vmatpush1.bf16.msra.mxu1 %v8106_v41 }
 0x38e   : > { %4682 = vmatprep.subr.bf16.mxu0 %v8111_v27  ;;  %4768 = vmatprep.subr.bf16.mxu1 %v8114_v2 }
 0x391   : > { %4683 = vmatpush1.bf16.msra.mxu0 %v8109_v60  ;;  %4769 = vmatpush1.bf16.msra.mxu1 %v8112_v53 }
 0x392   : > { %4684 = vmatprep.subr.bf16.mxu0 %v8117_v3  ;;  %4770 = vmatprep.subr.bf16.mxu1 %v8120_v5 }
 0x395   : > { %4685 = vmatpush1.bf16.msra.mxu0 %v8115_v58  ;;  %4771 = vmatpush1.bf16.msra.mxu1 %v8118_v6 }
 0x396   : > { %4686 = vmatprep.subr.bf16.mxu0 %v8123_v32  ;;  %4772 = vmatprep.subr.bf16.mxu1 %v8126_v15 }
 0x399   : > { %4687 = vmatpush1.bf16.msra.mxu0 %v8121_v31  ;;  %4773 = vmatpush1.bf16.msra.mxu1 %v8124_v55 }
 0x39a   : > { %4699 = vmatprep.subr.bf16.mxu0 %v8129_v37  ;;  %4785 = vmatprep.subr.bf16.mxu1 %v8132_v46 }
 0x42f   : > { %v9371_v11 = vpop.f32.mrb[8].mxu0  ;;  %v9376_v38 = vpop.f32.mrb[8].mxu1 }
 0x430   : > { %v3641_v29 = vmul.f32 %v8881_v17, %v9371_v11  ;;  %v3643_v12 = vmul.f32 %v8881_v17, %v9376_v38  ;;  %v9385_v14 = vpop.f32.mrb[9].mxu0  ;;  %v9390_v25 = vpop.f32.mrb[9].mxu1 }
 0x431   : > { %v3642_v16 = vmul.f32 %v8881_v17, %v9385_v14  ;;  %v3644_v51 = vmul.f32 %v8881_v17, %v9390_v25  ;;  %v9399_v28 = vpop.f32.mrb[10].mxu0  ;;  %v9401_v20 = vpop.f32.mrb[10].mxu1 }
 0x432   : > { %v3649_v7 = vrot.slane %v3641_v29, 4  ;;  %v3705_v33 = vmul.f32 %v3641_v29, %v9371_v11  ;;  %v3661_v21 = vrot.slane %v3643_v12, 4  ;;  %v3707_v35 = vmul.f32 %v3643_v12, %v9376_v38  ;;  %v9409_v56 = vpop.f32.mrb[11].mxu0  ;;  %v9411_v23 = vpop.f32.mrb[11].mxu1 }
 0x433   : > { %v3655_v36 = vrot.slane %v3642_v16, 4  ;;  %v3706_v39 = vmul.f32 %v3642_v16, %v9385_v14  ;;  %v3667_v42 = vrot.slane %v3644_v51, 4  ;;  %v3708_v43 = vmul.f32 %v3644_v51, %v9390_v25 }
 0x434   : > { %v3650_v44 = vadd.f32 %v3649_v7, %v3641_v29  ;;  %v3713_v48 = vrot.slane %v3705_v33, 4  ;;  %v3662_v47 = vadd.f32 %v3661_v21, %v3643_v12  ;;  %v3725_v59 = vrot.slane %v3707_v35, 4 }
 0x435   : > { %v3656_v63 = vadd.f32 %v3655_v36, %v3642_v16  ;;  %v3719_v50 = vrot.slane %v3706_v39, 4  ;;  %v3668_v18 = vadd.f32 %v3667_v42, %v3644_v51  ;;  %v3731_v45 = vrot.slane %v3708_v43, 4 }
 0x436   : > { %v3651_v49 = vrot.slane %v3650_v44, 2  ;;  %v3714_v19 = vadd.f32 %v3713_v48, %v3705_v33  ;;  %v3663_v1 = vrot.slane %v3662_v47, 2  ;;  %v3726_v52 = vadd.f32 %v3725_v59, %v3707_v35 }
 0x437   : > { %v3657_v30 = vrot.slane %v3656_v63, 2  ;;  %v3720_v57 = vadd.f32 %v3719_v50, %v3706_v39  ;;  %v3669_v22 = vrot.slane %v3668_v18, 2  ;;  %v3732_v26 = vadd.f32 %v3731_v45, %v3708_v43 }
 0x438   : > { %v3652_v62 = vadd.f32 %v3651_v49, %v3650_v44  ;;  %v3715_v41 = vrot.slane %v3714_v19, 2  ;;  %v3664_v27 = vadd.f32 %v3663_v1, %v3662_v47  ;;  %v3727_v2 = vrot.slane %v3726_v52, 2 }
 0x439   : > { %v3658_v60 = vadd.f32 %v3657_v30, %v3656_v63  ;;  %v3721_v53 = vrot.slane %v3720_v57, 2  ;;  %v3670_v3 = vadd.f32 %v3669_v22, %v3668_v18  ;;  %v3733_v5 = vrot.slane %v3732_v26, 2 }
 0x43a   : > { %v3653_v58 = vrot.slane %v3652_v62, 1  ;;  %v3716_v6 = vadd.f32 %v3715_v41, %v3714_v19  ;;  %v3665_v31 = vrot.slane %v3664_v27, 1  ;;  %v3728_v32 = vadd.f32 %v3727_v2, %v3726_v52 }
 0x43b   : > { %v3659_v55 = vrot.slane %v3658_v60, 1  ;;  %v3722_v15 = vadd.f32 %v3721_v53, %v3720_v57  ;;  %v3671_v37 = vrot.slane %v3670_v3, 1  ;;  %v3734_v46 = vadd.f32 %v3733_v5, %v3732_v26 }
 0x43c   : > { %v3654_v34 = vadd.f32 %v3653_v58, %v3652_v62  ;;  %v3717_v29 = vrot.slane %v3716_v6, 1  ;;  %v3666_v12 = vadd.f32 %v3665_v31, %v3664_v27  ;;  %v3729_v16 = vrot.slane %v3728_v32, 1 }
 0x43d   : > { %v3660_v51 = vadd.f32 %v3659_v55, %v3658_v60  ;;  %v3723_v7 = vrot.slane %v3722_v15, 1  ;;  %v3672_v33 = vadd.f32 %v3671_v37, %v3670_v3  ;;  %v3735_v21 = vrot.slane %v3734_v46, 1 }
 0x43e   : > { %v9415_v35 = vmul.f32 0.5, %v3654_v34  ;;  %v3718_v36 = vadd.f32 %v3717_v29, %v3716_v6  ;;  %v9417_v39 = vmul.f32 0.5, %v3666_v12  ;;  %v3730_v42 = vadd.f32 %v3729_v16, %v3728_v32 }
 0x43f   : > { %v9419_v43 = vmul.f32 0.5, %v3660_v51  ;;  %v3724_v44 = vadd.f32 %v3723_v7, %v3722_v15  ;;  %v9421_v48 = vmul.f32 0.5, %v3672_v33  ;;  %v3736_v47 = vadd.f32 %v3735_v21, %v3734_v46 }
 0x440   : > { %v3761_v59 = vmul.f32 0.5, %v3718_v36  ;;  %v3769_v63 = vmul.f32 %v9415_v35, %v9415_v35  ;;  %v3763_v50 = vmul.f32 0.5, %v3730_v42  ;;  %v9427_v18 = vrot.slane %v9369_v8, %v8969_v9 }
 0x441   : > { %v3771_v45 = vmul.f32 %v9417_v39, %v9417_v39  ;;  %v3762_v49 = vmul.f32 0.5, %v3724_v44  ;;  %v3770_v19 = vmul.f32 %v9419_v43, %v9419_v43  ;;  %v9435_v1 = vrot.slane %v9369_v8, %v8991_v0 }
 0x442   : > { %v3777_v52 = vsub.f32 %v3761_v59, %v3769_v63  ;;  %v3785_v30 = vsub.f32 %v9371_v11, %v9415_v35  ;;  %v3764_v57 = vmul.f32 0.5, %v3736_v47  ;;  %v3772_v22 = vmul.f32 %v9421_v48, %v9421_v48 }
 0x443   : > { %v3779_v26 = vsub.f32 %v3763_v50, %v3771_v45  ;;  %v3787_v62 = vsub.f32 %v9376_v38, %v9417_v39  ;;  %v3778_v41 = vsub.f32 %v3762_v49, %v3770_v19  ;;  %v3645_v27 = vmul.f32 %v8881_v17, %v9399_v28 }
 0x444   : > { %v3793_v2 = vadd.f32 1e-05, %v3777_v52  ;;  %v3780_v60 = vsub.f32 %v3764_v57, %v3772_v22  ;;  %v3647_v53 = vmul.f32 %v8881_v17, %v9401_v20  ;;  %v3646_v11 = vmul.f32 %v8881_v17, %v9409_v56 }
 0x445   : > { %v3795_v3 = vadd.f32 1e-05, %v3779_v26  ;;  %v3794_v5 = vadd.f32 1e-05, %v3778_v41  ;;  %v3673_v58 = vrot.slane %v3645_v27, 4  ;;  %v3709_v6 = vmul.f32 %v3645_v27, %v9399_v28 }
 0x446   : > { %8447 = vrsqrt.f32 %v3793_v2  ;;  %v3796_v31 = vadd.f32 1e-05, %v3780_v60  ;;  %v3685_v38 = vrot.slane %v3647_v53, 4  ;;  %v3711_v32 = vmul.f32 %v3647_v53, %v9401_v20 }
 0x447   : > { %8449 = vrsqrt.f32 %v3795_v3  ;;  %v3674_v55 = vadd.f32 %v3673_v58, %v3645_v27  ;;  %v3737_v15 = vrot.slane %v3709_v6, 4  ;;  %v3679_v37 = vrot.slane %v3646_v11, 4 }
 0x448   : > { %8451 = vrsqrt.f32 %v3794_v5  ;;  %v3686_v46 = vadd.f32 %v3685_v38, %v3647_v53  ;;  %v3749_v34 = vrot.slane %v3711_v32, 4  ;;  %v3710_v29 = vmul.f32 %v3646_v11, %v9409_v56 }
 0x449   : > { %8453 = vrsqrt.f32 %v3796_v31  ;;  %v3675_v12 = vrot.slane %v3674_v55, 2  ;;  %v3738_v16 = vadd.f32 %v3737_v15, %v3709_v6  ;;  %v3680_v51 = vadd.f32 %v3679_v37, %v3646_v11 }
 0x44a   : > { %v3687_v7 = vrot.slane %v3686_v46, 2  ;;  %v3750_v33 = vadd.f32 %v3749_v34, %v3711_v32  ;;  %v3743_v21 = vrot.slane %v3710_v29, 4  ;;  %v3648_v35 = vmul.f32 %v8881_v17, %v9411_v23 }
 0x44b   : > { %v3786_v36 = vsub.f32 %v9385_v14, %v9419_v43  ;;  %v3676_v39 = vadd.f32 %v3675_v12, %v3674_v55  ;;  %v3739_v42 = vrot.slane %v3738_v16, 2  ;;  %v3681_v44 = vrot.slane %v3680_v51, 2 }
 0x44c   : > { %v3688_v47 = vadd.f32 %v3687_v7, %v3686_v46  ;;  %v3751_v59 = vrot.slane %v3750_v33, 2  ;;  %v3744_v63 = vadd.f32 %v3743_v21, %v3710_v29  ;;  %v3691_v50 = vrot.slane %v3648_v35, 4 }
 0x44d   : > { %v3788_v45 = vsub.f32 %v9390_v25, %v9421_v48  ;;  %v3677_v49 = vrot.slane %v3676_v39, 1  ;;  %v3740_v19 = vadd.f32 %v3739_v42, %v3738_v16  ;;  %v3682_v52 = vadd.f32 %v3681_v44, %v3680_v51 }
 0x44e   : > { %v3689_v57 = vrot.slane %v3688_v47, 1  ;;  %v3752_v22 = vadd.f32 %v3751_v59, %v3750_v33  ;;  %v3745_v26 = vrot.slane %v3744_v63, 2  ;;  %v3692_v41 = vadd.f32 %v3691_v50, %v3648_v35 }
 0x44f   : > { %v3678_v27 = vadd.f32 %v3677_v49, %v3676_v39  ;;  %v3741_v2 = vrot.slane %v3740_v19, 1  ;;  %v3683_v14 = vrot.slane %v3682_v52, 1  ;;  %v3712_v43 = vmul.f32 %v3648_v35, %v9411_v23 }
 0x450   : > { %v8448_v60 = vpop.eup %8447  ;;  %v3690_v53 = vadd.f32 %v3689_v57, %v3688_v47  ;;  %v3753_v11 = vrot.slane %v3752_v22, 1  ;;  %v3746_v3 = vadd.f32 %v3745_v26, %v3744_v63  ;;  %v3693_v5 = vrot.slane %v3692_v41, 2 }
 0x451   : > { %v8450_v58 = vpop.eup %8449  ;;  %v3809_v6 = vmul.f32 %v8448_v60, %v3785_v30  ;;  %v3701_v25 = vmul.f32 0.5, %v3678_v27  ;;  %v3742_v48 = vadd.f32 %v3741_v2, %v3740_v19  ;;  %v3684_v31 = vadd.f32 %v3683_v14, %v3682_v52 }
 0x452   : > { %v8452_v38 = vpop.eup %8451  ;;  %v3811_v32 = vmul.f32 %v8450_v58, %v3787_v62  ;;  %v3703_v55 = vmul.f32 0.5, %v3690_v53  ;;  %v3754_v15 = vadd.f32 %v3753_v11, %v3752_v22  ;;  %v3747_v37 = vrot.slane %v3746_v3, 1 }
 0x453   : > { %v8454_v46 = vpop.eup %8453  ;;  %v3810_v34 = vmul.f32 %v8452_v38, %v3786_v36  ;;  %v3765_v29 = vmul.f32 0.5, %v3742_v48  ;;  %v3773_v12 = vmul.f32 %v3701_v25, %v3701_v25  ;;  %v3755_v16 = vrot.slane %v3712_v43, 4 }
 0x454   : > { %v3838_v51 = vmul.f32 %v9374_v4, %v3809_v6  ;;  %v3812_v7 = vmul.f32 %v8454_v46, %v3788_v45  ;;  %v3767_v33 = vmul.f32 0.5, %v3754_v15  ;;  %v3858_v30 = vrot.slane %v9369_v8, %v8918_v10 }
 0x455   : > { %v3840_v21 = vmul.f32 %v9383_v13, %v3811_v32  ;;  %v3839_v62 = vmul.f32 %v9388_v24, %v3810_v34  ;;  %v3781_v35 = vsub.f32 %v3765_v29, %v3773_v12  ;;  %v3775_v39 = vmul.f32 %v3703_v55, %v3703_v55 }
 0x456   : > { %v3841_v42 = vmul.f32 %v9397_v61, %v3812_v7  ;;  %v3702_v36 = vmul.f32 0.5, %v3684_v31  ;;  %v3748_v44 = vadd.f32 %v3747_v37, %v3746_v3  ;;  %v3694_v47 = vadd.f32 %v3693_v5, %v3692_v41  ;;  %v8127_v7 = vld [vmem:[%s8660_s9 + $0xe00] ss:$16 sps:$4 sm:$0xff]  }
 0x457   : > { %v3797_v59 = vadd.f32 1e-05, %v3781_v35  ;;  %v3783_v63 = vsub.f32 %v3767_v33, %v3775_v39  ;;  %v3756_v8 = vadd.f32 %v3755_v16, %v3712_v43  ;;  %v3868_v50 = vadd.f32 %v9405_v54, %v3839_v62  ;;  %v8136_v62 = vld [vmem:[%s8660_s9 + $0xe28] ss:$16 sps:$4 sm:$0xff]   ;;  %v8141_v35 = vld [vmem:[%s8660_s9 + $0xe44] ss:$16 sps:$4 sm:$0xff]  }
 0x458   : > { %v3766_v45 = vmul.f32 0.5, %v3748_v44  ;;  %v3774_v49 = vmul.f32 %v3702_v36, %v3702_v36  ;;  %v3695_v19 = vrot.slane %v3694_v47, 1  ;;  %v3867_v22 = vadd.f32 %v9427_v18, %v3838_v51  ;;  %v8144_v39 = vld [vmem:[%s8660_s9 + $0xe4c] ss:$16 sps:$4 sm:$0xff]   ;;  %v8142_v44 = vld [vmem:[%s8660_s9 + $0xe48] ss:$16 sps:$4 sm:$0xff]  }
 0x459   : > { %8455 = vrsqrt.f32 %v3797_v59  ;;  %v3799_v52 = vadd.f32 1e-05, %v3783_v63  ;;  %v3757_v57 = vrot.slane %v3756_v8, 2  ;;  %3876 = vst [vmem:[%s9469_s12 + $0x8] sm:$0xff] %v3868_v50  ;;  %v9475_v27 = vadd.f32 %v9435_v1, %v3841_v42  ;;  %v8150_v59 = vld [vmem:[%s8660_s9 + $0xe6c] ss:$16 sps:$4 sm:$0xff]  }
 0x45a   : > { %v3782_v26 = vsub.f32 %v3766_v45, %v3774_v49  ;;  %v3696_v41 = vadd.f32 %v3695_v19, %v3694_v47  ;;  %v3869_v2 = vadd.f32 %v3858_v30, %v3840_v21  ;;  %3875 = vst [vmem:[%s9469_s12] sm:$0xff] %v3867_v22  ;;  %v3789_v58 = vsub.f32 %v9399_v28, %v3701_v25  ;;  %v8138_v21 = vld [vmem:[%s8660_s9 + $0xe2c] ss:$16 sps:$4 sm:$0xff]   ;;  %v8148_v63 = vld [vmem:[%s8660_s9 + $0xe68] ss:$16 sps:$4 sm:$0xff]   ;;  %v8151_v45 = vld [vmem:[%s8660_s9 + $0xe80] ss:$16 sps:$4 sm:$0xff]  }
 0x45b   : > { %8457 = vrsqrt.f32 %v3799_v52  ;;  %v3758_v14 = vadd.f32 %v3757_v57, %v3756_v8  ;;  %3878 = vst [vmem:[%s9469_s12 + $0x18] sm:$0xff] %v9475_v27  ;;  %v3791_v38 = vsub.f32 %v9401_v20, %v3703_v55  ;;  %v3790_v34 = vsub.f32 %v9409_v56, %v3702_v36  ;;  %v8139_v36 = vld [vmem:[%s8660_s9 + $0xe40] ss:$16 sps:$4 sm:$0xff]   ;;  %v8153_v8 = vld [vmem:[%s8660_s9 + $0xe84] ss:$16 sps:$4 sm:$0xff]  }
 0x45c   : > { %v3798_v43 = vadd.f32 1e-05, %v3782_v26  ;;  %v3704_v60 = vmul.f32 0.5, %v3696_v41  ;;  %3877 = vst [vmem:[%s9469_s12 + $0x10] sm:$0xff] %v3869_v2  ;;  %v8154_v49 = vld [vmem:[%s8660_s9 + $0xe88] ss:$16 sps:$4 sm:$0xff]  }
 0x45d   : > { %v3759_v53 = vrot.slane %v3758_v14, 1  ;;  %v8159_v19 = vld [vmem:[%s8660_s9 + $0xea4] ss:$16 sps:$4 sm:$0xff]   ;;  %v8162_v52 = vld [vmem:[%s8660_s9 + $0xeac] ss:$16 sps:$4 sm:$0xff]  }
 0x45e   : > { %8459 = vrsqrt.f32 %v3798_v43  ;;  %v3776_v3 = vmul.f32 %v3704_v60, %v3704_v60  ;;  %v3792_v33 = vsub.f32 %v9411_v23, %v3704_v60  ;;  %v8157_v57 = vld [vmem:[%s8660_s9 + $0xea0] ss:$16 sps:$4 sm:$0xff]   ;;  %v8165_v26 = vld [vmem:[%s8660_s9 + $0xec4] ss:$16 sps:$4 sm:$0xff]   ;;  %v8168_v41 = vld [vmem:[%s8660_s9 + $0xecc] ss:$16 sps:$4 sm:$0xff]  }
 0x45f   : > { %v3760_v11 = vadd.f32 %v3759_v53, %v3758_v14  ;;  %v8171_v14 = vld [vmem:[%s8660_s9 + $0xee4] ss:$16 sps:$4 sm:$0xff]   ;;  %v8174_v43 = vld [vmem:[%s8660_s9 + $0xeec] ss:$16 sps:$4 sm:$0xff]   ;;  %v8169_v60 = vld [vmem:[%s8660_s9 + $0xee0] ss:$16 sps:$4 sm:$0xff]  }
 0x460   : > { %v8172_v53 = vld [vmem:[%s8660_s9 + $0xee8] ss:$16 sps:$4 sm:$0xff]  }
 0x461   : > { %v3768_v5 = vmul.f32 0.5, %v3760_v11  ;;  %v8177_v11 = vld [vmem:[%s8660_s9 + $0xf04] ss:$16 sps:$4 sm:$0xff]  }
 0x463   : > { %v8456_v6 = vpop.eup %8455  ;;  %v3784_v48 = vsub.f32 %v3768_v5, %v3776_v3  ;;  %v8180_v3 = vld [vmem:[%s8660_s9 + $0xf0c] ss:$16 sps:$4 sm:$0xff]   ;;  %v8175_v5 = vld [vmem:[%s8660_s9 + $0xf00] ss:$16 sps:$4 sm:$0xff]  }
 0x464   : > { %v3813_v31 = vmul.f32 %v8456_v6, %v3789_v58  ;;  %v8178_v58 = vld [vmem:[%s8660_s9 + $0xf08] ss:$16 sps:$4 sm:$0xff]   ;;  %v8183_v6 = vld [vmem:[%s8660_s9 + $0xf24] ss:$16 sps:$4 sm:$0xff]  }
 0x465   : > { %v8458_v32 = vpop.eup %8457  ;;  %v3800_v15 = vadd.f32 1e-05, %v3784_v48  ;;  %v8186_v48 = vld [vmem:[%s8660_s9 + $0xf2c] ss:$16 sps:$4 sm:$0xff]  }
 0x466   : > { %v3842_v37 = vmul.f32 %v9374_v4, %v3813_v31  ;;  %v3815_v46 = vmul.f32 %v8458_v32, %v3791_v38  ;;  %v8181_v31 = vld [vmem:[%s8660_s9 + $0xf20] ss:$16 sps:$4 sm:$0xff]   ;;  %v8184_v38 = vld [vmem:[%s8660_s9 + $0xf28] ss:$16 sps:$4 sm:$0xff]   ;;  %v8189_v32 = vld [vmem:[%s8660_s9 + $0xf44] ss:$16 sps:$4 sm:$0xff]  }
 0x467   : > { %8461 = vrsqrt.f32 %v3800_v15  ;;  %v8192_v15 = vld [vmem:[%s8660_s9 + $0xf4c] ss:$16 sps:$4 sm:$0xff]  }
 0x468   : > { %v8460_v29 = vpop.eup %8459  ;;  %v3844_v28 = vmul.f32 %v9383_v13, %v3815_v46  ;;  %v3871_v25 = vadd.f32 %v9427_v18, %v3842_v37  ;;  %v8130_v13 = vld [vmem:[%s8660_s9 + $0xe08] ss:$16 sps:$4 sm:$0xff]   ;;  %v8135_v18 = vld [vmem:[%s8660_s9 + $0xe24] ss:$16 sps:$4 sm:$0xff]   ;;  %v8187_v37 = vld [vmem:[%s8660_s9 + $0xf40] ss:$16 sps:$4 sm:$0xff]  }
 0x469   : > { %v3814_v12 = vmul.f32 %v8460_v29, %v3790_v34  ;;  %v8190_v46 = vld [vmem:[%s8660_s9 + $0xf48] ss:$16 sps:$4 sm:$0xff]   ;;  %v8195_v34 = vld [vmem:[%s8660_s9 + $0xf64] ss:$16 sps:$4 sm:$0xff]   ;;  %v8198_v29 = vld [vmem:[%s8660_s9 + $0xf6c] ss:$16 sps:$4 sm:$0xff]  }
 0x46a   : > { %3879 = vst [vmem:[%s9469_s12 + $0x20] sm:$0xff] %v3871_v25  ;;  %v3883_v20 = vpack.c.bf16 %v3871_v25, %v3867_v22  ;;  %v3873_v55 = vadd.f32 %v3858_v30, %v3844_v28  ;;  %v8160_v22 = vld [vmem:[%s8660_s9 + $0xea8] ss:$16 sps:$4 sm:$0xff]   ;;  %v8193_v28 = vld [vmem:[%s8660_s9 + $0xf60] ss:$16 sps:$4 sm:$0xff]  }
 0x46b   : > { %v3843_v16 = vmul.f32 %v9388_v24, %v3814_v12  ;;  %v8196_v25 = vld [vmem:[%s8660_s9 + $0xf68] ss:$16 sps:$4 sm:$0xff]   ;;  %v8201_v12 = vld [vmem:[%s8660_s9 + $0xf84] ss:$16 sps:$4 sm:$0xff]  }
 0x46c   : > { %3881 = vst [vmem:[%s9469_s12 + $0x30] sm:$0xff] %v3873_v55  ;;  %v9490_v4 = vpack.c.bf16 %v3873_v55, %v3869_v2  ;;  %v8166_v2 = vld [vmem:[%s8660_s9 + $0xec8] ss:$16 sps:$4 sm:$0xff]   ;;  %v8199_v55 = vld [vmem:[%s8660_s9 + $0xf80] ss:$16 sps:$4 sm:$0xff]  }
 0x46d   : > { %v3872_v56 = vadd.f32 %v9405_v54, %v3843_v16  ;;  %v8133_v54 = vld [vmem:[%s8660_s9 + $0xe20] ss:$16 sps:$4 sm:$0xff]   ;;  %v8202_v16 = vld [vmem:[%s8660_s9 + $0xf88] ss:$16 sps:$4 sm:$0xff]  }
 0x46f   : > { %3880 = vst [vmem:[%s9469_s12 + $0x28] sm:$0xff] %v3872_v56  ;;  %v3884_v51 = vpack.c.bf16 %v3872_v56, %v3868_v50  ;;  %v8156_v50 = vld [vmem:[%s8660_s9 + $0xe8c] ss:$16 sps:$4 sm:$0xff]   ;;  %v8207_v56 = vld [vmem:[%s8660_s9 + $0xfa4] ss:$16 sps:$4 sm:$0xff]  }
 0x471   : > { %v8462_v30 = vpop.eup %8461  ;;  %4688 = vmatprep.mubr.bf16.mxu0 %v3884_v51  ;;  %4774 = vmatprep.mubr.bf16.mxu1 %v3884_v51  ;;  %v8210_v51 = vld [vmem:[%s8660_s9 + $0xfac] ss:$16 sps:$4 sm:$0xff]  }
 0x472   : > { %v3816_v24 = vmul.f32 %v8462_v30, %v3792_v33  ;;  %4689 = vmatmul.mubr.bf16.vlgmr.msra.gmra.mrb[12].mxu0 %v3883_v20  ;;  %4775 = vmatmul.mubr.bf16.vlgmr.msra.gmra.mrb[12].mxu1 %v3883_v20  ;;  %v8204_v20 = vld [vmem:[%s8660_s9 + $0xf8c] ss:$16 sps:$4 sm:$0xff]   ;;  %v8213_v33 = vld [vmem:[%s8660_s9 + $0xfc4] ss:$16 sps:$4 sm:$0xff]   ;;  %v8214_v30 = vld [vmem:[%s8660_s9 + $0xfc8] ss:$16 sps:$4 sm:$0xff]  }
 0x473   : > { %4700 = vmatpush1.bf16.msra.mxu0 %v8127_v7  ;;  %4786 = vmatpush1.bf16.msra.mxu1 %v8130_v13  ;;  %v8205_v7 = vld [vmem:[%s8660_s9 + $0xfa0] ss:$16 sps:$4 sm:$0xff]   ;;  %v8208_v13 = vld [vmem:[%s8660_s9 + $0xfa8] ss:$16 sps:$4 sm:$0xff]  }
 0x474   : > { %v3845_v23 = vmul.f32 %v9397_v61, %v3816_v24  ;;  %4701 = vmatprep.subr.bf16.mxu0 %v8135_v18  ;;  %4787 = vmatprep.subr.bf16.mxu1 %v8138_v21  ;;  %v8147_v61 = vld [vmem:[%s8660_s9 + $0xe64] ss:$16 sps:$4 sm:$0xff]   ;;  %v8216_v18 = vld [vmem:[%s8660_s9 + $0xfcc] ss:$16 sps:$4 sm:$0xff]   ;;  %v8211_v21 = vld [vmem:[%s8660_s9 + $0xfc0] ss:$16 sps:$4 sm:$0xff]  }
 0x475   : > { %v8219_v24 = vld [vmem:[%s8660_s9 + $0xfe4] ss:$16 sps:$4 sm:$0xff]  }
 0x476   : > { %v3874_v42 = vadd.f32 %v9435_v1, %v3845_v23  ;;  %v8145_v1 = vld [vmem:[%s8660_s9 + $0xe60] ss:$16 sps:$4 sm:$0xff]   ;;  %v8220_v23 = vld [vmem:[%s8660_s9 + $0xfe8] ss:$16 sps:$4 sm:$0xff]  }
 0x477   : > { %4702 = vmatpush1.bf16.msra.mxu0 %v8133_v54  ;;  %4788 = vmatpush1.bf16.msra.mxu1 %v8136_v62  ;;  %v8222_v54 = vld [vmem:[%s8660_s9 + $0xfec] ss:$16 sps:$4 sm:$0xff]   ;;  %v8217_v62 = vld [vmem:[%s8660_s9 + $0xfe0] ss:$16 sps:$4 sm:$0xff]  }
 0x478   : > { %3882 = vst [vmem:[%s9469_s12 + $0x38] sm:$0xff] %v3874_v42  ;;  %v3886_v47 = vpack.c.bf16 %v3874_v42, %v9475_v27  ;;  %4703 = vmatprep.subr.bf16.mxu0 %v8141_v35  ;;  %4789 = vmatprep.subr.bf16.mxu1 %v8144_v39  ;;  %v8163_v27 = vld [vmem:[%s8660_s9 + $0xec0] ss:$16 sps:$4 sm:$0xff]   ;;  %v8225_v35 = vld [vmem:[%s8660_s9 + $0x1004] ss:$16 sps:$4 sm:$0xff]  }
 0x479   : > { %v8228_v39 = vld [vmem:[%s8660_s9 + $0x100c] ss:$16 sps:$4 sm:$0xff]   ;;  %v8223_v42 = vld [vmem:[%s8660_s9 + $0x1000] ss:$16 sps:$4 sm:$0xff]  }
 0x47a   : > { %4731 = vmatprep.mubr.bf16.mxu0 %v3886_v47  ;;  %4817 = vmatprep.mubr.bf16.mxu1 %v3886_v47  ;;  %v8234_v47 = vld [vmem:[%s8660_s9 + $0x102c] ss:$16 sps:$4 sm:$0xff]  }
 0x47b   : > { %4704 = vmatpush1.bf16.msra.mxu0 %v8139_v36  ;;  %4790 = vmatpush1.bf16.msra.mxu1 %v8142_v44  ;;  %v8226_v36 = vld [vmem:[%s8660_s9 + $0x1008] ss:$16 sps:$4 sm:$0xff]   ;;  %v8231_v44 = vld [vmem:[%s8660_s9 + $0x1024] ss:$16 sps:$4 sm:$0xff]  }
 0x47c   : > { %4705 = vmatprep.subr.bf16.mxu0 %v8147_v61  ;;  %4791 = vmatprep.subr.bf16.mxu1 %v8150_v59  ;;  %v8229_v61 = vld [vmem:[%s8660_s9 + $0x1020] ss:$16 sps:$4 sm:$0xff]   ;;  %v8232_v59 = vld [vmem:[%s8660_s9 + $0x1028] ss:$16 sps:$4 sm:$0xff]  }
 0x47f   : > { %4706 = vmatpush1.bf16.msra.mxu0 %v8145_v1  ;;  %4792 = vmatpush1.bf16.msra.mxu1 %v8148_v63  ;;  %v8237_v1 = vld [vmem:[%s8660_s9 + $0x1044] ss:$16 sps:$4 sm:$0xff]   ;;  %v8240_v63 = vld [vmem:[%s8660_s9 + $0x104c] ss:$16 sps:$4 sm:$0xff]  }
 0x480   : > { %4707 = vmatprep.subr.bf16.mxu0 %v8153_v8  ;;  %4793 = vmatprep.subr.bf16.mxu1 %v8156_v50  ;;  %v8235_v8 = vld [vmem:[%s8660_s9 + $0x1040] ss:$16 sps:$4 sm:$0xff]   ;;  %v8238_v50 = vld [vmem:[%s8660_s9 + $0x1048] ss:$16 sps:$4 sm:$0xff]  }
 0x483   : > { %4708 = vmatpush1.bf16.msra.mxu0 %v8151_v45  ;;  %4794 = vmatpush1.bf16.msra.mxu1 %v8154_v49  ;;  %v8246_v45 = vld [vmem:[%s8660_s9 + $0x106c] ss:$16 sps:$4 sm:$0xff]   ;;  %v8241_v49 = vld [vmem:[%s8660_s9 + $0x1060] ss:$16 sps:$4 sm:$0xff]  }
 0x484   : > { %4709 = vmatprep.subr.bf16.mxu0 %v8159_v19  ;;  %4795 = vmatprep.subr.bf16.mxu1 %v8162_v52  ;;  %v8244_v19 = vld [vmem:[%s8660_s9 + $0x1068] ss:$16 sps:$4 sm:$0xff]   ;;  %v8249_v52 = vld [vmem:[%s8660_s9 + $0x1084] ss:$16 sps:$4 sm:$0xff]  }
 0x487   : > { %4710 = vmatpush1.bf16.msra.mxu0 %v8157_v57  ;;  %4796 = vmatpush1.bf16.msra.mxu1 %v8160_v22  ;;  %v8252_v57 = vld [vmem:[%s8660_s9 + $0x108c] ss:$16 sps:$4 sm:$0xff]   ;;  %v8247_v22 = vld [vmem:[%s8660_s9 + $0x1080] ss:$16 sps:$4 sm:$0xff]  }
 0x488   : > { %4711 = vmatprep.subr.bf16.mxu0 %v8165_v26  ;;  %4797 = vmatprep.subr.bf16.mxu1 %v8168_v41  ;;  %v8250_v26 = vld [vmem:[%s8660_s9 + $0x1088] ss:$16 sps:$4 sm:$0xff]   ;;  %v8255_v41 = vld [vmem:[%s8660_s9 + $0x10a4] ss:$16 sps:$4 sm:$0xff]  }
 0x48b   : > { %4712 = vmatpush1.bf16.msra.mxu0 %v8163_v27  ;;  %4798 = vmatpush1.bf16.msra.mxu1 %v8166_v2  ;;  %v8258_v27 = vld [vmem:[%s8660_s9 + $0x10ac] ss:$16 sps:$4 sm:$0xff]   ;;  %v8253_v2 = vld [vmem:[%s8660_s9 + $0x10a0] ss:$16 sps:$4 sm:$0xff]  }
 0x48c   : > { %4713 = vmatprep.subr.bf16.mxu0 %v8171_v14  ;;  %4799 = vmatprep.subr.bf16.mxu1 %v8174_v43  ;;  %v8256_v14 = vld [vmem:[%s8660_s9 + $0x10a8] ss:$16 sps:$4 sm:$0xff]   ;;  %v8261_v43 = vld [vmem:[%s8660_s9 + $0x10c4] ss:$16 sps:$4 sm:$0xff]  }
 0x48f   : > { %4714 = vmatpush1.bf16.msra.mxu0 %v8169_v60  ;;  %4800 = vmatpush1.bf16.msra.mxu1 %v8172_v53  ;;  %v8264_v60 = vld [vmem:[%s8660_s9 + $0x10cc] ss:$16 sps:$4 sm:$0xff]   ;;  %v8259_v53 = vld [vmem:[%s8660_s9 + $0x10c0] ss:$16 sps:$4 sm:$0xff]  }
 0x490   : > { %4715 = vmatprep.subr.bf16.mxu0 %v8177_v11  ;;  %4801 = vmatprep.subr.bf16.mxu1 %v8180_v3  ;;  %v8262_v11 = vld [vmem:[%s8660_s9 + $0x10c8] ss:$16 sps:$4 sm:$0xff]   ;;  %v8267_v3 = vld [vmem:[%s8660_s9 + $0x10e4] ss:$16 sps:$4 sm:$0xff]  }
 0x493   : > { %4716 = vmatpush1.bf16.msra.mxu0 %v8175_v5  ;;  %4802 = vmatpush1.bf16.msra.mxu1 %v8178_v58  ;;  %v8270_v5 = vld [vmem:[%s8660_s9 + $0x10ec] ss:$16 sps:$4 sm:$0xff]   ;;  %v8265_v58 = vld [vmem:[%s8660_s9 + $0x10e0] ss:$16 sps:$4 sm:$0xff]  }
 0x494   : > { %4717 = vmatprep.subr.bf16.mxu0 %v8183_v6  ;;  %4803 = vmatprep.subr.bf16.mxu1 %v8186_v48  ;;  %v8268_v6 = vld [vmem:[%s8660_s9 + $0x10e8] ss:$16 sps:$4 sm:$0xff]   ;;  %v8273_v48 = vld [vmem:[%s8660_s9 + $0x1104] ss:$16 sps:$4 sm:$0xff]  }
 0x497   : > { %4718 = vmatpush1.bf16.msra.mxu0 %v8181_v31  ;;  %4804 = vmatpush1.bf16.msra.mxu1 %v8184_v38  ;;  %v8276_v31 = vld [vmem:[%s8660_s9 + $0x110c] ss:$16 sps:$4 sm:$0xff]   ;;  %v8271_v38 = vld [vmem:[%s8660_s9 + $0x1100] ss:$16 sps:$4 sm:$0xff]  }
 0x498   : > { %4719 = vmatprep.subr.bf16.mxu0 %v8189_v32  ;;  %4805 = vmatprep.subr.bf16.mxu1 %v8192_v15  ;;  %v8274_v32 = vld [vmem:[%s8660_s9 + $0x1108] ss:$16 sps:$4 sm:$0xff]   ;;  %v8279_v15 = vld [vmem:[%s8660_s9 + $0x1124] ss:$16 sps:$4 sm:$0xff]  }
 0x49b   : > { %4720 = vmatpush1.bf16.msra.mxu0 %v8187_v37  ;;  %4806 = vmatpush1.bf16.msra.mxu1 %v8190_v46  ;;  %v8282_v37 = vld [vmem:[%s8660_s9 + $0x112c] ss:$16 sps:$4 sm:$0xff]   ;;  %v8277_v46 = vld [vmem:[%s8660_s9 + $0x1120] ss:$16 sps:$4 sm:$0xff]  }
 0x49c   : > { %4721 = vmatprep.subr.bf16.mxu0 %v8195_v34  ;;  %4807 = vmatprep.subr.bf16.mxu1 %v8198_v29  ;;  %v8280_v34 = vld [vmem:[%s8660_s9 + $0x1128] ss:$16 sps:$4 sm:$0xff]   ;;  %v8285_v29 = vld [vmem:[%s8660_s9 + $0x1144] ss:$16 sps:$4 sm:$0xff]  }
 0x49f   : > { %4722 = vmatpush1.bf16.msra.mxu0 %v8193_v28  ;;  %4808 = vmatpush1.bf16.msra.mxu1 %v8196_v25  ;;  %v8288_v28 = vld [vmem:[%s8660_s9 + $0x114c] ss:$16 sps:$4 sm:$0xff]   ;;  %v8283_v25 = vld [vmem:[%s8660_s9 + $0x1140] ss:$16 sps:$4 sm:$0xff]  }
 0x4a0   : > { %4723 = vmatprep.subr.bf16.mxu0 %v8201_v12  ;;  %4809 = vmatprep.subr.bf16.mxu1 %v8204_v20  ;;  %v8286_v12 = vld [vmem:[%s8660_s9 + $0x1148] ss:$16 sps:$4 sm:$0xff]   ;;  %v8291_v20 = vld [vmem:[%s8660_s9 + $0x1164] ss:$16 sps:$4 sm:$0xff]  }
 0x4a3   : > { %4724 = vmatpush1.bf16.msra.mxu0 %v8199_v55  ;;  %4810 = vmatpush1.bf16.msra.mxu1 %v8202_v16  ;;  %v8294_v55 = vld [vmem:[%s8660_s9 + $0x116c] ss:$16 sps:$4 sm:$0xff]   ;;  %v8289_v16 = vld [vmem:[%s8660_s9 + $0x1160] ss:$16 sps:$4 sm:$0xff]  }
 0x4a4   : > { %4725 = vmatprep.subr.bf16.mxu0 %v8207_v56  ;;  %4811 = vmatprep.subr.bf16.mxu1 %v8210_v51  ;;  %v8292_v56 = vld [vmem:[%s8660_s9 + $0x1168] ss:$16 sps:$4 sm:$0xff]   ;;  %v8297_v51 = vld [vmem:[%s8660_s9 + $0x1184] ss:$16 sps:$4 sm:$0xff]  }
 0x4a7   : > { %4726 = vmatpush1.bf16.msra.mxu0 %v8205_v7  ;;  %4812 = vmatpush1.bf16.msra.mxu1 %v8208_v13  ;;  %v8300_v7 = vld [vmem:[%s8660_s9 + $0x118c] ss:$16 sps:$4 sm:$0xff]   ;;  %v8295_v13 = vld [vmem:[%s8660_s9 + $0x1180] ss:$16 sps:$4 sm:$0xff]  }
 0x4a8   : > { %4727 = vmatprep.subr.bf16.mxu0 %v8213_v33  ;;  %4813 = vmatprep.subr.bf16.mxu1 %v8216_v18  ;;  %v8298_v33 = vld [vmem:[%s8660_s9 + $0x1188] ss:$16 sps:$4 sm:$0xff]   ;;  %v8303_v18 = vld [vmem:[%s8660_s9 + $0x11a4] ss:$16 sps:$4 sm:$0xff]  }
 0x4ab   : > { %4728 = vmatpush1.bf16.msra.mxu0 %v8211_v21  ;;  %4814 = vmatpush1.bf16.msra.mxu1 %v8214_v30  ;;  %v8306_v21 = vld [vmem:[%s8660_s9 + $0x11ac] ss:$16 sps:$4 sm:$0xff]   ;;  %v8301_v30 = vld [vmem:[%s8660_s9 + $0x11a0] ss:$16 sps:$4 sm:$0xff]  }
 0x4ac   : > { %4729 = vmatprep.subr.bf16.mxu0 %v8219_v24  ;;  %4815 = vmatprep.subr.bf16.mxu1 %v8222_v54  ;;  %v8304_v24 = vld [vmem:[%s8660_s9 + $0x11a8] ss:$16 sps:$4 sm:$0xff]   ;;  %v8309_v54 = vld [vmem:[%s8660_s9 + $0x11c4] ss:$16 sps:$4 sm:$0xff]  }
 0x4af   : > { %4730 = vmatpush1.bf16.msra.mxu0 %v8217_v62  ;;  %4816 = vmatpush1.bf16.msra.mxu1 %v8220_v23  ;;  %v8312_v62 = vld [vmem:[%s8660_s9 + $0x11cc] ss:$16 sps:$4 sm:$0xff]   ;;  %v8307_v23 = vld [vmem:[%s8660_s9 + $0x11c0] ss:$16 sps:$4 sm:$0xff]  }
 0x4b0   : > { %5870 = vmatprep.subr.bf16.mxu0 %v8225_v35  ;;  %5956 = vmatprep.subr.bf16.mxu1 %v8228_v39  ;;  %v8310_v35 = vld [vmem:[%s8660_s9 + $0x11c8] ss:$16 sps:$4 sm:$0xff]   ;;  %v8315_v39 = vld [vmem:[%s8660_s9 + $0x11e4] ss:$16 sps:$4 sm:$0xff]  }
 0x4b2   : > { %4732 = vmatmul.mubr.bf16.vlgmr.msra.gmra.mrb[12].mxu0 %v9490_v4  ;;  %4818 = vmatmul.mubr.bf16.vlgmr.msra.gmra.mrb[12].mxu1 %v9490_v4  ;;  %v8243_v4 = vld [vmem:[%s8660_s9 + $0x1064] ss:$16 sps:$4 sm:$0xff]  }
 0x4b3   : > { %5871 = vmatpush1.bf16.msra.mxu0 %v8223_v42  ;;  %5957 = vmatpush1.bf16.msra.mxu1 %v8226_v36  ;;  %v8313_v42 = vld [vmem:[%s8660_s9 + $0x11e0] ss:$16 sps:$4 sm:$0xff]   ;;  %v8316_v36 = vld [vmem:[%s8660_s9 + $0x11e8] ss:$16 sps:$4 sm:$0xff]  }
 0x4b4   : > { %5872 = vmatprep.subr.bf16.mxu0 %v8231_v44  ;;  %5958 = vmatprep.subr.bf16.mxu1 %v8234_v47  ;;  %v8318_v44 = vld [vmem:[%s8660_s9 + $0x11ec] ss:$16 sps:$4 sm:$0xff]   ;;  %v8321_v47 = vld [vmem:[%s8660_s9 + $0x1204] ss:$16 sps:$4 sm:$0xff]  }
 0x4b7   : > { %5873 = vmatpush1.bf16.msra.mxu0 %v8229_v61  ;;  %5959 = vmatpush1.bf16.msra.mxu1 %v8232_v59  ;;  %v8324_v61 = vld [vmem:[%s8660_s9 + $0x120c] ss:$16 sps:$4 sm:$0xff]  }
 0x4b8   : > { %5874 = vmatprep.subr.bf16.mxu0 %v8237_v1  ;;  %5960 = vmatprep.subr.bf16.mxu1 %v8240_v63 }
 0x4bb   : > { %5875 = vmatpush1.bf16.msra.mxu0 %v8235_v8  ;;  %5961 = vmatpush1.bf16.msra.mxu1 %v8238_v50 }
 0x4bc   : > { %5876 = vmatprep.subr.bf16.mxu0 %v8243_v4  ;;  %5962 = vmatprep.subr.bf16.mxu1 %v8246_v45 }
 0x4bf   : > { %5877 = vmatpush1.bf16.msra.mxu0 %v8241_v49  ;;  %5963 = vmatpush1.bf16.msra.mxu1 %v8244_v19 }
 0x4c0   : > { %5878 = vmatprep.subr.bf16.mxu0 %v8249_v52  ;;  %5964 = vmatprep.subr.bf16.mxu1 %v8252_v57 }
 0x4c3   : > { %5879 = vmatpush1.bf16.msra.mxu0 %v8247_v22  ;;  %5965 = vmatpush1.bf16.msra.mxu1 %v8250_v26 }
 0x4c4   : > { %5880 = vmatprep.subr.bf16.mxu0 %v8255_v41  ;;  %5966 = vmatprep.subr.bf16.mxu1 %v8258_v27 }
 0x4c7   : > { %5881 = vmatpush1.bf16.msra.mxu0 %v8253_v2  ;;  %5967 = vmatpush1.bf16.msra.mxu1 %v8256_v14 }
 0x4c8   : > { %5882 = vmatprep.subr.bf16.mxu0 %v8261_v43  ;;  %5968 = vmatprep.subr.bf16.mxu1 %v8264_v60 }
 0x4cb   : > { %5883 = vmatpush1.bf16.msra.mxu0 %v8259_v53  ;;  %5969 = vmatpush1.bf16.msra.mxu1 %v8262_v11 }
 0x4cc   : > { %5884 = vmatprep.subr.bf16.mxu0 %v8267_v3  ;;  %5970 = vmatprep.subr.bf16.mxu1 %v8270_v5 }
 0x4cf   : > { %5885 = vmatpush1.bf16.msra.mxu0 %v8265_v58  ;;  %5971 = vmatpush1.bf16.msra.mxu1 %v8268_v6 }
 0x4d0   : > { %5886 = vmatprep.subr.bf16.mxu0 %v8273_v48  ;;  %5972 = vmatprep.subr.bf16.mxu1 %v8276_v31 }
 0x4d3   : > { %5887 = vmatpush1.bf16.msra.mxu0 %v8271_v38  ;;  %5973 = vmatpush1.bf16.msra.mxu1 %v8274_v32 }
 0x4d4   : > { %5888 = vmatprep.subr.bf16.mxu0 %v8279_v15  ;;  %5974 = vmatprep.subr.bf16.mxu1 %v8282_v37 }
 0x4d7   : > { %5889 = vmatpush1.bf16.msra.mxu0 %v8277_v46  ;;  %5975 = vmatpush1.bf16.msra.mxu1 %v8280_v34 }
 0x4d8   : > { %5890 = vmatprep.subr.bf16.mxu0 %v8285_v29  ;;  %5976 = vmatprep.subr.bf16.mxu1 %v8288_v28 }
 0x4db   : > { %5891 = vmatpush1.bf16.msra.mxu0 %v8283_v25  ;;  %5977 = vmatpush1.bf16.msra.mxu1 %v8286_v12 }
 0x4dc   : > { %5892 = vmatprep.subr.bf16.mxu0 %v8291_v20  ;;  %5978 = vmatprep.subr.bf16.mxu1 %v8294_v55 }
 0x4df   : > { %5893 = vmatpush1.bf16.msra.mxu0 %v8289_v16  ;;  %5979 = vmatpush1.bf16.msra.mxu1 %v8292_v56 }
 0x4e0   : > { %5894 = vmatprep.subr.bf16.mxu0 %v8297_v51  ;;  %5980 = vmatprep.subr.bf16.mxu1 %v8300_v7 }
 0x4e3   : > { %5895 = vmatpush1.bf16.msra.mxu0 %v8295_v13  ;;  %5981 = vmatpush1.bf16.msra.mxu1 %v8298_v33 }
 0x4e4   : > { %5896 = vmatprep.subr.bf16.mxu0 %v8303_v18  ;;  %5982 = vmatprep.subr.bf16.mxu1 %v8306_v21 }
 0x4e7   : > { %5897 = vmatpush1.bf16.msra.mxu0 %v8301_v30  ;;  %5983 = vmatpush1.bf16.msra.mxu1 %v8304_v24 }
 0x4e8   : > { %5898 = vmatprep.subr.bf16.mxu0 %v8309_v54  ;;  %5984 = vmatprep.subr.bf16.mxu1 %v8312_v62 }
 0x4eb   : > { %5899 = vmatpush1.bf16.msra.mxu0 %v8307_v23  ;;  %5985 = vmatpush1.bf16.msra.mxu1 %v8310_v35 }
 0x4ec   : > { %5900 = vmatprep.subr.bf16.mxu0 %v8315_v39  ;;  %5986 = vmatprep.subr.bf16.mxu1 %v8318_v44 }
 0x4ef   : > { %5901 = vmatpush1.bf16.msra.mxu0 %v8313_v42  ;;  %5987 = vmatpush1.bf16.msra.mxu1 %v8316_v36 }
 0x4f0   : > { %5913 = vmatprep.subr.bf16.mxu0 %v8321_v47  ;;  %5999 = vmatprep.subr.bf16.mxu1 %v8324_v61 }
 0x585   : > { %v9629_v59 = vpop.f32.mrb[12].mxu0  ;;  %v9631_v1 = vpop.f32.mrb[12].mxu1 }
 0x586   : > { %v4832_v63 = vmul.f32 %v8881_v17, %v9629_v59  ;;  %v4834_v8 = vmul.f32 %v8881_v17, %v9631_v1  ;;  %v9637_v50 = vpop.f32.mrb[13].mxu0  ;;  %v9639_v4 = vpop.f32.mrb[13].mxu1 }
 0x587   : > { %v4833_v45 = vmul.f32 %v8881_v17, %v9637_v50  ;;  %v4835_v49 = vmul.f32 %v8881_v17, %v9639_v4  ;;  %v9645_v19 = vpop.f32.mrb[14].mxu0  ;;  %v9647_v52 = vpop.f32.mrb[14].mxu1 }
 0x588   : > { %v4840_v57 = vrot.slane %v4832_v63, 4  ;;  %v4896_v22 = vmul.f32 %v4832_v63, %v9629_v59  ;;  %v4852_v26 = vrot.slane %v4834_v8, 4  ;;  %v4898_v41 = vmul.f32 %v4834_v8, %v9631_v1  ;;  %v9651_v27 = vpop.f32.mrb[15].mxu0  ;;  %v9653_v2 = vpop.f32.mrb[15].mxu1 }
 0x589   : > { %v4846_v14 = vrot.slane %v4833_v45, 4  ;;  %v4897_v43 = vmul.f32 %v4833_v45, %v9637_v50  ;;  %v4858_v60 = vrot.slane %v4835_v49, 4  ;;  %v4899_v53 = vmul.f32 %v4835_v49, %v9639_v4 }
 0x58a   : > { %v4841_v11 = vadd.f32 %v4840_v57, %v4832_v63  ;;  %v4904_v3 = vrot.slane %v4896_v22, 4  ;;  %v4853_v5 = vadd.f32 %v4852_v26, %v4834_v8  ;;  %v4916_v58 = vrot.slane %v4898_v41, 4  ;;  %v9660_v8 = vld [vmem:[%s8915_s8 + $0x6] ss:$8 sm:$0xf] }
 0x58b   : > { %v4847_v6 = vadd.f32 %v4846_v14, %v4833_v45  ;;  %v4910_v48 = vrot.slane %v4897_v43, 4  ;;  %v4859_v31 = vadd.f32 %v4858_v60, %v4835_v49  ;;  %v4922_v38 = vrot.slane %v4899_v53, 4  ;;  %v9663_v49 = vld [vmem:[%s8915_s8 + $0x7] ss:$8 sm:$0xf] }
 0x58c   : > { %v4842_v32 = vrot.slane %v4841_v11, 2  ;;  %v4905_v15 = vadd.f32 %v4904_v3, %v4896_v22  ;;  %v4854_v37 = vrot.slane %v4853_v5, 2  ;;  %v4917_v46 = vadd.f32 %v4916_v58, %v4898_v41 }
 0x58d   : > { %v4848_v34 = vrot.slane %v4847_v6, 2  ;;  %v4911_v29 = vadd.f32 %v4910_v48, %v4897_v43  ;;  %v4860_v28 = vrot.slane %v4859_v31, 2  ;;  %v4923_v25 = vadd.f32 %v4922_v38, %v4899_v53 }
 0x58e   : > { %v4843_v12 = vadd.f32 %v4842_v32, %v4841_v11  ;;  %v4906_v20 = vrot.slane %v4905_v15, 2  ;;  %v4855_v55 = vadd.f32 %v4854_v37, %v4853_v5  ;;  %v4918_v16 = vrot.slane %v4917_v46, 2 }
 0x58f   : > { %v4849_v56 = vadd.f32 %v4848_v34, %v4847_v6  ;;  %v4912_v51 = vrot.slane %v4911_v29, 2  ;;  %v4861_v7 = vadd.f32 %v4860_v28, %v4859_v31  ;;  %v4924_v13 = vrot.slane %v4923_v25, 2 }
 0x590   : > { %v4844_v33 = vrot.slane %v4843_v12, 1  ;;  %v4907_v18 = vadd.f32 %v4906_v20, %v4905_v15  ;;  %v4856_v21 = vrot.slane %v4855_v55, 1  ;;  %v4919_v30 = vadd.f32 %v4918_v16, %v4917_v46 }
 0x591   : > { %v4850_v24 = vrot.slane %v4849_v56, 1  ;;  %v4913_v54 = vadd.f32 %v4912_v51, %v4911_v29  ;;  %v4862_v62 = vrot.slane %v4861_v7, 1  ;;  %v4925_v42 = vadd.f32 %v4924_v13, %v4923_v25 }
 0x592   : > { %v4908_v23 = vrot.slane %v4907_v18, 1  ;;  %v4857_v35 = vadd.f32 %v4856_v21, %v4855_v55  ;;  %v4920_v39 = vrot.slane %v4919_v30, 1  ;;  %v4845_v36 = vadd.f32 %v4844_v33, %v4843_v12 }
 0x593   : > { %v4851_v61 = vadd.f32 %v4850_v24, %v4849_v56  ;;  %v4914_v63 = vrot.slane %v4913_v54, 1  ;;  %v4863_v45 = vadd.f32 %v4862_v62, %v4861_v7  ;;  %v4926_v26 = vrot.slane %v4925_v42, 1 }
 0x594   : > { %v9657_v44 = vmul.f32 0.5, %v4857_v35  ;;  %v4921_v47 = vadd.f32 %v4920_v39, %v4919_v30  ;;  %v4909_v57 = vadd.f32 %v4908_v23, %v4907_v18  ;;  %v9665_v41 = vmul.f32 0.5, %v4845_v36 }
 0x595   : > { %v9671_v43 = vrot.slane %v9660_v8, %v8918_v10  ;;  %v9673_v60 = vmul.f32 0.5, %v4851_v61  ;;  %v4915_v53 = vadd.f32 %v4914_v63, %v4913_v54  ;;  %v9677_v3 = vrot.slane %v9663_v49, %v8918_v10 }
 0x596   : > { %v4954_v22 = vmul.f32 0.5, %v4921_v47  ;;  %v4962_v14 = vmul.f32 %v9657_v44, %v9657_v44  ;;  %v9679_v5 = vmul.f32 0.5, %v4863_v45  ;;  %v4836_v58 = vmul.f32 %v8881_v17, %v9645_v19 }
 0x597   : > { %v4952_v6 = vmul.f32 0.5, %v4909_v57  ;;  %v4927_v48 = vadd.f32 %v4926_v26, %v4925_v42  ;;  %v4838_v31 = vmul.f32 %v8881_v17, %v9647_v52  ;;  %v4837_v38 = vmul.f32 %v8881_v17, %v9651_v27 }
 0x598   : > { %v4970_v11 = vsub.f32 %v4954_v22, %v4962_v14  ;;  %v4960_v32 = vmul.f32 %v9665_v41, %v9665_v41  ;;  %v4864_v37 = vrot.slane %v4836_v58, 4  ;;  %v4900_v46 = vmul.f32 %v4836_v58, %v9645_v19 }
 0x599   : > { %v4953_v34 = vmul.f32 0.5, %v4915_v53  ;;  %v4961_v29 = vmul.f32 %v9673_v60, %v9673_v60  ;;  %v4876_v28 = vrot.slane %v4838_v31, 4  ;;  %v4902_v25 = vmul.f32 %v4838_v31, %v9647_v52 }
 0x59a   : > { %v4986_v15 = vadd.f32 1e-05, %v4970_v11  ;;  %v4865_v12 = vadd.f32 %v4864_v37, %v4836_v58  ;;  %v4928_v20 = vrot.slane %v4900_v46, 4  ;;  %v4870_v55 = vrot.slane %v4837_v38, 4 }
 0x59b   : > { %v4978_v16 = vsub.f32 %v9631_v1, %v9657_v44  ;;  %v4877_v56 = vadd.f32 %v4876_v28, %v4838_v31  ;;  %v4940_v51 = vrot.slane %v4902_v25, 4  ;;  %v4901_v7 = vmul.f32 %v4837_v38, %v9651_v27 }
 0x59c   : > { %8463 = vrsqrt.f32 %v4986_v15  ;;  %v4968_v13 = vsub.f32 %v4952_v6, %v4960_v32  ;;  %v4866_v33 = vrot.slane %v4865_v12, 2  ;;  %v4929_v18 = vadd.f32 %v4928_v20, %v4900_v46 }
 0x59d   : > { %v4871_v21 = vadd.f32 %v4870_v55, %v4837_v38  ;;  %v4878_v30 = vrot.slane %v4877_v56, 2  ;;  %v4941_v24 = vadd.f32 %v4940_v51, %v4902_v25  ;;  %v4934_v54 = vrot.slane %v4901_v7, 4 }
 0x59e   : > { %v4839_v62 = vmul.f32 %v8881_v17, %v9653_v2  ;;  %v4969_v23 = vsub.f32 %v4953_v34, %v4961_v29  ;;  %v4867_v35 = vadd.f32 %v4866_v33, %v4865_v12  ;;  %v4930_v39 = vrot.slane %v4929_v18, 2 }
 0x59f   : > { %v4872_v42 = vrot.slane %v4871_v21, 2  ;;  %v4879_v36 = vadd.f32 %v4878_v30, %v4877_v56  ;;  %v4942_v1 = vrot.slane %v4941_v24, 2  ;;  %v4935_v44 = vadd.f32 %v4934_v54, %v4901_v7 }
 0x5a0   : > { %v4882_v47 = vrot.slane %v4839_v62, 4  ;;  %v4984_v61 = vadd.f32 1e-05, %v4968_v13  ;;  %v4868_v63 = vrot.slane %v4867_v35, 1  ;;  %v4931_v45 = vadd.f32 %v4930_v39, %v4929_v18 }
 0x5a1   : > { %v4873_v57 = vadd.f32 %v4872_v42, %v4871_v21  ;;  %v4955_v22 = vmul.f32 0.5, %v4927_v48  ;;  %v4880_v26 = vrot.slane %v4879_v36, 1  ;;  %v4943_v14 = vadd.f32 %v4942_v1, %v4941_v24 }
 0x5a2   : > { %v4936_v53 = vrot.slane %v4935_v44, 2  ;;  %v4869_v11 = vadd.f32 %v4868_v63, %v4867_v35  ;;  %v4932_v58 = vrot.slane %v4931_v45, 1  ;;  %v4883_v17 = vadd.f32 %v4882_v47, %v4839_v62 }
 0x5a3   : > { %v4874_v6 = vrot.slane %v4873_v57, 1  ;;  %v4881_v31 = vadd.f32 %v4880_v26, %v4879_v36  ;;  %v4944_v38 = vrot.slane %v4943_v14, 1  ;;  %v4903_v15 = vmul.f32 %v4839_v62, %v9653_v2 }
 0x5a4   : > { %v4937_v32 = vadd.f32 %v4936_v53, %v4935_v44  ;;  %8465 = vrsqrt.f32 %v4984_v61  ;;  %v4985_v46 = vadd.f32 1e-05, %v4969_v23  ;;  %v4892_v34 = vmul.f32 0.5, %v4869_v11 }
 0x5a5   : > { %v4933_v29 = vadd.f32 %v4932_v58, %v4931_v45  ;;  %v4894_v25 = vmul.f32 0.5, %v4881_v31  ;;  %v4945_v48 = vadd.f32 %v4944_v38, %v4943_v14  ;;  %v4875_v12 = vadd.f32 %v4874_v6, %v4873_v57 }
 0x5a6   : > { %v8464_v37 = vpop.eup %8463  ;;  %v4964_v55 = vmul.f32 %v4892_v34, %v4892_v34  ;;  %v4938_v56 = vrot.slane %v4937_v32, 1  ;;  %v4884_v51 = vrot.slane %v4883_v17, 2  ;;  %v4963_v13 = vmul.f32 %v9679_v5, %v9679_v5 }
 0x5a7   : > { %v5002_v28 = vmul.f32 %v8464_v37, %v4978_v16  ;;  %v4956_v20 = vmul.f32 0.5, %v4933_v29  ;;  %v4958_v33 = vmul.f32 0.5, %v4945_v48  ;;  %v4946_v18 = vrot.slane %v4903_v15, 4 }
 0x5a8   : > { %v4966_v30 = vmul.f32 %v4894_v25, %v4894_v25  ;;  %8467 = vrsqrt.f32 %v4985_v46  ;;  %v4893_v16 = vmul.f32 0.5, %v4875_v12  ;;  %v4939_v23 = vadd.f32 %v4938_v56, %v4937_v32 }
 0x5a9   : > { %v5031_v7 = vmul.f32 %v9671_v43, %v5002_v28  ;;  %v4972_v21 = vsub.f32 %v4956_v20, %v4964_v55  ;;  %v4885_v35 = vadd.f32 %v4884_v51, %v4883_v17  ;;  %v4971_v39 = vsub.f32 %v4955_v22, %v4963_v13 }
 0x5aa   : > { %v4974_v62 = vsub.f32 %v4958_v33, %v4966_v30  ;;  %v4965_v42 = vmul.f32 %v4893_v16, %v4893_v16  ;;  %v4947_v36 = vadd.f32 %v4946_v18, %v4903_v15  ;;  %v4957_v44 = vmul.f32 0.5, %v4939_v23 }
 0x5ab   : > { %v9703_v24 = vadd.f32 %v9677_v3, %v5031_v7  ;;  %v4988_v54 = vadd.f32 1e-05, %v4972_v21  ;;  %v4886_v47 = vrot.slane %v4885_v35, 1  ;;  %v4976_v26 = vsub.f32 %v9629_v59, %v9665_v41 }
 0x5ac   : > { %v4990_v1 = vadd.f32 1e-05, %v4974_v62  ;;  %v4948_v61 = vrot.slane %v4947_v36, 2  ;;  %v4973_v45 = vsub.f32 %v4957_v44, %v4965_v42  ;;  %v4987_v14 = vadd.f32 1e-05, %v4971_v39 }
 0x5ad   : > { %8469 = vrsqrt.f32 %v4988_v54  ;;  %v4887_v57 = vadd.f32 %v4886_v47, %v4885_v35  ;;  %v5012_v22 = vrot.slane %v9660_v8, %v8969_v9  ;;  %v4977_v15 = vsub.f32 %v9637_v50, %v9673_v60 }
 0x5ae   : > { %v8466_v63 = vpop.eup %8465  ;;  %8471 = vrsqrt.f32 %v4990_v1  ;;  %v4949_v53 = vadd.f32 %v4948_v61, %v4947_v36  ;;  %v4989_v11 = vadd.f32 1e-05, %v4973_v45  ;;  %v5041_v59 = vrot.slane %v9663_v49, %v8969_v9  ;;  %v8319_v45 = vld [vmem:[%s8660_s9 + $0x1200] ss:$16 sps:$4 sm:$0xff]  }
 0x5af   : > { %v4895_v58 = vmul.f32 0.5, %v4887_v57  ;;  %v5000_v6 = vmul.f32 %v8466_v63, %v4976_v26  ;;  %v4980_v41 = vsub.f32 %v9645_v19, %v4892_v34  ;;  %v5016_v48 = vrot.slane %v9660_v8, %v8976_v40  ;;  %v8322_v57 = vld [vmem:[%s8660_s9 + $0x1208] ss:$16 sps:$4 sm:$0xff]  }
 0x5b0   : > { %v4950_v17 = vrot.slane %v4949_v53, 1  ;;  %8473 = vrsqrt.f32 %v4989_v11  ;;  %v4982_v20 = vsub.f32 %v9647_v52, %v4894_v25  ;;  %v5045_v33 = vrot.slane %v9663_v49, %v8976_v40  ;;  %v8328_v11 = vld [vmem:[%s8660_s9 + $0x1228] ss:$16 sps:$4 sm:$0xff]  }
 0x5b1   : > { %8475 = vrsqrt.f32 %v4987_v14  ;;  %v4967_v32 = vmul.f32 %v4895_v58, %v4895_v58  ;;  %v5029_v37 = vmul.f32 %v5012_v22, %v5000_v6  ;;  %v4981_v18 = vsub.f32 %v9651_v27, %v4893_v16  ;;  %v8330_v14 = vld [vmem:[%s8660_s9 + $0x122c] ss:$16 sps:$4 sm:$0xff]   ;;  %v8333_v6 = vld [vmem:[%s8660_s9 + $0x1244] ss:$16 sps:$4 sm:$0xff]  }
 0x5b2   : > { %v8468_v31 = vpop.eup %8467  ;;  %v4951_v38 = vadd.f32 %v4950_v17, %v4949_v53  ;;  %v4979_v23 = vsub.f32 %v9639_v4, %v9679_v5  ;;  %v4983_v5 = vsub.f32 %v9653_v2, %v4895_v58  ;;  %v5053_v61 = vrot.slane %v9663_v49, %v8991_v0  ;;  %v8325_v49 = vld [vmem:[%s8660_s9 + $0x1220] ss:$16 sps:$4 sm:$0xff]  }
 0x5b3   : > { %v5001_v28 = vmul.f32 %v8468_v31, %v4977_v15  ;;  %v5058_v51 = vadd.f32 %v5041_v59, %v5029_v37  ;;  %v8339_v37 = vld [vmem:[%s8660_s9 + $0x1264] ss:$16 sps:$4 sm:$0xff]  }
 0x5b4   : > { %v4959_v46 = vmul.f32 0.5, %v4951_v38  ;;  %v8331_v38 = vld [vmem:[%s8660_s9 + $0x1240] ss:$16 sps:$4 sm:$0xff]  }
 0x5b5   : > { %v5030_v13 = vmul.f32 %v5016_v48, %v5001_v28  ;;  %v5066_v54 = vmax.f32 %v5058_v51, 0.0  ;;  %v8348_v28 = vld [vmem:[%s8660_s9 + $0x128c] ss:$16 sps:$4 sm:$0xff]   ;;  %v8352_v51 = vld [vmem:[%s8660_s9 + $0x12a8] ss:$16 sps:$4 sm:$0xff]  }
 0x5b6   : > { %v4975_v55 = vsub.f32 %v4959_v46, %v4967_v32  ;;  %v8334_v32 = vld [vmem:[%s8660_s9 + $0x1248] ss:$16 sps:$4 sm:$0xff]  }
 0x5b7   : > { %v8470_v29 = vpop.eup %8469  ;;  %v5059_v35 = vadd.f32 %v5045_v33, %v5030_v13  ;;  %v8340_v46 = vld [vmem:[%s8660_s9 + $0x1268] ss:$16 sps:$4 sm:$0xff]  }
 0x5b8   : > { %v5004_v12 = vmul.f32 %v8470_v29, %v4980_v41  ;;  %v8472_v56 = vpop.eup %8471  ;;  %v4991_v60 = vadd.f32 1e-05, %v4975_v55  ;;  %v8337_v41 = vld [vmem:[%s8660_s9 + $0x1260] ss:$16 sps:$4 sm:$0xff]   ;;  %v8345_v29 = vld [vmem:[%s8660_s9 + $0x1284] ss:$16 sps:$4 sm:$0xff]  }
 0x5b9   : > { %v5006_v50 = vmul.f32 %v8472_v56, %v4982_v20  ;;  %v5067_v44 = vmax.f32 %v5059_v35, 0.0  ;;  %v8351_v20 = vld [vmem:[%s8660_s9 + $0x12a4] ss:$16 sps:$4 sm:$0xff]   ;;  %v8354_v55 = vld [vmem:[%s8660_s9 + $0x12ac] ss:$16 sps:$4 sm:$0xff]  }
 0x5ba   : > { %v5033_v7 = vmul.f32 %v5012_v22, %v5004_v12  ;;  %8477 = vrsqrt.f32 %v4991_v60  ;;  %v8474_v21 = vpop.eup %8473  ;;  %v8336_v22 = vld [vmem:[%s8660_s9 + $0x124c] ss:$16 sps:$4 sm:$0xff]   ;;  %v8346_v12 = vld [vmem:[%s8660_s9 + $0x1288] ss:$16 sps:$4 sm:$0xff]   ;;  %v8349_v56 = vld [vmem:[%s8660_s9 + $0x12a0] ss:$16 sps:$4 sm:$0xff]  }
 0x5bb   : > { %v5035_v34 = vmul.f32 %v9671_v43, %v5006_v50  ;;  %v8476_v30 = vpop.eup %8475  ;;  %v5005_v25 = vmul.f32 %v8474_v21, %v4981_v18  ;;  %v5068_v43 = vmax.f32 %v9703_v24, 0.0  ;;  %v8360_v50 = vld [vmem:[%s8660_s9 + $0x12cc] ss:$16 sps:$4 sm:$0xff]   ;;  %v8355_v60 = vld [vmem:[%s8660_s9 + $0x12c0] ss:$16 sps:$4 sm:$0xff]  }
 0x5bc   : > { %v5062_v19 = vadd.f32 %v5041_v59, %v5033_v7  ;;  %v5003_v16 = vmul.f32 %v8476_v30, %v4979_v23  ;;  %v8342_v59 = vld [vmem:[%s8660_s9 + $0x126c] ss:$16 sps:$4 sm:$0xff]   ;;  %v8357_v7 = vld [vmem:[%s8660_s9 + $0x12c4] ss:$16 sps:$4 sm:$0xff]   ;;  %v8358_v13 = vld [vmem:[%s8660_s9 + $0x12c8] ss:$16 sps:$4 sm:$0xff]  }
 0x5bd   : > { %v5064_v52 = vadd.f32 %v9677_v3, %v5035_v34  ;;  %v5034_v39 = vmul.f32 %v5016_v48, %v5005_v25  ;;  %v5024_v3 = vrot.slane %v9660_v8, %v8991_v0  ;;  %v8327_v8 = vld [vmem:[%s8660_s9 + $0x1224] ss:$16 sps:$4 sm:$0xff]   ;;  %v8343_v48 = vld [vmem:[%s8660_s9 + $0x1280] ss:$16 sps:$4 sm:$0xff]   ;;  %v8364_v18 = vld [vmem:[%s8660_s9 + $0x12e8] ss:$16 sps:$4 sm:$0xff]  }
 0x5be   : > { %v5070_v62 = vmax.f32 %v5062_v19, 0.0  ;;  %v8366_v19 = vld [vmem:[%s8660_s9 + $0x12ec] ss:$16 sps:$4 sm:$0xff]   ;;  %v8361_v34 = vld [vmem:[%s8660_s9 + $0x12e0] ss:$16 sps:$4 sm:$0xff]  }
 0x5bf   : > { %v5072_v27 = vmax.f32 %v5064_v52, 0.0  ;;  %v5063_v36 = vadd.f32 %v5045_v33, %v5034_v39  ;;  %v5032_v4 = vmul.f32 %v5024_v3, %v5003_v16  ;;  %v8363_v33 = vld [vmem:[%s8660_s9 + $0x12e4] ss:$16 sps:$4 sm:$0xff]   ;;  %v8372_v30 = vld [vmem:[%s8660_s9 + $0x130c] ss:$16 sps:$4 sm:$0xff]  }
 0x5c0   : > { %v5074_v42 = vpack.c.bf16 %v5070_v62, %v5066_v54  ;;  %v8369_v21 = vld [vmem:[%s8660_s9 + $0x1304] ss:$16 sps:$4 sm:$0xff]   ;;  %v8367_v52 = vld [vmem:[%s8660_s9 + $0x1300] ss:$16 sps:$4 sm:$0xff]   ;;  %v8370_v25 = vld [vmem:[%s8660_s9 + $0x1308] ss:$16 sps:$4 sm:$0xff]  }
 0x5c1   : > { %v9727_v1 = vpack.c.bf16 %v5072_v27, %v5068_v43  ;;  %v5071_v47 = vmax.f32 %v5063_v36, 0.0  ;;  %v5061_v2 = vadd.f32 %v5053_v61, %v5032_v4  ;;  %v8375_v54 = vld [vmem:[%s8660_s9 + $0x1324] ss:$16 sps:$4 sm:$0xff]   ;;  %v8378_v62 = vld [vmem:[%s8660_s9 + $0x132c] ss:$16 sps:$4 sm:$0xff]  }
 0x5c2   : > { %v8373_v23 = vld [vmem:[%s8660_s9 + $0x1320] ss:$16 sps:$4 sm:$0xff]   ;;  %v8376_v35 = vld [vmem:[%s8660_s9 + $0x1328] ss:$16 sps:$4 sm:$0xff]   ;;  %v8381_v39 = vld [vmem:[%s8660_s9 + $0x1344] ss:$16 sps:$4 sm:$0xff]  }
 0x5c3   : > { %v5075_v63 = vpack.c.bf16 %v5071_v47, %v5067_v44  ;;  %v5069_v17 = vmax.f32 %v5061_v2, 0.0  ;;  %v8379_v43 = vld [vmem:[%s8660_s9 + $0x1340] ss:$16 sps:$4 sm:$0xff]   ;;  %v8382_v27 = vld [vmem:[%s8660_s9 + $0x1348] ss:$16 sps:$4 sm:$0xff]  }
 0x5c4   : > { %v8478_v24 = vpop.eup %8477  ;;  %v8387_v16 = vld [vmem:[%s8660_s9 + $0x1364] ss:$16 sps:$4 sm:$0xff]   ;;  %v8385_v36 = vld [vmem:[%s8660_s9 + $0x1360] ss:$16 sps:$4 sm:$0xff]   ;;  %v8388_v44 = vld [vmem:[%s8660_s9 + $0x1368] ss:$16 sps:$4 sm:$0xff]  }
 0x5c5   : > { %v5007_v26 = vmul.f32 %v8478_v24, %v4983_v5  ;;  %5902 = vmatprep.mubr.bf16.mxu0 %v5075_v63  ;;  %5988 = vmatprep.mubr.bf16.mxu1 %v5075_v63  ;;  %v8393_v47 = vld [vmem:[%s8660_s9 + $0x1384] ss:$16 sps:$4 sm:$0xff]   ;;  %v8396_v4 = vld [vmem:[%s8660_s9 + $0x138c] ss:$16 sps:$4 sm:$0xff]   ;;  %v8391_v5 = vld [vmem:[%s8660_s9 + $0x1380] ss:$16 sps:$4 sm:$0xff]  }
 0x5c6   : > { %5903 = vmatmul.mubr.bf16.vlgmr.msra.gmra.mrb[16].mxu0 %v5074_v42  ;;  %5989 = vmatmul.mubr.bf16.vlgmr.msra.gmra.mrb[16].mxu1 %v5074_v42  ;;  %v8384_v42 = vld [vmem:[%s8660_s9 + $0x134c] ss:$16 sps:$4 sm:$0xff]   ;;  %v8399_v24 = vld [vmem:[%s8660_s9 + $0x13a4] ss:$16 sps:$4 sm:$0xff]  }
 0x5c7   : > { %v5036_v53 = vmul.f32 %v5024_v3, %v5007_v26  ;;  %5914 = vmatpush1.bf16.msra.mxu0 %v8319_v45  ;;  %6000 = vmatpush1.bf16.msra.mxu1 %v8322_v57  ;;  %v8390_v3 = vld [vmem:[%s8660_s9 + $0x136c] ss:$16 sps:$4 sm:$0xff]   ;;  %v8397_v45 = vld [vmem:[%s8660_s9 + $0x13a0] ss:$16 sps:$4 sm:$0xff]   ;;  %v8400_v57 = vld [vmem:[%s8660_s9 + $0x13a8] ss:$16 sps:$4 sm:$0xff]  }
 0x5c8   : > { %5915 = vmatprep.subr.bf16.mxu0 %v8327_v8  ;;  %6001 = vmatprep.subr.bf16.mxu1 %v8330_v14  ;;  %v8402_v63 = vld [vmem:[%s8660_s9 + $0x13ac] ss:$16 sps:$4 sm:$0xff]   ;;  %v8405_v26 = vld [vmem:[%s8660_s9 + $0x13c4] ss:$16 sps:$4 sm:$0xff]   ;;  %v8403_v14 = vld [vmem:[%s8660_s9 + $0x13c0] ss:$16 sps:$4 sm:$0xff]  }
 0x5c9   : > { %v5065_v58 = vadd.f32 %v5053_v61, %v5036_v53  ;;  %v8394_v61 = vld [vmem:[%s8660_s9 + $0x1388] ss:$16 sps:$4 sm:$0xff]   ;;  %v8408_v8 = vld [vmem:[%s8660_s9 + $0x13cc] ss:$16 sps:$4 sm:$0xff]   ;;  %v8411_v2 = vld [vmem:[%s8660_s9 + $0x13e4] ss:$16 sps:$4 sm:$0xff]  }
 0x5ca   : > { %v8406_v53 = vld [vmem:[%s8660_s9 + $0x13c8] ss:$16 sps:$4 sm:$0xff]  }
 0x5cb   : > { %v5073_v31 = vmax.f32 %v5065_v58, 0.0  ;;  %5916 = vmatpush1.bf16.msra.mxu0 %v8325_v49  ;;  %6002 = vmatpush1.bf16.msra.mxu1 %v8328_v11  ;;  %v8414_v49 = vld [vmem:[%s8660_s9 + $0x13ec] ss:$16 sps:$4 sm:$0xff]   ;;  %v8409_v11 = vld [vmem:[%s8660_s9 + $0x13e0] ss:$16 sps:$4 sm:$0xff]  }
 0x5cc   : > { %5917 = vmatprep.subr.bf16.mxu0 %v8333_v6  ;;  %6003 = vmatprep.subr.bf16.mxu1 %v8336_v22  ;;  %v8412_v58 = vld [vmem:[%s8660_s9 + $0x13e8] ss:$16 sps:$4 sm:$0xff]  }
 0x5cd   : > { %v5077_v15 = vpack.c.bf16 %v5073_v31, %v5069_v17  ;;  %v7223_v6 = vld [vmem:[%s8915_s8 + $0x20] ss:$8 sm:$0xf] }
 0x5ce   : > { %v5213_v22 = vrot.slane %v7223_v6, %v8969_v9  ;;  %v5221_v17 = vrot.slane %v7223_v6, %v8918_v10  ;;  %v5217_v31 = vrot.slane %v7223_v6, %v8976_v40 }
 0x5cf   : > { %5945 = vmatprep.mubr.bf16.mxu0 %v5077_v15  ;;  %6031 = vmatprep.mubr.bf16.mxu1 %v5077_v15 }
 0x5d0   : > { %5918 = vmatpush1.bf16.msra.mxu0 %v8331_v38  ;;  %6004 = vmatpush1.bf16.msra.mxu1 %v8334_v32  ;;  %v5225_v38 = vrot.slane %v7223_v6, %v8991_v0 }
 0x5d1   : > { %5919 = vmatprep.subr.bf16.mxu0 %v8339_v37  ;;  %6005 = vmatprep.subr.bf16.mxu1 %v8342_v59 }
 0x5d4   : > { %5920 = vmatpush1.bf16.msra.mxu0 %v8337_v41  ;;  %6006 = vmatpush1.bf16.msra.mxu1 %v8340_v46 }
 0x5d5   : > { %5921 = vmatprep.subr.bf16.mxu0 %v8345_v29  ;;  %6007 = vmatprep.subr.bf16.mxu1 %v8348_v28 }
 0x5d8   : > { %5922 = vmatpush1.bf16.msra.mxu0 %v8343_v48  ;;  %6008 = vmatpush1.bf16.msra.mxu1 %v8346_v12 }
 0x5d9   : > { %5923 = vmatprep.subr.bf16.mxu0 %v8351_v20  ;;  %6009 = vmatprep.subr.bf16.mxu1 %v8354_v55 }
 0x5dc   : > { %5924 = vmatpush1.bf16.msra.mxu0 %v8349_v56  ;;  %6010 = vmatpush1.bf16.msra.mxu1 %v8352_v51 }
 0x5dd   : > { %5925 = vmatprep.subr.bf16.mxu0 %v8357_v7  ;;  %6011 = vmatprep.subr.bf16.mxu1 %v8360_v50 }
 0x5e0   : > { %5926 = vmatpush1.bf16.msra.mxu0 %v8355_v60  ;;  %6012 = vmatpush1.bf16.msra.mxu1 %v8358_v13 }
 0x5e1   : > { %5927 = vmatprep.subr.bf16.mxu0 %v8363_v33  ;;  %6013 = vmatprep.subr.bf16.mxu1 %v8366_v19 }
 0x5e4   : > { %5928 = vmatpush1.bf16.msra.mxu0 %v8361_v34  ;;  %6014 = vmatpush1.bf16.msra.mxu1 %v8364_v18 }
 0x5e5   : > { %5929 = vmatprep.subr.bf16.mxu0 %v8369_v21  ;;  %6015 = vmatprep.subr.bf16.mxu1 %v8372_v30 }
 0x5e8   : > { %5930 = vmatpush1.bf16.msra.mxu0 %v8367_v52  ;;  %6016 = vmatpush1.bf16.msra.mxu1 %v8370_v25 }
 0x5e9   : > { %5931 = vmatprep.subr.bf16.mxu0 %v8375_v54  ;;  %6017 = vmatprep.subr.bf16.mxu1 %v8378_v62 }
 0x5ec   : > { %5932 = vmatpush1.bf16.msra.mxu0 %v8373_v23  ;;  %6018 = vmatpush1.bf16.msra.mxu1 %v8376_v35 }
 0x5ed   : > { %5933 = vmatprep.subr.bf16.mxu0 %v8381_v39  ;;  %6019 = vmatprep.subr.bf16.mxu1 %v8384_v42 }
 0x5f0   : > { %5934 = vmatpush1.bf16.msra.mxu0 %v8379_v43  ;;  %6020 = vmatpush1.bf16.msra.mxu1 %v8382_v27 }
 0x5f1   : > { %5935 = vmatprep.subr.bf16.mxu0 %v8387_v16  ;;  %6021 = vmatprep.subr.bf16.mxu1 %v8390_v3 }
 0x5f4   : > { %5936 = vmatpush1.bf16.msra.mxu0 %v8385_v36  ;;  %6022 = vmatpush1.bf16.msra.mxu1 %v8388_v44 }
 0x5f5   : > { %5937 = vmatprep.subr.bf16.mxu0 %v8393_v47  ;;  %6023 = vmatprep.subr.bf16.mxu1 %v8396_v4 }
 0x5f8   : > { %5938 = vmatpush1.bf16.msra.mxu0 %v8391_v5  ;;  %6024 = vmatpush1.bf16.msra.mxu1 %v8394_v61 }
 0x5f9   : > { %5939 = vmatprep.subr.bf16.mxu0 %v8399_v24  ;;  %6025 = vmatprep.subr.bf16.mxu1 %v8402_v63 }
 0x5fc   : > { %5940 = vmatpush1.bf16.msra.mxu0 %v8397_v45  ;;  %6026 = vmatpush1.bf16.msra.mxu1 %v8400_v57 }
 0x5fd   : > { %5941 = vmatprep.subr.bf16.mxu0 %v8405_v26  ;;  %6027 = vmatprep.subr.bf16.mxu1 %v8408_v8 }
 0x600   : > { %5942 = vmatpush1.bf16.msra.mxu0 %v8403_v14  ;;  %6028 = vmatpush1.bf16.msra.mxu1 %v8406_v53 }
 0x601   : > { %5943 = vmatprep.subr.bf16.mxu0 %v8411_v2  ;;  %6029 = vmatprep.subr.bf16.mxu1 %v8414_v49 }
 0x604   : > { %5944 = vmatpush1.bf16.msra.mxu0 %v8409_v11  ;;  %6030 = vmatpush1.bf16.msra.mxu1 %v8412_v58 }
 0x607   : > { %5946 = vmatmul.mubr.bf16.vlgmr.msra.gmra.mrb[16].mxu0 %v9727_v1  ;;  %6032 = vmatmul.mubr.bf16.vlgmr.msra.gmra.mrb[16].mxu1 %v9727_v1 }
 0x6da   : > { %v5947_v32 = vpop.f32.mrb[16].mxu0  ;;  %v6033_v15 = vpop.f32.mrb[16].mxu1 }
 0x6db   : > { %v7362_v37 = vadd.f32 %v5947_v32, %v5213_v22  ;;  %v7366_v59 = vadd.f32 %v6033_v15, %v5221_v17  ;;  %v5949_v41 = vpop.f32.mrb[17].mxu0  ;;  %v6035_v46 = vpop.f32.mrb[17].mxu1 }
 0x6dc   : > { %v7363_v1 = vadd.f32 %v5949_v41, %v5217_v31  ;;  %v7367_v29 = vadd.f32 %v6035_v46, %v5225_v38  ;;  %v5951_v28 = vpop.f32.mrb[18].mxu0  ;;  %v6037_v9 = vpop.f32.mrb[18].mxu1 }
 0x6dd   : > { %6042 = vst [vmem:[%s270_s15] sm:$0xff] %v7362_v37  ;;  %6044 = vst [vmem:[%s270_s15 + $0x10] sm:$0xff] %v7366_v59  ;;  %v7364_v10 = vadd.f32 %v5951_v28, %v5213_v22  ;;  %v7368_v40 = vadd.f32 %v6037_v9, %v5221_v17  ;;  %v5953_v48 = vpop.f32.mrb[19].mxu0  ;;  %v6039_v0 = vpop.f32.mrb[19].mxu1 }
 0x6de   : > { %6043 = vst [vmem:[%s270_s15 + $0x8] sm:$0xff] %v7363_v1  ;;  %6045 = vst [vmem:[%s270_s15 + $0x18] sm:$0xff] %v7367_v29  ;;  %v7365_v12 = vadd.f32 %v5953_v48, %v5217_v31  ;;  %v7369_v20 = vadd.f32 %v6039_v0, %v5225_v38 }
 0x6df   : > { %6046 = vst [vmem:[%s270_s15 + $0x20] sm:$0xff] %v7364_v10  ;;  %6048 = vst [vmem:[%s270_s15 + $0x30] sm:$0xff] %v7368_v40 }
 0x6e0   : > { %6047 = vst [vmem:[%s270_s15 + $0x28] sm:$0xff] %v7365_v12  ;;  %6049 = vst [vmem:[%s270_s15 + $0x38] sm:$0xff] %v7369_v20 }
 0x6e1 PF: > { %p15_p8 = scmp.ge.s32.totalorder %s8596_s20, 4   ;;  %s9826_s15 = smov %s8535_s16 }
 0x6e2   : > { %s9827_s16 = smov %s8539_s17  ;;  %s9828_s17 = smov %s8606_s23 }
 0x6e3   : > { %s9829_s18 = smov %s8596_s20  ;;  %17 = sbr.rel (!%p15_p8) target bundleno = 3 (0x3), region = 102 }
 0x6ea   :  { %6087 = vsyncpa [#allocation3], 1 }
 0x6eb   :  { %6089 = vsyncpa [#allocation3 + $0x1], 1 }

</bundles_post_ra>
